<compile_context>
chip_gen: v6e
topology: v6e:2x2x1
jax: 0.10.0
libtpu: 0.0.40
codegen_flags: <defaults>
</compile_context>

<pallas_src>
import functools

import jax
import jax.numpy as jnp
from jax import lax
from jax.experimental import pallas as pl
from jax.experimental.pallas import tpu as pltpu


VMEM = pltpu.MemorySpace.VMEM
SMEM = pltpu.MemorySpace.SMEM


# ----------------------------- in-kernel helpers -----------------------------

def _mm(a, b):
    """MXU matmul: bf16 operands, f32 accumulation."""
    return jnp.dot(a.astype(jnp.bfloat16), b.astype(jnp.bfloat16),
                   preferred_element_type=jnp.float32)


def _layernorm(x, g, b, eps=1e-5):
    mu = jnp.mean(x, axis=-1, keepdims=True)
    xc = x - mu
    var = jnp.mean(xc * xc, axis=-1, keepdims=True)
    return xc * lax.rsqrt(var + eps) * g + b


# --------------------------------------------------------------------------
# Kernel 1: embedding row gather (SMEM token ids drive dynamic row copies)
# --------------------------------------------------------------------------
def _embed_kernel(ids_ref, tab_ref, out_ref):
    # TODO(synk): for real vocab sizes, switch to a PrefetchScalarGridSpec HBM row gather
    # so the table does not need to be VMEM-resident.
    def body(r, carry):
        row = ids_ref[r]
        out_ref[pl.ds(r, 1), :] = tab_ref[pl.ds(row, 1), :]
        return carry
    lax.fori_loop(0, out_ref.shape[0], body, 0)


def embed(table, ids_flat):
    n = ids_flat.shape[0]
    E = table.shape[1]
    return pl.pallas_call(
        _embed_kernel,
        out_shape=jax.ShapeDtypeStruct((n, E), jnp.float32),
        in_specs=[pl.BlockSpec(memory_space=SMEM),
                  pl.BlockSpec(memory_space=VMEM)],
        out_specs=pl.BlockSpec(memory_space=VMEM),
    )(ids_flat, table)


# --------------------------------------------------------------------------
# Kernel 2: one fused TransformerEncoderLayer (post-norm, relu, eval dropout)
# --------------------------------------------------------------------------
def _encoder_layer_kernel(x_ref, mask_ref,
                          wqkv_ref, bqkv_ref, wo_ref, bo_ref,
                          g1_ref, be1_ref,
                          wf1_ref, bf1_ref, wf2_ref, bf2_ref,
                          g2_ref, be2_ref,
                          o_ref, *, nhead):
    B, T, E = x_ref.shape
    hd = E // nhead
    scale = 1.0 / float(hd) ** 0.5

    x = x_ref[...]                                     # (B, T, E)
    xf = x.reshape(B * T, E)

    # Fused QKV projection: one lane-dense (E, 3E) matmul.
    qkv = _mm(xf, wqkv_ref[...]) + bqkv_ref[...]       # (B*T, 3E)
    q = qkv[:, :E].reshape(B, T, E)
    k = qkv[:, E:2 * E].reshape(B, T, E)
    v = qkv[:, 2 * E:].reshape(B, T, E)

    # key-padding mask: 1.0 at padded keys -> large negative attention bias.
    bias = mask_ref[...][:, None, :] * jnp.float32(-1e30)     # (B, 1, T)

    ctx_heads = []
    for h in range(nhead):                              # static unroll over heads
        sl = slice(h * hd, (h + 1) * hd)
        qh, kh, vh = q[:, :, sl], k[:, :, sl], v[:, :, sl]
        s = jnp.einsum('bqd,bkd->bqk',
                       qh.astype(jnp.bfloat16), kh.astype(jnp.bfloat16),
                       preferred_element_type=jnp.float32) * scale + bias
        m = jnp.max(s, axis=-1, keepdims=True)
        e = jnp.exp(s - m)
        p = e * pl.reciprocal(jnp.sum(e, axis=-1, keepdims=True), approx=True)
        ctx_heads.append(
            jnp.einsum('bqk,bkd->bqd',
                       p.astype(jnp.bfloat16), vh.astype(jnp.bfloat16),
                       preferred_element_type=jnp.float32))
    ctx = jnp.concatenate(ctx_heads, axis=-1).reshape(B * T, E)

    attn_out = _mm(ctx, wo_ref[...]) + bo_ref[...]
    h1 = _layernorm(xf + attn_out, g1_ref[...], be1_ref[...])

    ff = _mm(jnp.maximum(_mm(h1, wf1_ref[...]) + bf1_ref[...], 0.0),
             wf2_ref[...]) + bf2_ref[...]
    h2 = _layernorm(h1 + ff, g2_ref[...], be2_ref[...])

    o_ref[...] = h2.reshape(B, T, E)


def encoder_layer(x, mask, lp, nhead):
    B, T, E = x.shape
    return pl.pallas_call(
        functools.partial(_encoder_layer_kernel, nhead=nhead),
        out_shape=jax.ShapeDtypeStruct((B, T, E), jnp.float32),
        in_specs=[pl.BlockSpec(memory_space=VMEM)] * 14,
        out_specs=pl.BlockSpec(memory_space=VMEM),
    )(x, mask,
      lp['wqkv'], lp['bqkv'], lp['wo'], lp['bo'],
      lp['g1'], lp['b1'], lp['wf1'], lp['bf1'], lp['wf2'], lp['bf2'],
      lp['g2'], lp['b2'])


# --------------------------------------------------------------------------
# Kernel 3: sum-over-T pooling / #valid tokens + classifier + log-softmax
# --------------------------------------------------------------------------
def _pool_fc_kernel(x_ref, mask_ref, wfc_ref, bfc_ref, o_ref):
    x = x_ref[...]                                     # (B, T, E)
    summed = jnp.sum(x, axis=1)                        # sum over ALL positions (matches torch)
    valid = jnp.sum(1.0 - mask_ref[...], axis=1, keepdims=True)   # (#non-pad tokens per row)
    pooled = summed / valid
    logits = jnp.dot(pooled, wfc_ref[...], preferred_element_type=jnp.float32) + bfc_ref[...]
    m = jnp.max(logits, axis=1, keepdims=True)
    lse = m + jnp.log(jnp.sum(jnp.exp(logits - m), axis=1, keepdims=True))
    o_ref[...] = logits - lse


def pool_fc(x, mask, wfc, bfc):
    B = x.shape[0]
    C = wfc.shape[1]
    return pl.pallas_call(
        _pool_fc_kernel,
        out_shape=jax.ShapeDtypeStruct((B, C), jnp.float32),
        in_specs=[pl.BlockSpec(memory_space=VMEM)] * 4,
        out_specs=pl.BlockSpec(memory_space=VMEM),
    )(x, mask, wfc, bfc)


# ----------------------------- parameters -----------------------------

def _init_linear(key, fan_in, fan_out):
    kw, kb = jax.random.split(key)
    bound = 1.0 / float(fan_in) ** 0.5
    w = jax.random.uniform(kw, (fan_in, fan_out), jnp.float32, -bound, bound)
    b = jax.random.uniform(kb, (1, fan_out), jnp.float32, -bound, bound)
    return w, b


def init_params(key, V, E, H, nhead, nlayers, C):
    keys = jax.random.split(key, nlayers + 2)
    emb = jax.random.normal(keys[0], (V, E), jnp.float32)      # nn.Embedding default N(0,1)
    wfc, bfc = _init_linear(keys[1], E, C)
    layers = []
    for li in range(nlayers):
        lk = jax.random.split(keys[2 + li], 4)
        wqkv, bqkv = _init_linear(lk[0], E, 3 * E)             # fused in_proj (q|k|v)
        wo, bo = _init_linear(lk[1], E, E)
        wf1, bf1 = _init_linear(lk[2], E, H)
        wf2, bf2 = _init_linear(lk[3], H, E)
        layers.append(dict(
            wqkv=wqkv, bqkv=bqkv, wo=wo, bo=bo,
            wf1=wf1, bf1=bf1, wf2=wf2, bf2=bf2,
            g1=jnp.ones((1, E), jnp.float32), b1=jnp.zeros((1, E), jnp.float32),
            g2=jnp.ones((1, E), jnp.float32), b2=jnp.zeros((1, E), jnp.float32)))
    return dict(emb=emb, layers=layers, wfc=wfc, bfc=bfc)


# ----------------------------- forward -----------------------------

def forward(params, x_ids, src_key_padding_mask, *, nhead):
    """Returns log-probabilities (B, class_num).  mask: 1.0 = padded, 0.0 = valid."""
    B, T = x_ids.shape
    E = params['emb'].shape[1]
    mask = src_key_padding_mask.astype(jnp.float32)

    # TODO(synk): src_mask (additive attn_mask) other than None is not supported.
    h = embed(params['emb'], x_ids.reshape(-1).astype(jnp.int32)).reshape(B, T, E)
    for lp in params['layers']:
        h = encoder_layer(h, mask, lp, nhead)
    return pool_fc(h, mask, params['wfc'], params['bfc'])


# ----------------------------- main -----------------------------

if __name__ == "__main__":
    B, T = 2, 16                     # batch, sequence length
    V = 100                          # vocab size
    E = 128                          # embedding_dim (lane-dense)
    H = 256                          # hidden_dim of the FFN
    nhead, nlayers = 4, 2
    C = 4                            # class_num

    key = jax.random.PRNGKey(0)
    kp, kx = jax.random.split(key)
    params = init_params(kp, V, E, H, nhead, nlayers, C)

    x_ids = jax.random.randint(kx, (B, T), 1, V, dtype=jnp.int32)
    lengths = jnp.array([T, T - 6], dtype=jnp.int32)                       # valid tokens per row
    pad_mask = (jnp.arange(T)[None, :] >= lengths[:, None]).astype(jnp.float32)
    x_ids = jnp.where(pad_mask > 0, 0, x_ids)                              # pad token id = 0

    fwd = jax.jit(functools.partial(forward, nhead=nhead))
    log_probs = fwd(params, x_ids, pad_mask)
    jax.block_until_ready(log_probs)
    print("KERNEL_OK")
</pallas_src>

<mosaic_0001>
module attributes {stable_mosaic.version = 11 : i64} {
  func.func @_encoder_layer_kernel(%arg0: memref<2x16x128xf32, #tpu.memory_space<vmem>>, %arg1: memref<2x16xf32, #tpu.memory_space<vmem>>, %arg2: memref<128x384xf32, #tpu.memory_space<vmem>>, %arg3: memref<1x384xf32, #tpu.memory_space<vmem>>, %arg4: memref<128x128xf32, #tpu.memory_space<vmem>>, %arg5: memref<1x128xf32, #tpu.memory_space<vmem>>, %arg6: memref<1x128xf32, #tpu.memory_space<vmem>>, %arg7: memref<1x128xf32, #tpu.memory_space<vmem>>, %arg8: memref<128x256xf32, #tpu.memory_space<vmem>>, %arg9: memref<1x256xf32, #tpu.memory_space<vmem>>, %arg10: memref<256x128xf32, #tpu.memory_space<vmem>>, %arg11: memref<1x128xf32, #tpu.memory_space<vmem>>, %arg12: memref<1x128xf32, #tpu.memory_space<vmem>>, %arg13: memref<1x128xf32, #tpu.memory_space<vmem>>, %arg14: memref<2x16x128xf32, #tpu.memory_space<vmem>>) attributes {dimension_semantics = [], scalar_prefetch = 0 : i64, scratch_operands = 0 : i64, tpu.core_type = #tpu.core_type<tc>} {
    %c0 = arith.constant 0 : index
    %c0_0 = arith.constant 0 : index
    %c0_1 = arith.constant 0 : index
    %0 = vector.load %arg0[%c0, %c0_0, %c0_1] : memref<2x16x128xf32, #tpu.memory_space<vmem>>, vector<2x16x128xf32>
    %1 = vector.shape_cast %0 : vector<2x16x128xf32> to vector<32x128xf32>
    %c0_2 = arith.constant 0 : index
    %c0_3 = arith.constant 0 : index
    %2 = vector.load %arg2[%c0_2, %c0_3] : memref<128x384xf32, #tpu.memory_space<vmem>>, vector<128x384xf32>
    %3 = arith.truncf %1 : vector<32x128xf32> to vector<32x128xbf16>
    %4 = arith.truncf %2 : vector<128x384xf32> to vector<128x384xbf16>
    %cst = arith.constant dense<0.000000e+00> : vector<32x384xf32>
    %5 = tpu.matmul %3, %4, %cst {dimension_numbers = #tpu.dot_dimension_numbers<[1], [0], [0], [1], [0, 0, 1, 1], [], []>} : vector<32x128xbf16>, vector<128x384xbf16>, vector<32x384xf32> -> vector<32x384xf32>
    %c0_4 = arith.constant 0 : index
    %c0_5 = arith.constant 0 : index
    %6 = vector.load %arg3[%c0_4, %c0_5] : memref<1x384xf32, #tpu.memory_space<vmem>>, vector<1x384xf32>
    %7 = vector.broadcast %6 : vector<1x384xf32> to vector<32x384xf32>
    %8 = arith.addf %5, %7 : vector<32x384xf32>
    %9 = vector.extract_strided_slice %8 {offsets = [0, 0], sizes = [32, 128], strides = [1, 1]} : vector<32x384xf32> to vector<32x128xf32>
    %10 = vector.shape_cast %9 : vector<32x128xf32> to vector<2x16x128xf32>
    %11 = vector.extract_strided_slice %8 {offsets = [0, 128], sizes = [32, 128], strides = [1, 1]} : vector<32x384xf32> to vector<32x128xf32>
    %12 = vector.shape_cast %11 : vector<32x128xf32> to vector<2x16x128xf32>
    %13 = vector.extract_strided_slice %8 {offsets = [0, 256], sizes = [32, 128], strides = [1, 1]} : vector<32x384xf32> to vector<32x128xf32>
    %14 = vector.shape_cast %13 : vector<32x128xf32> to vector<2x16x128xf32>
    %c0_6 = arith.constant 0 : index
    %c0_7 = arith.constant 0 : index
    %15 = vector.load %arg1[%c0_6, %c0_7] : memref<2x16xf32, #tpu.memory_space<vmem>>, vector<2x16xf32>
    %16 = vector.shape_cast %15 : vector<2x16xf32> to vector<2x1x16xf32>
    %cst_8 = arith.constant -1.000000e+30 : f32
    %17 = vector.broadcast %cst_8 : f32 to vector<2x1x16xf32>
    %18 = arith.mulf %16, %17 : vector<2x1x16xf32>
    %19 = vector.extract_strided_slice %10 {offsets = [0, 0, 0], sizes = [2, 16, 32], strides = [1, 1, 1]} : vector<2x16x128xf32> to vector<2x16x32xf32>
    %20 = vector.extract_strided_slice %12 {offsets = [0, 0, 0], sizes = [2, 16, 32], strides = [1, 1, 1]} : vector<2x16x128xf32> to vector<2x16x32xf32>
    %21 = vector.extract_strided_slice %14 {offsets = [0, 0, 0], sizes = [2, 16, 32], strides = [1, 1, 1]} : vector<2x16x128xf32> to vector<2x16x32xf32>
    %22 = arith.truncf %19 : vector<2x16x32xf32> to vector<2x16x32xbf16>
    %23 = arith.truncf %20 : vector<2x16x32xf32> to vector<2x16x32xbf16>
    "tpu.trace_start"() <{level = 10 : i32, message = "bqd,bkd->bqk"}> : () -> ()
    %cst_9 = arith.constant dense<0.000000e+00> : vector<2x16x16xf32>
    %24 = tpu.matmul %22, %23, %cst_9 {dimension_numbers = #tpu.dot_dimension_numbers<[2], [2], [1], [1], [0, 0, 0, 1, 1, 1], [0], [0]>} : vector<2x16x32xbf16>, vector<2x16x32xbf16>, vector<2x16x16xf32> -> vector<2x16x16xf32>
    "tpu.trace_stop"() : () -> ()
    %cst_10 = arith.constant 0.176776692 : f32
    %25 = vector.broadcast %cst_10 : f32 to vector<2x16x16xf32>
    %26 = arith.mulf %24, %25 : vector<2x16x16xf32>
    %27 = vector.broadcast %18 : vector<2x1x16xf32> to vector<2x16x16xf32>
    %28 = arith.addf %26, %27 : vector<2x16x16xf32>
    %cst_11 = arith.constant dense<0xFF800000> : vector<2x16xf32>
    %29 = vector.multi_reduction <maximumf>, %28, %cst_11 [2] : vector<2x16x16xf32> to vector<2x16xf32>
    %30 = vector.shape_cast %29 : vector<2x16xf32> to vector<2x16x1xf32>
    %31 = vector.broadcast %30 : vector<2x16x1xf32> to vector<2x16x16xf32>
    %32 = arith.subf %28, %31 : vector<2x16x16xf32>
    %33 = math.exp %32 : vector<2x16x16xf32>
    %cst_12 = arith.constant dense<0.000000e+00> : vector<2x16xf32>
    %34 = vector.multi_reduction <add>, %33, %cst_12 [2] : vector<2x16x16xf32> to vector<2x16xf32>
    %35 = vector.shape_cast %34 : vector<2x16xf32> to vector<2x16x1xf32>
    %36 = tpu.reciprocal %35 {approx = true} : vector<2x16x1xf32> -> vector<2x16x1xf32>
    %37 = vector.broadcast %36 : vector<2x16x1xf32> to vector<2x16x16xf32>
    %38 = arith.mulf %33, %37 : vector<2x16x16xf32>
    %39 = arith.truncf %38 : vector<2x16x16xf32> to vector<2x16x16xbf16>
    %40 = arith.truncf %21 : vector<2x16x32xf32> to vector<2x16x32xbf16>
    "tpu.trace_start"() <{level = 10 : i32, message = "bqk,bkd->bqd"}> : () -> ()
    %cst_13 = arith.constant dense<0.000000e+00> : vector<2x16x32xf32>
    %41 = tpu.matmul %39, %40, %cst_13 {dimension_numbers = #tpu.dot_dimension_numbers<[2], [1], [1], [2], [0, 0, 0, 1, 1, 2], [0], [0]>} : vector<2x16x16xbf16>, vector<2x16x32xbf16>, vector<2x16x32xf32> -> vector<2x16x32xf32>
    "tpu.trace_stop"() : () -> ()
    %42 = vector.extract_strided_slice %10 {offsets = [0, 0, 32], sizes = [2, 16, 32], strides = [1, 1, 1]} : vector<2x16x128xf32> to vector<2x16x32xf32>
    %43 = vector.extract_strided_slice %12 {offsets = [0, 0, 32], sizes = [2, 16, 32], strides = [1, 1, 1]} : vector<2x16x128xf32> to vector<2x16x32xf32>
    %44 = vector.extract_strided_slice %14 {offsets = [0, 0, 32], sizes = [2, 16, 32], strides = [1, 1, 1]} : vector<2x16x128xf32> to vector<2x16x32xf32>
    %45 = arith.truncf %42 : vector<2x16x32xf32> to vector<2x16x32xbf16>
    %46 = arith.truncf %43 : vector<2x16x32xf32> to vector<2x16x32xbf16>
    "tpu.trace_start"() <{level = 10 : i32, message = "bqd,bkd->bqk"}> : () -> ()
    %cst_14 = arith.constant dense<0.000000e+00> : vector<2x16x16xf32>
    %47 = tpu.matmul %45, %46, %cst_14 {dimension_numbers = #tpu.dot_dimension_numbers<[2], [2], [1], [1], [0, 0, 0, 1, 1, 1], [0], [0]>} : vector<2x16x32xbf16>, vector<2x16x32xbf16>, vector<2x16x16xf32> -> vector<2x16x16xf32>
    "tpu.trace_stop"() : () -> ()
    %cst_15 = arith.constant 0.176776692 : f32
    %48 = vector.broadcast %cst_15 : f32 to vector<2x16x16xf32>
    %49 = arith.mulf %47, %48 : vector<2x16x16xf32>
    %50 = vector.broadcast %18 : vector<2x1x16xf32> to vector<2x16x16xf32>
    %51 = arith.addf %49, %50 : vector<2x16x16xf32>
    %cst_16 = arith.constant dense<0xFF800000> : vector<2x16xf32>
    %52 = vector.multi_reduction <maximumf>, %51, %cst_16 [2] : vector<2x16x16xf32> to vector<2x16xf32>
    %53 = vector.shape_cast %52 : vector<2x16xf32> to vector<2x16x1xf32>
    %54 = vector.broadcast %53 : vector<2x16x1xf32> to vector<2x16x16xf32>
    %55 = arith.subf %51, %54 : vector<2x16x16xf32>
    %56 = math.exp %55 : vector<2x16x16xf32>
    %cst_17 = arith.constant dense<0.000000e+00> : vector<2x16xf32>
    %57 = vector.multi_reduction <add>, %56, %cst_17 [2] : vector<2x16x16xf32> to vector<2x16xf32>
    %58 = vector.shape_cast %57 : vector<2x16xf32> to vector<2x16x1xf32>
    %59 = tpu.reciprocal %58 {approx = true} : vector<2x16x1xf32> -> vector<2x16x1xf32>
    %60 = vector.broadcast %59 : vector<2x16x1xf32> to vector<2x16x16xf32>
    %61 = arith.mulf %56, %60 : vector<2x16x16xf32>
    %62 = arith.truncf %61 : vector<2x16x16xf32> to vector<2x16x16xbf16>
    %63 = arith.truncf %44 : vector<2x16x32xf32> to vector<2x16x32xbf16>
    "tpu.trace_start"() <{level = 10 : i32, message = "bqk,bkd->bqd"}> : () -> ()
    %cst_18 = arith.constant dense<0.000000e+00> : vector<2x16x32xf32>
    %64 = tpu.matmul %62, %63, %cst_18 {dimension_numbers = #tpu.dot_dimension_numbers<[2], [1], [1], [2], [0, 0, 0, 1, 1, 2], [0], [0]>} : vector<2x16x16xbf16>, vector<2x16x32xbf16>, vector<2x16x32xf32> -> vector<2x16x32xf32>
    "tpu.trace_stop"() : () -> ()
    %65 = vector.extract_strided_slice %10 {offsets = [0, 0, 64], sizes = [2, 16, 32], strides = [1, 1, 1]} : vector<2x16x128xf32> to vector<2x16x32xf32>
    %66 = vector.extract_strided_slice %12 {offsets = [0, 0, 64], sizes = [2, 16, 32], strides = [1, 1, 1]} : vector<2x16x128xf32> to vector<2x16x32xf32>
    %67 = vector.extract_strided_slice %14 {offsets = [0, 0, 64], sizes = [2, 16, 32], strides = [1, 1, 1]} : vector<2x16x128xf32> to vector<2x16x32xf32>
    %68 = arith.truncf %65 : vector<2x16x32xf32> to vector<2x16x32xbf16>
    %69 = arith.truncf %66 : vector<2x16x32xf32> to vector<2x16x32xbf16>
    "tpu.trace_start"() <{level = 10 : i32, message = "bqd,bkd->bqk"}> : () -> ()
    %cst_19 = arith.constant dense<0.000000e+00> : vector<2x16x16xf32>
    %70 = tpu.matmul %68, %69, %cst_19 {dimension_numbers = #tpu.dot_dimension_numbers<[2], [2], [1], [1], [0, 0, 0, 1, 1, 1], [0], [0]>} : vector<2x16x32xbf16>, vector<2x16x32xbf16>, vector<2x16x16xf32> -> vector<2x16x16xf32>
    "tpu.trace_stop"() : () -> ()
    %cst_20 = arith.constant 0.176776692 : f32
    %71 = vector.broadcast %cst_20 : f32 to vector<2x16x16xf32>
    %72 = arith.mulf %70, %71 : vector<2x16x16xf32>
    %73 = vector.broadcast %18 : vector<2x1x16xf32> to vector<2x16x16xf32>
    %74 = arith.addf %72, %73 : vector<2x16x16xf32>
    %cst_21 = arith.constant dense<0xFF800000> : vector<2x16xf32>
    %75 = vector.multi_reduction <maximumf>, %74, %cst_21 [2] : vector<2x16x16xf32> to vector<2x16xf32>
    %76 = vector.shape_cast %75 : vector<2x16xf32> to vector<2x16x1xf32>
    %77 = vector.broadcast %76 : vector<2x16x1xf32> to vector<2x16x16xf32>
    %78 = arith.subf %74, %77 : vector<2x16x16xf32>
    %79 = math.exp %78 : vector<2x16x16xf32>
    %cst_22 = arith.constant dense<0.000000e+00> : vector<2x16xf32>
    %80 = vector.multi_reduction <add>, %79, %cst_22 [2] : vector<2x16x16xf32> to vector<2x16xf32>
    %81 = vector.shape_cast %80 : vector<2x16xf32> to vector<2x16x1xf32>
    %82 = tpu.reciprocal %81 {approx = true} : vector<2x16x1xf32> -> vector<2x16x1xf32>
    %83 = vector.broadcast %82 : vector<2x16x1xf32> to vector<2x16x16xf32>
    %84 = arith.mulf %79, %83 : vector<2x16x16xf32>
    %85 = arith.truncf %84 : vector<2x16x16xf32> to vector<2x16x16xbf16>
    %86 = arith.truncf %67 : vector<2x16x32xf32> to vector<2x16x32xbf16>
    "tpu.trace_start"() <{level = 10 : i32, message = "bqk,bkd->bqd"}> : () -> ()
    %cst_23 = arith.constant dense<0.000000e+00> : vector<2x16x32xf32>
    %87 = tpu.matmul %85, %86, %cst_23 {dimension_numbers = #tpu.dot_dimension_numbers<[2], [1], [1], [2], [0, 0, 0, 1, 1, 2], [0], [0]>} : vector<2x16x16xbf16>, vector<2x16x32xbf16>, vector<2x16x32xf32> -> vector<2x16x32xf32>
    "tpu.trace_stop"() : () -> ()
    %88 = vector.extract_strided_slice %10 {offsets = [0, 0, 96], sizes = [2, 16, 32], strides = [1, 1, 1]} : vector<2x16x128xf32> to vector<2x16x32xf32>
    %89 = vector.extract_strided_slice %12 {offsets = [0, 0, 96], sizes = [2, 16, 32], strides = [1, 1, 1]} : vector<2x16x128xf32> to vector<2x16x32xf32>
    %90 = vector.extract_strided_slice %14 {offsets = [0, 0, 96], sizes = [2, 16, 32], strides = [1, 1, 1]} : vector<2x16x128xf32> to vector<2x16x32xf32>
    %91 = arith.truncf %88 : vector<2x16x32xf32> to vector<2x16x32xbf16>
    %92 = arith.truncf %89 : vector<2x16x32xf32> to vector<2x16x32xbf16>
    "tpu.trace_start"() <{level = 10 : i32, message = "bqd,bkd->bqk"}> : () -> ()
    %cst_24 = arith.constant dense<0.000000e+00> : vector<2x16x16xf32>
    %93 = tpu.matmul %91, %92, %cst_24 {dimension_numbers = #tpu.dot_dimension_numbers<[2], [2], [1], [1], [0, 0, 0, 1, 1, 1], [0], [0]>} : vector<2x16x32xbf16>, vector<2x16x32xbf16>, vector<2x16x16xf32> -> vector<2x16x16xf32>
    "tpu.trace_stop"() : () -> ()
    %cst_25 = arith.constant 0.176776692 : f32
    %94 = vector.broadcast %cst_25 : f32 to vector<2x16x16xf32>
    %95 = arith.mulf %93, %94 : vector<2x16x16xf32>
    %96 = vector.broadcast %18 : vector<2x1x16xf32> to vector<2x16x16xf32>
    %97 = arith.addf %95, %96 : vector<2x16x16xf32>
    %cst_26 = arith.constant dense<0xFF800000> : vector<2x16xf32>
    %98 = vector.multi_reduction <maximumf>, %97, %cst_26 [2] : vector<2x16x16xf32> to vector<2x16xf32>
    %99 = vector.shape_cast %98 : vector<2x16xf32> to vector<2x16x1xf32>
    %100 = vector.broadcast %99 : vector<2x16x1xf32> to vector<2x16x16xf32>
    %101 = arith.subf %97, %100 : vector<2x16x16xf32>
    %102 = math.exp %101 : vector<2x16x16xf32>
    %cst_27 = arith.constant dense<0.000000e+00> : vector<2x16xf32>
    %103 = vector.multi_reduction <add>, %102, %cst_27 [2] : vector<2x16x16xf32> to vector<2x16xf32>
    %104 = vector.shape_cast %103 : vector<2x16xf32> to vector<2x16x1xf32>
    %105 = tpu.reciprocal %104 {approx = true} : vector<2x16x1xf32> -> vector<2x16x1xf32>
    %106 = vector.broadcast %105 : vector<2x16x1xf32> to vector<2x16x16xf32>
    %107 = arith.mulf %102, %106 : vector<2x16x16xf32>
    %108 = arith.truncf %107 : vector<2x16x16xf32> to vector<2x16x16xbf16>
    %109 = arith.truncf %90 : vector<2x16x32xf32> to vector<2x16x32xbf16>
    "tpu.trace_start"() <{level = 10 : i32, message = "bqk,bkd->bqd"}> : () -> ()
    %cst_28 = arith.constant dense<0.000000e+00> : vector<2x16x32xf32>
    %110 = tpu.matmul %108, %109, %cst_28 {dimension_numbers = #tpu.dot_dimension_numbers<[2], [1], [1], [2], [0, 0, 0, 1, 1, 2], [0], [0]>} : vector<2x16x16xbf16>, vector<2x16x32xbf16>, vector<2x16x32xf32> -> vector<2x16x32xf32>
    "tpu.trace_stop"() : () -> ()
    %111 = tpu.concatenate %41, %64, %87, %110 in 2 : vector<2x16x32xf32>, vector<2x16x32xf32>, vector<2x16x32xf32>, vector<2x16x32xf32> -> vector<2x16x128xf32>
    %112 = vector.shape_cast %111 : vector<2x16x128xf32> to vector<32x128xf32>
    %c0_29 = arith.constant 0 : index
    %c0_30 = arith.constant 0 : index
    %113 = vector.load %arg4[%c0_29, %c0_30] : memref<128x128xf32, #tpu.memory_space<vmem>>, vector<128x128xf32>
    %114 = arith.truncf %112 : vector<32x128xf32> to vector<32x128xbf16>
    %115 = arith.truncf %113 : vector<128x128xf32> to vector<128x128xbf16>
    %cst_31 = arith.constant dense<0.000000e+00> : vector<32x128xf32>
    %116 = tpu.matmul %114, %115, %cst_31 {dimension_numbers = #tpu.dot_dimension_numbers<[1], [0], [0], [1], [0, 0, 1, 1], [], []>} : vector<32x128xbf16>, vector<128x128xbf16>, vector<32x128xf32> -> vector<32x128xf32>
    %c0_32 = arith.constant 0 : index
    %c0_33 = arith.constant 0 : index
    %117 = vector.load %arg5[%c0_32, %c0_33] : memref<1x128xf32, #tpu.memory_space<vmem>>, vector<1x128xf32>
    %118 = vector.broadcast %117 : vector<1x128xf32> to vector<32x128xf32>
    %119 = arith.addf %116, %118 : vector<32x128xf32>
    %120 = arith.addf %1, %119 : vector<32x128xf32>
    %c0_34 = arith.constant 0 : index
    %c0_35 = arith.constant 0 : index
    %121 = vector.load %arg6[%c0_34, %c0_35] : memref<1x128xf32, #tpu.memory_space<vmem>>, vector<1x128xf32>
    %c0_36 = arith.constant 0 : index
    %c0_37 = arith.constant 0 : index
    %122 = vector.load %arg7[%c0_36, %c0_37] : memref<1x128xf32, #tpu.memory_space<vmem>>, vector<1x128xf32>
    %cst_38 = arith.constant dense<0.000000e+00> : vector<32xf32>
    %123 = vector.multi_reduction <add>, %120, %cst_38 [1] : vector<32x128xf32> to vector<32xf32>
    %124 = vector.shape_cast %123 : vector<32xf32> to vector<32x1xf32>
    %cst_39 = arith.constant 1.280000e+02 : f32
    %125 = vector.broadcast %cst_39 : f32 to vector<32x1xf32>
    %126 = arith.divf %124, %125 : vector<32x1xf32>
    %127 = vector.broadcast %126 : vector<32x1xf32> to vector<32x128xf32>
    %128 = arith.subf %120, %127 : vector<32x128xf32>
    %129 = arith.mulf %128, %128 : vector<32x128xf32>
    %cst_40 = arith.constant dense<0.000000e+00> : vector<32xf32>
    %130 = vector.multi_reduction <add>, %129, %cst_40 [1] : vector<32x128xf32> to vector<32xf32>
    %131 = vector.shape_cast %130 : vector<32xf32> to vector<32x1xf32>
    %cst_41 = arith.constant 1.280000e+02 : f32
    %132 = vector.broadcast %cst_41 : f32 to vector<32x1xf32>
    %133 = arith.divf %131, %132 : vector<32x1xf32>
    %cst_42 = arith.constant 9.99999974E-6 : f32
    %134 = vector.broadcast %cst_42 : f32 to vector<32x1xf32>
    %135 = arith.addf %133, %134 : vector<32x1xf32>
    %136 = math.rsqrt %135 : vector<32x1xf32>
    %137 = vector.broadcast %136 : vector<32x1xf32> to vector<32x128xf32>
    %138 = arith.mulf %128, %137 : vector<32x128xf32>
    %139 = vector.broadcast %121 : vector<1x128xf32> to vector<32x128xf32>
    %140 = arith.mulf %138, %139 : vector<32x128xf32>
    %141 = vector.broadcast %122 : vector<1x128xf32> to vector<32x128xf32>
    %142 = arith.addf %140, %141 : vector<32x128xf32>
    %c0_43 = arith.constant 0 : index
    %c0_44 = arith.constant 0 : index
    %143 = vector.load %arg8[%c0_43, %c0_44] : memref<128x256xf32, #tpu.memory_space<vmem>>, vector<128x256xf32>
    %144 = arith.truncf %142 : vector<32x128xf32> to vector<32x128xbf16>
    %145 = arith.truncf %143 : vector<128x256xf32> to vector<128x256xbf16>
    %cst_45 = arith.constant dense<0.000000e+00> : vector<32x256xf32>
    %146 = tpu.matmul %144, %145, %cst_45 {dimension_numbers = #tpu.dot_dimension_numbers<[1], [0], [0], [1], [0, 0, 1, 1], [], []>} : vector<32x128xbf16>, vector<128x256xbf16>, vector<32x256xf32> -> vector<32x256xf32>
    %c0_46 = arith.constant 0 : index
    %c0_47 = arith.constant 0 : index
    %147 = vector.load %arg9[%c0_46, %c0_47] : memref<1x256xf32, #tpu.memory_space<vmem>>, vector<1x256xf32>
    %148 = vector.broadcast %147 : vector<1x256xf32> to vector<32x256xf32>
    %149 = arith.addf %146, %148 : vector<32x256xf32>
    %cst_48 = arith.constant 0.000000e+00 : f32
    %150 = vector.broadcast %cst_48 : f32 to vector<32x256xf32>
    %151 = arith.maximumf %149, %150 : vector<32x256xf32>
    %c0_49 = arith.constant 0 : index
    %c0_50 = arith.constant 0 : index
    %152 = vector.load %arg10[%c0_49, %c0_50] : memref<256x128xf32, #tpu.memory_space<vmem>>, vector<256x128xf32>
    %153 = arith.truncf %151 : vector<32x256xf32> to vector<32x256xbf16>
    %154 = arith.truncf %152 : vector<256x128xf32> to vector<256x128xbf16>
    %cst_51 = arith.constant dense<0.000000e+00> : vector<32x128xf32>
    %155 = tpu.matmul %153, %154, %cst_51 {dimension_numbers = #tpu.dot_dimension_numbers<[1], [0], [0], [1], [0, 0, 1, 1], [], []>} : vector<32x256xbf16>, vector<256x128xbf16>, vector<32x128xf32> -> vector<32x128xf32>
    %c0_52 = arith.constant 0 : index
    %c0_53 = arith.constant 0 : index
    %156 = vector.load %arg11[%c0_52, %c0_53] : memref<1x128xf32, #tpu.memory_space<vmem>>, vector<1x128xf32>
    %157 = vector.broadcast %156 : vector<1x128xf32> to vector<32x128xf32>
    %158 = arith.addf %155, %157 : vector<32x128xf32>
    %159 = arith.addf %142, %158 : vector<32x128xf32>
    %c0_54 = arith.constant 0 : index
    %c0_55 = arith.constant 0 : index
    %160 = vector.load %arg12[%c0_54, %c0_55] : memref<1x128xf32, #tpu.memory_space<vmem>>, vector<1x128xf32>
    %c0_56 = arith.constant 0 : index
    %c0_57 = arith.constant 0 : index
    %161 = vector.load %arg13[%c0_56, %c0_57] : memref<1x128xf32, #tpu.memory_space<vmem>>, vector<1x128xf32>
    %cst_58 = arith.constant dense<0.000000e+00> : vector<32xf32>
    %162 = vector.multi_reduction <add>, %159, %cst_58 [1] : vector<32x128xf32> to vector<32xf32>
    %163 = vector.shape_cast %162 : vector<32xf32> to vector<32x1xf32>
    %cst_59 = arith.constant 1.280000e+02 : f32
    %164 = vector.broadcast %cst_59 : f32 to vector<32x1xf32>
    %165 = arith.divf %163, %164 : vector<32x1xf32>
    %166 = vector.broadcast %165 : vector<32x1xf32> to vector<32x128xf32>
    %167 = arith.subf %159, %166 : vector<32x128xf32>
    %168 = arith.mulf %167, %167 : vector<32x128xf32>
    %cst_60 = arith.constant dense<0.000000e+00> : vector<32xf32>
    %169 = vector.multi_reduction <add>, %168, %cst_60 [1] : vector<32x128xf32> to vector<32xf32>
    %170 = vector.shape_cast %169 : vector<32xf32> to vector<32x1xf32>
    %cst_61 = arith.constant 1.280000e+02 : f32
    %171 = vector.broadcast %cst_61 : f32 to vector<32x1xf32>
    %172 = arith.divf %170, %171 : vector<32x1xf32>
    %cst_62 = arith.constant 9.99999974E-6 : f32
    %173 = vector.broadcast %cst_62 : f32 to vector<32x1xf32>
    %174 = arith.addf %172, %173 : vector<32x1xf32>
    %175 = math.rsqrt %174 : vector<32x1xf32>
    %176 = vector.broadcast %175 : vector<32x1xf32> to vector<32x128xf32>
    %177 = arith.mulf %167, %176 : vector<32x128xf32>
    %178 = vector.broadcast %160 : vector<1x128xf32> to vector<32x128xf32>
    %179 = arith.mulf %177, %178 : vector<32x128xf32>
    %180 = vector.broadcast %161 : vector<1x128xf32> to vector<32x128xf32>
    %181 = arith.addf %179, %180 : vector<32x128xf32>
    %182 = vector.shape_cast %181 : vector<32x128xf32> to vector<2x16x128xf32>
    %c0_63 = arith.constant 0 : index
    %c0_64 = arith.constant 0 : index
    %c0_65 = arith.constant 0 : index
    %183 = vector.load %arg14[%c0_63, %c0_64, %c0_65] : memref<2x16x128xf32, #tpu.memory_space<vmem>>, vector<2x16x128xf32>
    tpu.vector_store %arg14[%c0_63, %c0_64, %c0_65], %182 {strides = array<i32>} : memref<2x16x128xf32, #tpu.memory_space<vmem>>, vector<2x16x128xf32>,
    return
  }
}

module attributes {stable_mosaic.version = 11 : i64} {
  func.func @_embed_kernel(%arg0: memref<32xi32, #tpu.memory_space<smem>>, %arg1: memref<100x128xf32, #tpu.memory_space<vmem>>, %arg2: memref<32x128xf32, #tpu.memory_space<vmem>>) attributes {dimension_semantics = [], scalar_prefetch = 0 : i64, scratch_operands = 0 : i64, tpu.core_type = #tpu.core_type<tc>} {
    %c0_i32 = arith.constant 0 : i32
    %c32_i32 = arith.constant 32 : i32
    %0 = arith.addi %c0_i32, %c32_i32 : i32
    %c1_i32 = arith.constant 1 : i32
    scf.for %arg3 = %c0_i32 to %0 step %c1_i32  : i32 {
      %1 = arith.index_cast %arg3 : i32 to index
      %2 = memref.load %arg0[%1] : memref<32xi32, #tpu.memory_space<smem>>
      %3 = arith.index_cast %2 : i32 to index
      %c0 = arith.constant 0 : index
      %4 = vector.load %arg1[%3, %c0] : memref<100x128xf32, #tpu.memory_space<vmem>>, vector<1x128xf32>
      %5 = arith.index_cast %arg3 : i32 to index
      %c0_1 = arith.constant 0 : index
      %6 = vector.load %arg2[%5, %c0_1] : memref<32x128xf32, #tpu.memory_space<vmem>>, vector<1x128xf32>
      tpu.vector_store %arg2[%5, %c0_1], %4 {strides = array<i32>} : memref<32x128xf32, #tpu.memory_space<vmem>>, vector<1x128xf32>,
    }
    %c32_i32_0 = arith.constant 32 : i32
    return
  }
}

module attributes {stable_mosaic.version = 11 : i64} {
  func.func @_encoder_layer_kernel(%arg0: memref<2x16x128xf32, #tpu.memory_space<vmem>>, %arg1: memref<2x16xf32, #tpu.memory_space<vmem>>, %arg2: memref<128x384xf32, #tpu.memory_space<vmem>>, %arg3: memref<1x384xf32, #tpu.memory_space<vmem>>, %arg4: memref<128x128xf32, #tpu.memory_space<vmem>>, %arg5: memref<1x128xf32, #tpu.memory_space<vmem>>, %arg6: memref<1x128xf32, #tpu.memory_space<vmem>>, %arg7: memref<1x128xf32, #tpu.memory_space<vmem>>, %arg8: memref<128x256xf32, #tpu.memory_space<vmem>>, %arg9: memref<1x256xf32, #tpu.memory_space<vmem>>, %arg10: memref<256x128xf32, #tpu.memory_space<vmem>>, %arg11: memref<1x128xf32, #tpu.memory_space<vmem>>, %arg12: memref<1x128xf32, #tpu.memory_space<vmem>>, %arg13: memref<1x128xf32, #tpu.memory_space<vmem>>, %arg14: memref<2x16x128xf32, #tpu.memory_space<vmem>>) attributes {dimension_semantics = [], scalar_prefetch = 0 : i64, scratch_operands = 0 : i64, tpu.core_type = #tpu.core_type<tc>} {
    %c0 = arith.constant 0 : index
    %c0_0 = arith.constant 0 : index
    %c0_1 = arith.constant 0 : index
    %0 = vector.load %arg0[%c0, %c0_0, %c0_1] : memref<2x16x128xf32, #tpu.memory_space<vmem>>, vector<2x16x128xf32>
    %1 = vector.shape_cast %0 : vector<2x16x128xf32> to vector<32x128xf32>
    %c0_2 = arith.constant 0 : index
    %c0_3 = arith.constant 0 : index
    %2 = vector.load %arg2[%c0_2, %c0_3] : memref<128x384xf32, #tpu.memory_space<vmem>>, vector<128x384xf32>
    %3 = arith.truncf %1 : vector<32x128xf32> to vector<32x128xbf16>
    %4 = arith.truncf %2 : vector<128x384xf32> to vector<128x384xbf16>
    %cst = arith.constant dense<0.000000e+00> : vector<32x384xf32>
    %5 = tpu.matmul %3, %4, %cst {dimension_numbers = #tpu.dot_dimension_numbers<[1], [0], [0], [1], [0, 0, 1, 1], [], []>} : vector<32x128xbf16>, vector<128x384xbf16>, vector<32x384xf32> -> vector<32x384xf32>
    %c0_4 = arith.constant 0 : index
    %c0_5 = arith.constant 0 : index
    %6 = vector.load %arg3[%c0_4, %c0_5] : memref<1x384xf32, #tpu.memory_space<vmem>>, vector<1x384xf32>
    %7 = vector.broadcast %6 : vector<1x384xf32> to vector<32x384xf32>
    %8 = arith.addf %5, %7 : vector<32x384xf32>
    %9 = vector.extract_strided_slice %8 {offsets = [0, 0], sizes = [32, 128], strides = [1, 1]} : vector<32x384xf32> to vector<32x128xf32>
    %10 = vector.shape_cast %9 : vector<32x128xf32> to vector<2x16x128xf32>
    %11 = vector.extract_strided_slice %8 {offsets = [0, 128], sizes = [32, 128], strides = [1, 1]} : vector<32x384xf32> to vector<32x128xf32>
    %12 = vector.shape_cast %11 : vector<32x128xf32> to vector<2x16x128xf32>
    %13 = vector.extract_strided_slice %8 {offsets = [0, 256], sizes = [32, 128], strides = [1, 1]} : vector<32x384xf32> to vector<32x128xf32>
    %14 = vector.shape_cast %13 : vector<32x128xf32> to vector<2x16x128xf32>
    %c0_6 = arith.constant 0 : index
    %c0_7 = arith.constant 0 : index
    %15 = vector.load %arg1[%c0_6, %c0_7] : memref<2x16xf32, #tpu.memory_space<vmem>>, vector<2x16xf32>
    %16 = vector.shape_cast %15 : vector<2x16xf32> to vector<2x1x16xf32>
    %cst_8 = arith.constant -1.000000e+30 : f32
    %17 = vector.broadcast %cst_8 : f32 to vector<2x1x16xf32>
    %18 = arith.mulf %16, %17 : vector<2x1x16xf32>
    %19 = vector.extract_strided_slice %10 {offsets = [0, 0, 0], sizes = [2, 16, 32], strides = [1, 1, 1]} : vector<2x16x128xf32> to vector<2x16x32xf32>
    %20 = vector.extract_strided_slice %12 {offsets = [0, 0, 0], sizes = [2, 16, 32], strides = [1, 1, 1]} : vector<2x16x128xf32> to vector<2x16x32xf32>
    %21 = vector.extract_strided_slice %14 {offsets = [0, 0, 0], sizes = [2, 16, 32], strides = [1, 1, 1]} : vector<2x16x128xf32> to vector<2x16x32xf32>
    %22 = arith.truncf %19 : vector<2x16x32xf32> to vector<2x16x32xbf16>
    %23 = arith.truncf %20 : vector<2x16x32xf32> to vector<2x16x32xbf16>
    "tpu.trace_start"() <{level = 10 : i32, message = "bqd,bkd->bqk"}> : () -> ()
    %cst_9 = arith.constant dense<0.000000e+00> : vector<2x16x16xf32>
    %24 = tpu.matmul %22, %23, %cst_9 {dimension_numbers = #tpu.dot_dimension_numbers<[2], [2], [1], [1], [0, 0, 0, 1, 1, 1], [0], [0]>} : vector<2x16x32xbf16>, vector<2x16x32xbf16>, vector<2x16x16xf32> -> vector<2x16x16xf32>
    "tpu.trace_stop"() : () -> ()
    %cst_10 = arith.constant 0.176776692 : f32
    %25 = vector.broadcast %cst_10 : f32 to vector<2x16x16xf32>
    %26 = arith.mulf %24, %25 : vector<2x16x16xf32>
    %27 = vector.broadcast %18 : vector<2x1x16xf32> to vector<2x16x16xf32>
    %28 = arith.addf %26, %27 : vector<2x16x16xf32>
    %cst_11 = arith.constant dense<0xFF800000> : vector<2x16xf32>
    %29 = vector.multi_reduction <maximumf>, %28, %cst_11 [2] : vector<2x16x16xf32> to vector<2x16xf32>
    %30 = vector.shape_cast %29 : vector<2x16xf32> to vector<2x16x1xf32>
    %31 = vector.broadcast %30 : vector<2x16x1xf32> to vector<2x16x16xf32>
    %32 = arith.subf %28, %31 : vector<2x16x16xf32>
    %33 = math.exp %32 : vector<2x16x16xf32>
    %cst_12 = arith.constant dense<0.000000e+00> : vector<2x16xf32>
    %34 = vector.multi_reduction <add>, %33, %cst_12 [2] : vector<2x16x16xf32> to vector<2x16xf32>
    %35 = vector.shape_cast %34 : vector<2x16xf32> to vector<2x16x1xf32>
    %36 = tpu.reciprocal %35 {approx = true} : vector<2x16x1xf32> -> vector<2x16x1xf32>
    %37 = vector.broadcast %36 : vector<2x16x1xf32> to vector<2x16x16xf32>
    %38 = arith.mulf %33, %37 : vector<2x16x16xf32>
    %39 = arith.truncf %38 : vector<2x16x16xf32> to vector<2x16x16xbf16>
    %40 = arith.truncf %21 : vector<2x16x32xf32> to vector<2x16x32xbf16>
    "tpu.trace_start"() <{level = 10 : i32, message = "bqk,bkd->bqd"}> : () -> ()
    %cst_13 = arith.constant dense<0.000000e+00> : vector<2x16x32xf32>
    %41 = tpu.matmul %39, %40, %cst_13 {dimension_numbers = #tpu.dot_dimension_numbers<[2], [1], [1], [2], [0, 0, 0, 1, 1, 2], [0], [0]>} : vector<2x16x16xbf16>, vector<2x16x32xbf16>, vector<2x16x32xf32> -> vector<2x16x32xf32>
    "tpu.trace_stop"() : () -> ()
    %42 = vector.extract_strided_slice %10 {offsets = [0, 0, 32], sizes = [2, 16, 32], strides = [1, 1, 1]} : vector<2x16x128xf32> to vector<2x16x32xf32>
    %43 = vector.extract_strided_slice %12 {offsets = [0, 0, 32], sizes = [2, 16, 32], strides = [1, 1, 1]} : vector<2x16x128xf32> to vector<2x16x32xf32>
    %44 = vector.extract_strided_slice %14 {offsets = [0, 0, 32], sizes = [2, 16, 32], strides = [1, 1, 1]} : vector<2x16x128xf32> to vector<2x16x32xf32>
    %45 = arith.truncf %42 : vector<2x16x32xf32> to vector<2x16x32xbf16>
    %46 = arith.truncf %43 : vector<2x16x32xf32> to vector<2x16x32xbf16>
    "tpu.trace_start"() <{level = 10 : i32, message = "bqd,bkd->bqk"}> : () -> ()
    %cst_14 = arith.constant dense<0.000000e+00> : vector<2x16x16xf32>
    %47 = tpu.matmul %45, %46, %cst_14 {dimension_numbers = #tpu.dot_dimension_numbers<[2], [2], [1], [1], [0, 0, 0, 1, 1, 1], [0], [0]>} : vector<2x16x32xbf16>, vector<2x16x32xbf16>, vector<2x16x16xf32> -> vector<2x16x16xf32>
    "tpu.trace_stop"() : () -> ()
    %cst_15 = arith.constant 0.176776692 : f32
    %48 = vector.broadcast %cst_15 : f32 to vector<2x16x16xf32>
    %49 = arith.mulf %47, %48 : vector<2x16x16xf32>
    %50 = vector.broadcast %18 : vector<2x1x16xf32> to vector<2x16x16xf32>
    %51 = arith.addf %49, %50 : vector<2x16x16xf32>
    %cst_16 = arith.constant dense<0xFF800000> : vector<2x16xf32>
    %52 = vector.multi_reduction <maximumf>, %51, %cst_16 [2] : vector<2x16x16xf32> to vector<2x16xf32>
    %53 = vector.shape_cast %52 : vector<2x16xf32> to vector<2x16x1xf32>
    %54 = vector.broadcast %53 : vector<2x16x1xf32> to vector<2x16x16xf32>
    %55 = arith.subf %51, %54 : vector<2x16x16xf32>
    %56 = math.exp %55 : vector<2x16x16xf32>
    %cst_17 = arith.constant dense<0.000000e+00> : vector<2x16xf32>
    %57 = vector.multi_reduction <add>, %56, %cst_17 [2] : vector<2x16x16xf32> to vector<2x16xf32>
    %58 = vector.shape_cast %57 : vector<2x16xf32> to vector<2x16x1xf32>
    %59 = tpu.reciprocal %58 {approx = true} : vector<2x16x1xf32> -> vector<2x16x1xf32>
    %60 = vector.broadcast %59 : vector<2x16x1xf32> to vector<2x16x16xf32>
    %61 = arith.mulf %56, %60 : vector<2x16x16xf32>
    %62 = arith.truncf %61 : vector<2x16x16xf32> to vector<2x16x16xbf16>
    %63 = arith.truncf %44 : vector<2x16x32xf32> to vector<2x16x32xbf16>
    "tpu.trace_start"() <{level = 10 : i32, message = "bqk,bkd->bqd"}> : () -> ()
    %cst_18 = arith.constant dense<0.000000e+00> : vector<2x16x32xf32>
    %64 = tpu.matmul %62, %63, %cst_18 {dimension_numbers = #tpu.dot_dimension_numbers<[2], [1], [1], [2], [0, 0, 0, 1, 1, 2], [0], [0]>} : vector<2x16x16xbf16>, vector<2x16x32xbf16>, vector<2x16x32xf32> -> vector<2x16x32xf32>
    "tpu.trace_stop"() : () -> ()
    %65 = vector.extract_strided_slice %10 {offsets = [0, 0, 64], sizes = [2, 16, 32], strides = [1, 1, 1]} : vector<2x16x128xf32> to vector<2x16x32xf32>
    %66 = vector.extract_strided_slice %12 {offsets = [0, 0, 64], sizes = [2, 16, 32], strides = [1, 1, 1]} : vector<2x16x128xf32> to vector<2x16x32xf32>
    %67 = vector.extract_strided_slice %14 {offsets = [0, 0, 64], sizes = [2, 16, 32], strides = [1, 1, 1]} : vector<2x16x128xf32> to vector<2x16x32xf32>
    %68 = arith.truncf %65 : vector<2x16x32xf32> to vector<2x16x32xbf16>
    %69 = arith.truncf %66 : vector<2x16x32xf32> to vector<2x16x32xbf16>
    "tpu.trace_start"() <{level = 10 : i32, message = "bqd,bkd->bqk"}> : () -> ()
    %cst_19 = arith.constant dense<0.000000e+00> : vector<2x16x16xf32>
    %70 = tpu.matmul %68, %69, %cst_19 {dimension_numbers = #tpu.dot_dimension_numbers<[2], [2], [1], [1], [0, 0, 0, 1, 1, 1], [0], [0]>} : vector<2x16x32xbf16>, vector<2x16x32xbf16>, vector<2x16x16xf32> -> vector<2x16x16xf32>
    "tpu.trace_stop"() : () -> ()
    %cst_20 = arith.constant 0.176776692 : f32
    %71 = vector.broadcast %cst_20 : f32 to vector<2x16x16xf32>
    %72 = arith.mulf %70, %71 : vector<2x16x16xf32>
    %73 = vector.broadcast %18 : vector<2x1x16xf32> to vector<2x16x16xf32>
    %74 = arith.addf %72, %73 : vector<2x16x16xf32>
    %cst_21 = arith.constant dense<0xFF800000> : vector<2x16xf32>
    %75 = vector.multi_reduction <maximumf>, %74, %cst_21 [2] : vector<2x16x16xf32> to vector<2x16xf32>
    %76 = vector.shape_cast %75 : vector<2x16xf32> to vector<2x16x1xf32>
    %77 = vector.broadcast %76 : vector<2x16x1xf32> to vector<2x16x16xf32>
    %78 = arith.subf %74, %77 : vector<2x16x16xf32>
    %79 = math.exp %78 : vector<2x16x16xf32>
    %cst_22 = arith.constant dense<0.000000e+00> : vector<2x16xf32>
    %80 = vector.multi_reduction <add>, %79, %cst_22 [2] : vector<2x16x16xf32> to vector<2x16xf32>
    %81 = vector.shape_cast %80 : vector<2x16xf32> to vector<2x16x1xf32>
    %82 = tpu.reciprocal %81 {approx = true} : vector<2x16x1xf32> -> vector<2x16x1xf32>
    %83 = vector.broadcast %82 : vector<2x16x1xf32> to vector<2x16x16xf32>
    %84 = arith.mulf %79, %83 : vector<2x16x16xf32>
    %85 = arith.truncf %84 : vector<2x16x16xf32> to vector<2x16x16xbf16>
    %86 = arith.truncf %67 : vector<2x16x32xf32> to vector<2x16x32xbf16>
    "tpu.trace_start"() <{level = 10 : i32, message = "bqk,bkd->bqd"}> : () -> ()
    %cst_23 = arith.constant dense<0.000000e+00> : vector<2x16x32xf32>
    %87 = tpu.matmul %85, %86, %cst_23 {dimension_numbers = #tpu.dot_dimension_numbers<[2], [1], [1], [2], [0, 0, 0, 1, 1, 2], [0], [0]>} : vector<2x16x16xbf16>, vector<2x16x32xbf16>, vector<2x16x32xf32> -> vector<2x16x32xf32>
    "tpu.trace_stop"() : () -> ()
    %88 = vector.extract_strided_slice %10 {offsets = [0, 0, 96], sizes = [2, 16, 32], strides = [1, 1, 1]} : vector<2x16x128xf32> to vector<2x16x32xf32>
    %89 = vector.extract_strided_slice %12 {offsets = [0, 0, 96], sizes = [2, 16, 32], strides = [1, 1, 1]} : vector<2x16x128xf32> to vector<2x16x32xf32>
    %90 = vector.extract_strided_slice %14 {offsets = [0, 0, 96], sizes = [2, 16, 32], strides = [1, 1, 1]} : vector<2x16x128xf32> to vector<2x16x32xf32>
    %91 = arith.truncf %88 : vector<2x16x32xf32> to vector<2x16x32xbf16>
    %92 = arith.truncf %89 : vector<2x16x32xf32> to vector<2x16x32xbf16>
    "tpu.trace_start"() <{level = 10 : i32, message = "bqd,bkd->bqk"}> : () -> ()
    %cst_24 = arith.constant dense<0.000000e+00> : vector<2x16x16xf32>
    %93 = tpu.matmul %91, %92, %cst_24 {dimension_numbers = #tpu.dot_dimension_numbers<[2], [2], [1], [1], [0, 0, 0, 1, 1, 1], [0], [0]>} : vector<2x16x32xbf16>, vector<2x16x32xbf16>, vector<2x16x16xf32> -> vector<2x16x16xf32>
    "tpu.trace_stop"() : () -> ()
    %cst_25 = arith.constant 0.176776692 : f32
    %94 = vector.broadcast %cst_25 : f32 to vector<2x16x16xf32>
    %95 = arith.mulf %93, %94 : vector<2x16x16xf32>
    %96 = vector.broadcast %18 : vector<2x1x16xf32> to vector<2x16x16xf32>
    %97 = arith.addf %95, %96 : vector<2x16x16xf32>
    %cst_26 = arith.constant dense<0xFF800000> : vector<2x16xf32>
    %98 = vector.multi_reduction <maximumf>, %97, %cst_26 [2] : vector<2x16x16xf32> to vector<2x16xf32>
    %99 = vector.shape_cast %98 : vector<2x16xf32> to vector<2x16x1xf32>
    %100 = vector.broadcast %99 : vector<2x16x1xf32> to vector<2x16x16xf32>
    %101 = arith.subf %97, %100 : vector<2x16x16xf32>
    %102 = math.exp %101 : vector<2x16x16xf32>
    %cst_27 = arith.constant dense<0.000000e+00> : vector<2x16xf32>
    %103 = vector.multi_reduction <add>, %102, %cst_27 [2] : vector<2x16x16xf32> to vector<2x16xf32>
    %104 = vector.shape_cast %103 : vector<2x16xf32> to vector<2x16x1xf32>
    %105 = tpu.reciprocal %104 {approx = true} : vector<2x16x1xf32> -> vector<2x16x1xf32>
    %106 = vector.broadcast %105 : vector<2x16x1xf32> to vector<2x16x16xf32>
    %107 = arith.mulf %102, %106 : vector<2x16x16xf32>
    %108 = arith.truncf %107 : vector<2x16x16xf32> to vector<2x16x16xbf16>
    %109 = arith.truncf %90 : vector<2x16x32xf32> to vector<2x16x32xbf16>
    "tpu.trace_start"() <{level = 10 : i32, message = "bqk,bkd->bqd"}> : () -> ()
    %cst_28 = arith.constant dense<0.000000e+00> : vector<2x16x32xf32>
    %110 = tpu.matmul %108, %109, %cst_28 {dimension_numbers = #tpu.dot_dimension_numbers<[2], [1], [1], [2], [0, 0, 0, 1, 1, 2], [0], [0]>} : vector<2x16x16xbf16>, vector<2x16x32xbf16>, vector<2x16x32xf32> -> vector<2x16x32xf32>
    "tpu.trace_stop"() : () -> ()
    %111 = tpu.concatenate %41, %64, %87, %110 in 2 : vector<2x16x32xf32>, vector<2x16x32xf32>, vector<2x16x32xf32>, vector<2x16x32xf32> -> vector<2x16x128xf32>
    %112 = vector.shape_cast %111 : vector<2x16x128xf32> to vector<32x128xf32>
    %c0_29 = arith.constant 0 : index
    %c0_30 = arith.constant 0 : index
    %113 = vector.load %arg4[%c0_29, %c0_30] : memref<128x128xf32, #tpu.memory_space<vmem>>, vector<128x128xf32>
    %114 = arith.truncf %112 : vector<32x128xf32> to vector<32x128xbf16>
    %115 = arith.truncf %113 : vector<128x128xf32> to vector<128x128xbf16>
    %cst_31 = arith.constant dense<0.000000e+00> : vector<32x128xf32>
    %116 = tpu.matmul %114, %115, %cst_31 {dimension_numbers = #tpu.dot_dimension_numbers<[1], [0], [0], [1], [0, 0, 1, 1], [], []>} : vector<32x128xbf16>, vector<128x128xbf16>, vector<32x128xf32> -> vector<32x128xf32>
    %c0_32 = arith.constant 0 : index
    %c0_33 = arith.constant 0 : index
    %117 = vector.load %arg5[%c0_32, %c0_33] : memref<1x128xf32, #tpu.memory_space<vmem>>, vector<1x128xf32>
    %118 = vector.broadcast %117 : vector<1x128xf32> to vector<32x128xf32>
    %119 = arith.addf %116, %118 : vector<32x128xf32>
    %120 = arith.addf %1, %119 : vector<32x128xf32>
    %c0_34 = arith.constant 0 : index
    %c0_35 = arith.constant 0 : index
    %121 = vector.load %arg6[%c0_34, %c0_35] : memref<1x128xf32, #tpu.memory_space<vmem>>, vector<1x128xf32>
    %c0_36 = arith.constant 0 : index
    %c0_37 = arith.constant 0 : index
    %122 = vector.load %arg7[%c0_36, %c0_37] : memref<1x128xf32, #tpu.memory_space<vmem>>, vector<1x128xf32>
    %cst_38 = arith.constant dense<0.000000e+00> : vector<32xf32>
    %123 = vector.multi_reduction <add>, %120, %cst_38 [1] : vector<32x128xf32> to vector<32xf32>
    %124 = vector.shape_cast %123 : vector<32xf32> to vector<32x1xf32>
    %cst_39 = arith.constant 1.280000e+02 : f32
    %125 = vector.broadcast %cst_39 : f32 to vector<32x1xf32>
    %126 = arith.divf %124, %125 : vector<32x1xf32>
    %127 = vector.broadcast %126 : vector<32x1xf32> to vector<32x128xf32>
    %128 = arith.subf %120, %127 : vector<32x128xf32>
    %129 = arith.mulf %128, %128 : vector<32x128xf32>
    %cst_40 = arith.constant dense<0.000000e+00> : vector<32xf32>
    %130 = vector.multi_reduction <add>, %129, %cst_40 [1] : vector<32x128xf32> to vector<32xf32>
    %131 = vector.shape_cast %130 : vector<32xf32> to vector<32x1xf32>
    %cst_41 = arith.constant 1.280000e+02 : f32
    %132 = vector.broadcast %cst_41 : f32 to vector<32x1xf32>
    %133 = arith.divf %131, %132 : vector<32x1xf32>
    %cst_42 = arith.constant 9.99999974E-6 : f32
    %134 = vector.broadcast %cst_42 : f32 to vector<32x1xf32>
    %135 = arith.addf %133, %134 : vector<32x1xf32>
    %136 = math.rsqrt %135 : vector<32x1xf32>
    %137 = vector.broadcast %136 : vector<32x1xf32> to vector<32x128xf32>
    %138 = arith.mulf %128, %137 : vector<32x128xf32>
    %139 = vector.broadcast %121 : vector<1x128xf32> to vector<32x128xf32>
    %140 = arith.mulf %138, %139 : vector<32x128xf32>
    %141 = vector.broadcast %122 : vector<1x128xf32> to vector<32x128xf32>
    %142 = arith.addf %140, %141 : vector<32x128xf32>
    %c0_43 = arith.constant 0 : index
    %c0_44 = arith.constant 0 : index
    %143 = vector.load %arg8[%c0_43, %c0_44] : memref<128x256xf32, #tpu.memory_space<vmem>>, vector<128x256xf32>
    %144 = arith.truncf %142 : vector<32x128xf32> to vector<32x128xbf16>
    %145 = arith.truncf %143 : vector<128x256xf32> to vector<128x256xbf16>
    %cst_45 = arith.constant dense<0.000000e+00> : vector<32x256xf32>
    %146 = tpu.matmul %144, %145, %cst_45 {dimension_numbers = #tpu.dot_dimension_numbers<[1], [0], [0], [1], [0, 0, 1, 1], [], []>} : vector<32x128xbf16>, vector<128x256xbf16>, vector<32x256xf32> -> vector<32x256xf32>
    %c0_46 = arith.constant 0 : index
    %c0_47 = arith.constant 0 : index
    %147 = vector.load %arg9[%c0_46, %c0_47] : memref<1x256xf32, #tpu.memory_space<vmem>>, vector<1x256xf32>
    %148 = vector.broadcast %147 : vector<1x256xf32> to vector<32x256xf32>
    %149 = arith.addf %146, %148 : vector<32x256xf32>
    %cst_48 = arith.constant 0.000000e+00 : f32
    %150 = vector.broadcast %cst_48 : f32 to vector<32x256xf32>
    %151 = arith.maximumf %149, %150 : vector<32x256xf32>
    %c0_49 = arith.constant 0 : index
    %c0_50 = arith.constant 0 : index
    %152 = vector.load %arg10[%c0_49, %c0_50] : memref<256x128xf32, #tpu.memory_space<vmem>>, vector<256x128xf32>
    %153 = arith.truncf %151 : vector<32x256xf32> to vector<32x256xbf16>
    %154 = arith.truncf %152 : vector<256x128xf32> to vector<256x128xbf16>
    %cst_51 = arith.constant dense<0.000000e+00> : vector<32x128xf32>
    %155 = tpu.matmul %153, %154, %cst_51 {dimension_numbers = #tpu.dot_dimension_numbers<[1], [0], [0], [1], [0, 0, 1, 1], [], []>} : vector<32x256xbf16>, vector<256x128xbf16>, vector<32x128xf32> -> vector<32x128xf32>
    %c0_52 = arith.constant 0 : index
    %c0_53 = arith.constant 0 : index
    %156 = vector.load %arg11[%c0_52, %c0_53] : memref<1x128xf32, #tpu.memory_space<vmem>>, vector<1x128xf32>
    %157 = vector.broadcast %156 : vector<1x128xf32> to vector<32x128xf32>
    %158 = arith.addf %155, %157 : vector<32x128xf32>
    %159 = arith.addf %142, %158 : vector<32x128xf32>
    %c0_54 = arith.constant 0 : index
    %c0_55 = arith.constant 0 : index
    %160 = vector.load %arg12[%c0_54, %c0_55] : memref<1x128xf32, #tpu.memory_space<vmem>>, vector<1x128xf32>
    %c0_56 = arith.constant 0 : index
    %c0_57 = arith.constant 0 : index
    %161 = vector.load %arg13[%c0_56, %c0_57] : memref<1x128xf32, #tpu.memory_space<vmem>>, vector<1x128xf32>
    %cst_58 = arith.constant dense<0.000000e+00> : vector<32xf32>
    %162 = vector.multi_reduction <add>, %159, %cst_58 [1] : vector<32x128xf32> to vector<32xf32>
    %163 = vector.shape_cast %162 : vector<32xf32> to vector<32x1xf32>
    %cst_59 = arith.constant 1.280000e+02 : f32
    %164 = vector.broadcast %cst_59 : f32 to vector<32x1xf32>
    %165 = arith.divf %163, %164 : vector<32x1xf32>
    %166 = vector.broadcast %165 : vector<32x1xf32> to vector<32x128xf32>
    %167 = arith.subf %159, %166 : vector<32x128xf32>
    %168 = arith.mulf %167, %167 : vector<32x128xf32>
    %cst_60 = arith.constant dense<0.000000e+00> : vector<32xf32>
    %169 = vector.multi_reduction <add>, %168, %cst_60 [1] : vector<32x128xf32> to vector<32xf32>
    %170 = vector.shape_cast %169 : vector<32xf32> to vector<32x1xf32>
    %cst_61 = arith.constant 1.280000e+02 : f32
    %171 = vector.broadcast %cst_61 : f32 to vector<32x1xf32>
    %172 = arith.divf %170, %171 : vector<32x1xf32>
    %cst_62 = arith.constant 9.99999974E-6 : f32
    %173 = vector.broadcast %cst_62 : f32 to vector<32x1xf32>
    %174 = arith.addf %172, %173 : vector<32x1xf32>
    %175 = math.rsqrt %174 : vector<32x1xf32>
    %176 = vector.broadcast %175 : vector<32x1xf32> to vector<32x128xf32>
    %177 = arith.mulf %167, %176 : vector<32x128xf32>
    %178 = vector.broadcast %160 : vector<1x128xf32> to vector<32x128xf32>
    %179 = arith.mulf %177, %178 : vector<32x128xf32>
    %180 = vector.broadcast %161 : vector<1x128xf32> to vector<32x128xf32>
    %181 = arith.addf %179, %180 : vector<32x128xf32>
    %182 = vector.shape_cast %181 : vector<32x128xf32> to vector<2x16x128xf32>
    %c0_63 = arith.constant 0 : index
    %c0_64 = arith.constant 0 : index
    %c0_65 = arith.constant 0 : index
    %183 = vector.load %arg14[%c0_63, %c0_64, %c0_65] : memref<2x16x128xf32, #tpu.memory_space<vmem>>, vector<2x16x128xf32>
    tpu.vector_store %arg14[%c0_63, %c0_64, %c0_65], %182 {strides = array<i32>} : memref<2x16x128xf32, #tpu.memory_space<vmem>>, vector<2x16x128xf32>,
    return
  }
}

module attributes {stable_mosaic.version = 11 : i64} {
  func.func @_pool_fc_kernel(%arg0: memref<2x16x128xf32, #tpu.memory_space<vmem>>, %arg1: memref<2x16xf32, #tpu.memory_space<vmem>>, %arg2: memref<128x4xf32, #tpu.memory_space<vmem>>, %arg3: memref<1x4xf32, #tpu.memory_space<vmem>>, %arg4: memref<2x4xf32, #tpu.memory_space<vmem>>) attributes {dimension_semantics = [], scalar_prefetch = 0 : i64, scratch_operands = 0 : i64, tpu.core_type = #tpu.core_type<tc>} {
    %c0 = arith.constant 0 : index
    %c0_0 = arith.constant 0 : index
    %c0_1 = arith.constant 0 : index
    %0 = vector.load %arg0[%c0, %c0_0, %c0_1] : memref<2x16x128xf32, #tpu.memory_space<vmem>>, vector<2x16x128xf32>
    %cst = arith.constant dense<0.000000e+00> : vector<2x128xf32>
    %1 = vector.multi_reduction <add>, %0, %cst [1] : vector<2x16x128xf32> to vector<2x128xf32>
    %c0_2 = arith.constant 0 : index
    %c0_3 = arith.constant 0 : index
    %2 = vector.load %arg1[%c0_2, %c0_3] : memref<2x16xf32, #tpu.memory_space<vmem>>, vector<2x16xf32>
    %cst_4 = arith.constant 1.000000e+00 : f32
    %3 = vector.broadcast %cst_4 : f32 to vector<2x16xf32>
    %4 = arith.subf %3, %2 : vector<2x16xf32>
    %cst_5 = arith.constant dense<0.000000e+00> : vector<2xf32>
    %5 = vector.multi_reduction <add>, %4, %cst_5 [1] : vector<2x16xf32> to vector<2xf32>
    %6 = vector.shape_cast %5 : vector<2xf32> to vector<2x1xf32>
    %7 = vector.broadcast %6 : vector<2x1xf32> to vector<2x128xf32>
    %8 = arith.divf %1, %7 : vector<2x128xf32>
    %c0_6 = arith.constant 0 : index
    %c0_7 = arith.constant 0 : index
    %9 = vector.load %arg2[%c0_6, %c0_7] : memref<128x4xf32, #tpu.memory_space<vmem>>, vector<128x4xf32>
    %cst_8 = arith.constant dense<0.000000e+00> : vector<2x4xf32>
    %10 = tpu.matmul %8, %9, %cst_8 {dimension_numbers = #tpu.dot_dimension_numbers<[1], [0], [0], [1], [0, 0, 1, 1], [], []>} : vector<2x128xf32>, vector<128x4xf32>, vector<2x4xf32> -> vector<2x4xf32>
    %c0_9 = arith.constant 0 : index
    %c0_10 = arith.constant 0 : index
    %11 = vector.load %arg3[%c0_9, %c0_10] : memref<1x4xf32, #tpu.memory_space<vmem>>, vector<1x4xf32>
    %12 = vector.broadcast %11 : vector<1x4xf32> to vector<2x4xf32>
    %13 = arith.addf %10, %12 : vector<2x4xf32>
    %cst_11 = arith.constant dense<0xFF800000> : vector<2xf32>
    %14 = vector.multi_reduction <maximumf>, %13, %cst_11 [1] : vector<2x4xf32> to vector<2xf32>
    %15 = vector.shape_cast %14 : vector<2xf32> to vector<2x1xf32>
    %16 = vector.broadcast %15 : vector<2x1xf32> to vector<2x4xf32>
    %17 = arith.subf %13, %16 : vector<2x4xf32>
    %18 = math.exp %17 : vector<2x4xf32>
    %cst_12 = arith.constant dense<0.000000e+00> : vector<2xf32>
    %19 = vector.multi_reduction <add>, %18, %cst_12 [1] : vector<2x4xf32> to vector<2xf32>
    %20 = vector.shape_cast %19 : vector<2xf32> to vector<2x1xf32>
    %21 = math.log %20 : vector<2x1xf32>
    %22 = arith.addf %15, %21 : vector<2x1xf32>
    %23 = vector.broadcast %22 : vector<2x1xf32> to vector<2x4xf32>
    %24 = arith.subf %13, %23 : vector<2x4xf32>
    %c0_13 = arith.constant 0 : index
    %c0_14 = arith.constant 0 : index
    %25 = vector.load %arg4[%c0_13, %c0_14] : memref<2x4xf32, #tpu.memory_space<vmem>>, vector<2x4xf32>
    tpu.vector_store %arg4[%c0_13, %c0_14], %24 {strides = array<i32>} : memref<2x4xf32, #tpu.memory_space<vmem>>, vector<2x4xf32>,
    return
  }
}

</mosaic_0001>

<bundles_post_ra>
// kernel: forward.4
= control target key start
LH: loop header
LB: loop body
LE: loop exit
PB: predicated region body
PF: predicated region fallthrough
CT: control target
= control target key end

     0   :  { %7 = vsyncpa [#allocation4], 0  ;;  %s146_s0 = inlined_call_operand.vmem [shape: s32[32], index: 0, kind: input, shape index: {}]   ;;  %s147_s1 = inlined_call_operand.hbm [shape: f32[100,128], index: 1, kind: input, shape index: {}]   ;;  %s148_s2 = inlined_call_operand.vmem [shape: f32[32,128], index: 2, kind: output, shape index: {}]  }
   0x1   :  { %s15_s11 = sshll.u32 %s146_s0, 4  ;;  %s16_s11 = int_to_ptr.vmem [resolvable:$true] %s15_s11 }
   0x2   :  { %8 = vsyncpa [#allocation3], 0  ;;  %s74_s12 = scalar_lea.vmem %s16_s11, 16  ;;  %p79_p1 = scmp.lt.s32.totalorder %s16_s11, %s16_s11 }
   0x3   :  { %p75_p0 = scmp.ne.s32.totalorder %s16_s11, %s74_s12  ;;  %p80_p2 = scmp.lt.s32.totalorder %s74_s12, %s74_s12 }
   0x5   :  { %p81_p3 = por %p80_p2, %p79_p1 }
   0x7   :  { %p82_p4 = pnand %p81_p3, %p75_p0 }
   0x9   :  { %85 = shalt.err (!%p82_p4)
}
   0xa   :  { %s118_s13 = smov [#allocation2]   ;;  %s119_s14 = smov [#allocation5]  }
   0xb   :  { %18 = dma.vmem_to_smem %s16_s11, 16, %s118_s13, [#allocation4]  }
   0xc   :  { %s24_s15 = sshll.u32 %s119_s14, 4  ;;  %s25_s15 = int_to_ptr.vmem [resolvable:$true] %s24_s15 }
   0xd   :  { %s94_s16 = scalar_lea.vmem %s25_s15, 1664  ;;  %p99_p6 = scmp.lt.s32.totalorder %s25_s15, %s25_s15 }
   0xe   :  { %p95_p5 = scmp.ne.s32.totalorder %s25_s15, %s94_s16  ;;  %p100_p7 = scmp.lt.s32.totalorder %s94_s16, %s94_s16 }
  0x10   :  { %p101_p8 = por %p100_p7, %p99_p6 }
  0x12   :  { %p102_p9 = pnand %p101_p8, %p95_p5 }
  0x14   :  { %105 = shalt.err (!%p102_p9)
}
  0x15   :  { %s120_s0 = smov 128   ;;  %s121_s17 = smov 8  }
  0x16   :  { %30 = dma.hbm_to_vmem [thread:$0]  %s147_s1, 1664, %s25_s15, [#allocation3], %s120_s0, %s120_s0, %s121_s17  }
  0x17   :  { %110 = dma.done.wait [#allocation4], 16  }
  0x18   :  { %111 = vsyncadd [#allocation4], 4294967280 }
  0x19   :  { %112 = dma.done.wait [#allocation3], 1664  }
  0x1a   :  { %113 = vsyncadd [#allocation3], 4294965632 }
  0x1b   :  { %37 = sfence }
  0x1c   :  { %s114_s20 = smov 0  }
  0x1d LB: > { %s44_s21 = sld [smem:[#allocation2 + %s116_s20]]  ;;  %s47_s24 = scalar_lea.vmem %s148_s2, %s116_s20  ;;  %s116_s20 = sphi %s114_s20, %s43_s20  }
  0x1e   : > { %s43_s20 = sadd.s32 1, %s116_s20  }
  0x1f   : > { %p40_p10 = scmp.ge.s32.totalorder %s43_s20, 32  }
  0x21   :  { %42 = sbr.rel (!%p40_p10) target bundleno = 29 (0x1d), region = 45 }
  0x23   : > { %s45_s25 = scalar_lea.vmem [#allocation5], %s44_s21 }
  0x24   : > { %v46_v0 = vld [vmem:[%s45_s25] sm:$0x1] }
  0x25   : > { %48 = vst [vmem:[%s47_s24] sm:$0x1] %v46_v0 }
  0x26   :  { %53 = vsyncpa [#allocation3], 1 }
  0x27   :  { %54 = vsyncpa [#allocation4], 1 }

// kernel: forward.7
= control target key start
LH: loop header
LB: loop body
LE: loop exit
PB: predicated region body
PF: predicated region fallthrough
CT: control target
= control target key end

     0   :  { %vm38_vm0 = vcmask 123904   ;;  %v264_v3 = vmov 0.0   ;;  %s364_s0 = inlined_call_operand.vmem [shape: f32[2,16,128], index: 0, kind: input, shape index: {}]   ;;  %s365_s1 = inlined_call_operand.vmem [shape: f32[2,16], index: 1, kind: input, shape index: {}]   ;;  %s366_s2 = inlined_call_operand.vmem [shape: f32[128,4], index: 2, kind: input, shape index: {}]   ;;  %s367_s3 = inlined_call_operand.vmem [shape: f32[1,4], index: 3, kind: input, shape index: {}]   ;;  %s368_s4 = inlined_call_operand.hbm [shape: f32[2,4], index: 4, kind: output, shape index: {}]  }
   0x1   :  { %v36_v0 = vld [vmem:[%s365_s1] sm:$0x3]  ;;  %v65_v1 = vld [vmem:[%s366_s2 + $0x78] sm:$0xff]  ;;  %196 = vmatprep.subr.mxu0 %v264_v3  ;;  %v64_v4 = vld [vmem:[%s366_s2 + $0x70] sm:$0xff] }
   0x2   :  { %v37_v2 = vsub.f32 1.0, %v36_v0  ;;  %197 = vmatpush3.msra.mxu0 %v65_v1 }
   0x3   :  { %9 = vsyncpa [#allocation3], 0  ;;  %198 = vmatprep.subr.mxu0 %v264_v3  ;;  %v63_v6 = vld [vmem:[%s366_s2 + $0x68] sm:$0xff]  ;;  %v62_v7 = vld [vmem:[%s366_s2 + $0x60] sm:$0xff]  ;;  %vm265_vm1 = vmmov 0   ;;  %vm76_vm2 = vcmask 1041409  }
   0x4   :  { %v39_v5 = vsel %vm38_vm0, %v37_v2, 0.0  ;;  %199 = vmatpush3.msra.mxu0 %v64_v4  ;;  %v61_v8 = vld [vmem:[%s366_s2 + $0x58] sm:$0xff]  ;;  %v60_v9 = vld [vmem:[%s366_s2 + $0x50] sm:$0xff]  ;;  %v59_v10 = vld [vmem:[%s366_s2 + $0x48] sm:$0xff]  ;;  %228 = vmatprep.mubr.msk.f32.mxu0 %vm265_vm1, %v264_v3  ;;  %vm149_vm3 = vcmask 25600  }
   0x5   :  { %40 = vadd.xlane.f32.xlu0 %v39_v5  ;;  %200 = vmatprep.subr.mxu0 %v264_v3  ;;  %v58_v11 = vld [vmem:[%s366_s2 + $0x40] sm:$0xff]  ;;  %v57_v12 = vld [vmem:[%s366_s2 + $0x38] sm:$0xff]  ;;  %v56_v13 = vld [vmem:[%s366_s2 + $0x30] sm:$0xff] }
   0x6   :  { %201 = vmatpush3.msra.mxu0 %v63_v6  ;;  %v55_v14 = vld [vmem:[%s366_s2 + $0x28] sm:$0xff]  ;;  %v54_v15 = vld [vmem:[%s366_s2 + $0x20] sm:$0xff]  ;;  %v53_v16 = vld [vmem:[%s366_s2 + $0x18] sm:$0xff] }
   0x7   :  { %202 = vmatprep.subr.mxu0 %v264_v3  ;;  %v52_v17 = vld [vmem:[%s366_s2 + $0x10] sm:$0xff]  ;;  %v51_v18 = vld [vmem:[%s366_s2 + $0x8] sm:$0xff]  ;;  %v50_v19 = vld [vmem:[%s366_s2] sm:$0xff] }
   0x8   :  { %203 = vmatpush3.msra.mxu0 %v62_v7  ;;  %v20_v20 = vld [vmem:[%s364_s0 + $0x10] sm:$0xff]  ;;  %v21_v21 = vld [vmem:[%s364_s0 + $0x18] sm:$0xff]  ;;  %v18_v22 = vld [vmem:[%s364_s0] sm:$0xff] }
   0x9   :  { %204 = vmatprep.subr.mxu0 %v264_v3  ;;  %v19_v23 = vld [vmem:[%s364_s0 + $0x8] sm:$0xff]  ;;  %v29_v24 = vadd.f32 %v21_v21, %v20_v20  ;;  %v178_v46 = vld [vmem:[%s367_s3] ss:$0 sm:$0xff]  ;;  %s266_s3 = smov [#allocation2]  }
   0xa   :  { %205 = vmatpush3.msra.mxu0 %v61_v8  ;;  %v22_v25 = vadd.f32 %v19_v23, %v18_v22  ;;  %s170_s29 = sshll.u32 %s266_s3, 4  ;;  %s171_s29 = int_to_ptr.vmem [resolvable:$true] %s170_s29 }
   0xb   :  { %206 = vmatprep.subr.mxu0 %v264_v3  ;;  %v30_v26 = vrot.slane %v29_v24, 4  ;;  %s242_s30 = scalar_lea.vmem %s171_s29, 32  ;;  %p247_p1 = scmp.lt.s32.totalorder %s171_s29, %s171_s29 }
   0xc   :  { %207 = vmatpush3.msra.mxu0 %v60_v9  ;;  %v23_v27 = vrot.slane %v22_v25, 4  ;;  %p243_p0 = scmp.ne.s32.totalorder %s171_s29, %s242_s30  ;;  %p248_p2 = scmp.lt.s32.totalorder %s242_s30, %s242_s30 }
   0xd   :  { %208 = vmatprep.subr.mxu0 %v264_v3  ;;  %v31_v28 = vadd.f32 %v30_v26, %v29_v24 }
   0xe   :  { %209 = vmatpush3.msra.mxu0 %v59_v10  ;;  %v24_v29 = vadd.f32 %v23_v27, %v22_v25  ;;  %p249_p3 = por %p248_p2, %p247_p1 }
   0xf   :  { %210 = vmatprep.subr.mxu0 %v264_v3  ;;  %v32_v32 = vrot.slane %v31_v28, 2 }
  0x10   :  { %211 = vmatpush3.msra.mxu0 %v58_v11  ;;  %v25_v33 = vrot.slane %v24_v29, 2  ;;  %p250_p4 = pnand %p249_p3, %p243_p0 }
  0x11   :  { %212 = vmatprep.subr.mxu0 %v264_v3  ;;  %v33_v34 = vadd.f32 %v32_v32, %v31_v28 }
  0x12   :  { %213 = vmatpush3.msra.mxu0 %v57_v12  ;;  %v26_v35 = vadd.f32 %v25_v33, %v24_v29 }
  0x13   :  { %214 = vmatprep.subr.mxu0 %v264_v3  ;;  %v34_v36 = vrot.slane %v33_v34, 1 }
  0x14   :  { %215 = vmatpush3.msra.mxu0 %v56_v13  ;;  %v27_v37 = vrot.slane %v26_v35, 1 }
  0x15   :  { %216 = vmatprep.subr.mxu0 %v264_v3  ;;  %v35_v38 = vadd.f32 %v34_v36, %v33_v34 }
  0x16   :  { %217 = vmatpush3.msra.mxu0 %v55_v14  ;;  %v28_v40 = vadd.f32 %v27_v37, %v26_v35 }
  0x17   :  { %218 = vmatprep.subr.mxu0 %v264_v3 }
  0x18   :  { %219 = vmatpush3.msra.mxu0 %v54_v15 }
  0x19   :  { %220 = vmatprep.subr.mxu0 %v264_v3 }
  0x1a   :  { %221 = vmatpush3.msra.mxu0 %v53_v16 }
  0x1b   :  { %222 = vmatprep.subr.mxu0 %v264_v3 }
  0x1c   :  { %223 = vmatpush3.msra.mxu0 %v52_v17 }
  0x1d   :  { %224 = vmatprep.subr.mxu0 %v264_v3 }
  0x1e   :  { %225 = vmatpush3.msra.mxu0 %v51_v18 }
  0x1f   :  { %226 = vmatprep.subr.mxu0 %v264_v3 }
  0x20   :  { %227 = vmatpush3.msra.mxu0 %v50_v19 }
  0x8e   :  { %v41_v30 = vpop.xlane.xlu0 %40 }
  0x8f   :  { %v43_v31 = vrot.slane %v41_v30, 1  ;;  %234 = vrcp.f32 %v41_v30 }
  0x91   :  { %236 = vrcp.f32 %v43_v31 }
  0x9c   :  { %v235_v39 = vpop.eup %234 }
  0x9d   :  { %v47_v43 = vmul.f32 %v235_v39, %v28_v40 }
  0x9e   :  { %v237_v41 = vpop.eup %236 }
  0x9f   :  { %v49_v42 = vmul.f32 %v237_v41, %v35_v38 }
  0xa1   :  { %v75_v44 = vrot.slane %v49_v42, 7 }
  0xa3   :  { %v77_v45 = vsel %vm76_vm2, %v75_v44, %v47_v43 }
  0xa4   :  { %229 = vmatmul.mubr.f32.vlgmr.msra.gmra.mxu0 %v77_v45 }
 0x164   :  { %v145_v47 = vpop.f32.mrf.mxu0 }
 0x165   :  { %v146_v48 = vadd.f32 %v178_v46, %v145_v47 }
 0x166   :  { %v230_v49 = vpop.f32.mrf.mxu0 }
 0x167   :  { %v150_v50 = vsel %vm149_vm3, %v146_v48, -inf }
 0x168   :  { %151 = vmax.xlane.f32.xlu0 %v150_v50 }
 0x1f1   :  { %v152_v51 = vpop.xlane.xlu0 %151 }
 0x1f2   :  { %v153_v52 = vsub.f32 %v146_v48, %v152_v51 }
 0x1f4   :  { %v154_v53 = vmul.f32 1.442695, %v153_v52 }
 0x1f6   :  { %238 = vpow2.f32 %v154_v53 }
 0x203   :  { %v239_v54 = vpop.eup %238 }
 0x204   :  { %v156_v55 = vsel %vm149_vm3, %v239_v54, 0.0 }
 0x205   :  { %157 = vadd.xlane.f32.xlu1 %v156_v55 }
 0x28e   :  { %v158_v56 = vpop.xlane.xlu1 %157 }
 0x28f   :  { %240 = vlog2.f32 %v158_v56 }
 0x29c   :  { %v241_v57 = vpop.eup %240 }
 0x29d   :  { %v160_v58 = vmul.f32 0.6931472, %v241_v57 }
 0x29f   :  { %v161_v59 = vadd.f32 %v160_v58, %v152_v51 }
 0x2a1   :  { %v162_v60 = vsub.f32 %v146_v48, %v161_v59 }
 0x2a3   :  { %163 = vst.msk [vmem:[#allocation2] sm:$0x3] %vm149_vm3, %v162_v60 }
 0x2a4   :  { %253 = shalt.err (!%p250_p4)
}
 0x2a5   :  { %173 = dma.vmem_to_hbm [thread:$0]  %s171_s29, 32, %s368_s4, [#allocation3]  }
 0x2a6   :  { %262 = dma.done.wait [#allocation3], 32  }
 0x2a7   :  { %263 = vsyncadd [#allocation3], 4294967264 }
 0x2a8   :  { %177 = vsyncpa [#allocation3], 1 }

// kernel: forward.5
= control target key start
LH: loop header
LB: loop body
LE: loop exit
PB: predicated region body
PF: predicated region fallthrough
CT: control target
= control target key end

     0   :  { %19 = vsyncpa [#allocation3], 0  ;;  %s2793_s0 = inlined_call_operand.vmem [shape: f32[2,16,128], index: 0, kind: input, shape index: {}]   ;;  %s2794_s1 = inlined_call_operand.vmem [shape: f32[2,16], index: 1, kind: input, shape index: {}]   ;;  %s2795_s2 = inlined_call_operand.hbm [shape: f32[128,384], index: 2, kind: input, shape index: {}]   ;;  %s2796_s3 = inlined_call_operand.vmem [shape: f32[1,384], index: 3, kind: input, shape index: {}]   ;;  %s2797_s4 = inlined_call_operand.vmem [shape: f32[128,128], index: 4, kind: input, shape index: {}]   ;;  %s2798_s5 = inlined_call_operand.vmem [shape: f32[1,128], index: 5, kind: input, shape index: {}]   ;;  %s2799_s6 = inlined_call_operand.vmem [shape: f32[1,128], index: 6, kind: input, shape index: {}]   ;;  %s2800_s7 = inlined_call_operand.vmem [shape: f32[1,128], index: 7, kind: input, shape index: {}]   ;;  %s2801_s8 = inlined_call_operand.hbm [shape: f32[128,256], index: 8, kind: input, shape index: {}]   ;;  %s2802_s9 = inlined_call_operand.vmem [shape: f32[1,256], index: 9, kind: input, shape index: {}]   ;;  %s2803_s10 = inlined_call_operand.hbm [shape: f32[256,128], index: 10, kind: input, shape index: {}]   ;;  %s2804_s11 = inlined_call_operand.vmem [shape: f32[1,128], index: 11, kind: input, shape index: {}]   ;;  %s2805_s12 = inlined_call_operand.vmem [shape: f32[1,128], index: 12, kind: input, shape index: {}]   ;;  %s2806_s13 = inlined_call_operand.vmem [shape: f32[1,128], index: 13, kind: input, shape index: {}]   ;;  %s2807_s14 = inlined_call_operand.vmem [shape: f32[2,16,128], index: 14, kind: output, shape index: {}]  }
   0x1   :  { %20 = vsyncpa [#allocation5], 0  ;;  %s2285_s29 = smov [#allocation4]  }
   0x2   :  { %s52_s30 = sshll.u32 %s2285_s29, 4  ;;  %s53_s30 = int_to_ptr.vmem [resolvable:$true] %s52_s30 }
   0x3   :  { %s2229_s15 = scalar_lea.vmem %s53_s30, 4096  ;;  %p2234_p1 = scmp.lt.s32.totalorder %s53_s30, %s53_s30 }
   0x4   :  { %p2230_p0 = scmp.ne.s32.totalorder %s53_s30, %s2229_s15  ;;  %p2235_p2 = scmp.lt.s32.totalorder %s2229_s15, %s2229_s15 }
   0x6   :  { %p2236_p3 = por %p2235_p2, %p2234_p1 }
   0x8   :  { %p2237_p4 = pnand %p2236_p3, %p2230_p0 }
   0xa   :  { %2240 = shalt.err (!%p2237_p4)
}
   0xb   :  { %s2286_s16 = smov 256   ;;  %s2287_s17 = smov 16  }
   0xc   :  { %58 = dma.hbm_to_vmem [thread:$0]  %s2801_s8, 4096, %s53_s30, [#allocation5], %s2286_s16, %s2286_s16, %s2287_s17  }
   0xd   :  { %s2288_s20 = smov [#allocation2]  }
   0xe   :  { %s30_s21 = sshll.u32 %s2288_s20, 4  ;;  %s31_s21 = int_to_ptr.vmem [resolvable:$true] %s30_s21 }
   0xf   :  { %s2249_s22 = scalar_lea.vmem %s31_s21, 6144  ;;  %p2254_p6 = scmp.lt.s32.totalorder %s31_s21, %s31_s21 }
  0x10   :  { %p2250_p5 = scmp.ne.s32.totalorder %s31_s21, %s2249_s22  ;;  %p2255_p7 = scmp.lt.s32.totalorder %s2249_s22, %s2249_s22 }
  0x12   :  { %p2256_p8 = por %p2255_p7, %p2254_p6 }
  0x14   :  { %p2257_p9 = pnand %p2256_p8, %p2250_p5 }
  0x16   :  { %2260 = shalt.err (!%p2257_p9)
}
  0x17   :  { %s2289_s23 = smov 384   ;;  %s2290_s24 = smov 24  }
  0x18   :  { %36 = dma.hbm_to_vmem [thread:$0]  %s2795_s2, 6144, %s31_s21, [#allocation3], %s2289_s23, %s2289_s23, %s2290_s24  }
  0x19   :  { %s2291_s27 = smov [#allocation6]  }
  0x1a   :  { %s66_s28 = sshll.u32 %s2291_s27, 4  ;;  %s67_s28 = int_to_ptr.vmem [resolvable:$true] %s66_s28 }
  0x1b   :  { %s2269_s8 = scalar_lea.vmem %s67_s28, 4096  ;;  %p2274_p11 = scmp.lt.s32.totalorder %s67_s28, %s67_s28 }
  0x1c   :  { %p2270_p10 = scmp.ne.s32.totalorder %s67_s28, %s2269_s8  ;;  %p2275_p12 = scmp.lt.s32.totalorder %s2269_s8, %s2269_s8 }
  0x1e   :  { %p2276_p13 = por %p2275_p12, %p2274_p11 }
  0x20   :  { %p2277_p0 = pnand %p2276_p13, %p2270_p10 }
  0x22   :  { %2280 = shalt.err (!%p2277_p0)
}
  0x23   :  { %s2292_s29 = smov 128   ;;  %s2293_s30 = smov 8  }
  0x24   :  { %72 = dma.hbm_to_vmem [thread:$0]  %s2803_s10, 4096, %s67_s28, [#allocation5], %s2292_s29, %s2292_s29, %s2293_s30  }
  0x25   :  { %2281 = dma.done.wait [#allocation3], 6144  }
  0x26   :  { %2282 = vsyncadd [#allocation3], 4294961152 }
  0x27   :  { %2283 = dma.done.wait [#allocation5], 8192  }
  0x28   :  { %2284 = vsyncadd [#allocation5], 4294959104  ;;  %v2294_v0 = vmov 0   ;;  %v136_v1 = vld [vmem:[#allocation2 + $0x158] sm:$0xff]  ;;  %v139_v2 = vld [vmem:[#allocation2 + $0x170] sm:$0xff]  ;;  %v2295_v55 = vmov 0.0   ;;  %v169_v56 = vlaneseq }
  0x29   :  { %216 = vmatprep.mubr.bf16.mxu0 %v2294_v0  ;;  %v135_v3 = vld [vmem:[#allocation2 + $0x150] sm:$0xff]  ;;  %v165_v4 = vpack.c.bf16 %v139_v2, %v136_v1  ;;  %v138_v5 = vld [vmem:[#allocation2 + $0x168] sm:$0xff]  ;;  %v133_v7 = vld [vmem:[#allocation2 + $0x140] sm:$0xff]  ;;  %vm2296_vm0 = vmmov 0   ;;  %vm318_vm1 = vcmask 261120   ;;  %vm433_vm2 = vcmask 130048  }
  0x2a   :  { %v130_v6 = vld [vmem:[#allocation2 + $0x128] sm:$0xff]  ;;  %v164_v8 = vpack.c.bf16 %v138_v5, %v135_v3  ;;  %v129_v10 = vld [vmem:[#allocation2 + $0x120] sm:$0xff]  ;;  %v132_v11 = vld [vmem:[#allocation2 + $0x138] sm:$0xff]  ;;  %v2405_v57 = vshrl.u32 %v169_v56, 7  ;;  %s2299_s26 = smov 64   ;;  %s2300_s27 = smov 32  }
  0x2b   :  { %v162_v9 = vpack.c.bf16 %v133_v7, %v130_v6  ;;  %v124_v12 = vld [vmem:[#allocation2 + $0xf8] sm:$0xff]  ;;  %184 = vmatprep.subr.bf16.mxu0 %v165_v4  ;;  %v127_v13 = vld [vmem:[#allocation2 + $0x110] sm:$0xff]  ;;  %v161_v14 = vpack.c.bf16 %v132_v11, %v129_v10  ;;  %v126_v17 = vld [vmem:[#allocation2 + $0x108] sm:$0xff]  ;;  %vm1378_vm3 = vcmask 523264   ;;  %vm1383_vm4 = vcmask 785408  }
  0x2c   :  { %185 = vmatpush1.bf16.msra.mxu0 %v164_v8  ;;  %v159_v15 = vpack.c.bf16 %v127_v13, %v124_v12  ;;  %v123_v16 = vld [vmem:[#allocation2 + $0xf0] sm:$0xff]  ;;  %v118_v18 = vld [vmem:[#allocation2 + $0xc8] sm:$0xff]  ;;  %v121_v19 = vld [vmem:[#allocation2 + $0xe0] sm:$0xff]  ;;  %v175_v58 = vsub.s32 1, %v2405_v57  ;;  %v2417_v2 = vsub.s32 0, %v2405_v57 }
  0x2d   :  { %186 = vmatprep.subr.bf16.mxu0 %v162_v9  ;;  %v158_v20 = vpack.c.bf16 %v126_v17, %v123_v16  ;;  %v156_v21 = vpack.c.bf16 %v121_v19, %v118_v18  ;;  %v117_v22 = vld [vmem:[#allocation2 + $0xc0] sm:$0xff]  ;;  %v120_v23 = vld [vmem:[#allocation2 + $0xd8] sm:$0xff]  ;;  %v115_v25 = vld [vmem:[#allocation2 + $0xb0] sm:$0xff] }
  0x2e   :  { %v112_v24 = vld [vmem:[#allocation2 + $0x98] sm:$0xff]  ;;  %v89_v26 = vld [vmem:[%s2793_s0] sm:$0xff]  ;;  %v90_v27 = vld [vmem:[%s2793_s0 + $0x8] sm:$0xff]  ;;  %v155_v28 = vpack.c.bf16 %v120_v23, %v117_v22 }
  0x2f   :  { %v141_v29 = vpack.c.bf16 %v90_v27, %v89_v26  ;;  %v153_v30 = vpack.c.bf16 %v115_v25, %v112_v24  ;;  %v111_v31 = vld [vmem:[#allocation2 + $0x90] sm:$0xff]  ;;  %v114_v32 = vld [vmem:[#allocation2 + $0xa8] sm:$0xff]  ;;  %v109_v34 = vld [vmem:[#allocation2 + $0x80] sm:$0xff] }
  0x30   :  { %187 = vmatpush1.bf16.msra.mxu0 %v161_v14  ;;  %v106_v33 = vld [vmem:[#allocation2 + $0x68] sm:$0xff]  ;;  %v152_v35 = vpack.c.bf16 %v114_v32, %v111_v31  ;;  %v105_v37 = vld [vmem:[#allocation2 + $0x60] sm:$0xff]  ;;  %v108_v38 = vld [vmem:[#allocation2 + $0x78] sm:$0xff] }
  0x31   :  { %188 = vmatprep.subr.bf16.mxu0 %v159_v15  ;;  %1971 = vmatprep.mubr.bf16.mxu1 %v141_v29  ;;  %v150_v36 = vpack.c.bf16 %v109_v34, %v106_v33  ;;  %v100_v39 = vld [vmem:[#allocation2 + $0x38] sm:$0xff]  ;;  %v103_v40 = vld [vmem:[#allocation2 + $0x50] sm:$0xff]  ;;  %v149_v41 = vpack.c.bf16 %v108_v38, %v105_v37  ;;  %v102_v44 = vld [vmem:[#allocation2 + $0x48] sm:$0xff] }
  0x32   :  { %v147_v42 = vpack.c.bf16 %v103_v40, %v100_v39  ;;  %v99_v43 = vld [vmem:[#allocation2 + $0x30] sm:$0xff]  ;;  %v94_v45 = vld [vmem:[#allocation2 + $0x8] sm:$0xff]  ;;  %v97_v46 = vld [vmem:[#allocation2 + $0x20] sm:$0xff] }
  0x33   :  { %v146_v47 = vpack.c.bf16 %v102_v44, %v99_v43  ;;  %v144_v48 = vpack.c.bf16 %v97_v46, %v94_v45  ;;  %v93_v49 = vld [vmem:[#allocation2] sm:$0xff]  ;;  %v96_v50 = vld [vmem:[#allocation2 + $0x18] sm:$0xff]  ;;  %v91_v52 = vld [vmem:[%s2793_s0 + $0x10] sm:$0xff]  ;;  %v2297_v46 = vmov 1966171168  }
  0x34   :  { %189 = vmatpush1.bf16.msra.mxu0 %v158_v20  ;;  %v143_v51 = vpack.c.bf16 %v96_v50, %v93_v49  ;;  %v92_v53 = vld [vmem:[%s2793_s0 + $0x18] sm:$0xff]  ;;  %v2411_v60 = vld [vmem:[%s2796_s3] sm:$0x7]  ;;  %v131_v24 = vld [vmem:[#allocation2 + $0x130] sm:$0xff] }
  0x35   :  { %190 = vmatprep.subr.bf16.mxu0 %v156_v21  ;;  %v2399_v54 = vpack.c.bf16 %v92_v53, %v91_v52  ;;  %v176_v62 = vrot.slane %v2411_v60, %v175_v58  ;;  %v172_v8 = vrot.slane %v2411_v60, %v2417_v2  ;;  %v137_v22 = vld [vmem:[#allocation2 + $0x160] sm:$0xff]  ;;  %v140_v23 = vld [vmem:[#allocation2 + $0x178] sm:$0xff]  ;;  %v134_v26 = vld [vmem:[#allocation2 + $0x148] sm:$0xff] }
  0x36   :  { %v166_v25 = vpack.c.bf16 %v140_v23, %v137_v22  ;;  %v163_v27 = vpack.c.bf16 %v134_v26, %v131_v24  ;;  %v119_v31 = vld [vmem:[#allocation2 + $0xd0] sm:$0xff]  ;;  %v122_v32 = vld [vmem:[#allocation2 + $0xe8] sm:$0xff]  ;;  %v113_v34 = vld [vmem:[#allocation2 + $0xa0] sm:$0xff] }
  0x37   :  { %v157_v33 = vpack.c.bf16 %v122_v32, %v119_v31  ;;  %v107_v37 = vld [vmem:[#allocation2 + $0x70] sm:$0xff]  ;;  %v110_v38 = vld [vmem:[#allocation2 + $0x88] sm:$0xff]  ;;  %v101_v40 = vld [vmem:[#allocation2 + $0x40] sm:$0xff] }
  0x38   :  { %191 = vmatpush1.bf16.msra.mxu0 %v155_v28  ;;  %v125_v28 = vld [vmem:[#allocation2 + $0x100] sm:$0xff]  ;;  %1955 = vmatprep.subr.bf16.mxu1 %v166_v25  ;;  %v151_v39 = vpack.c.bf16 %v110_v38, %v107_v37  ;;  %v95_v43 = vld [vmem:[#allocation2 + $0x10] sm:$0xff]  ;;  %v98_v44 = vld [vmem:[#allocation2 + $0x28] sm:$0xff] }
  0x39   :  { %192 = vmatprep.subr.bf16.mxu0 %v153_v30  ;;  %1956 = vmatpush3.bf16.msra.mxu1 %v166_v25  ;;  %v145_v45 = vpack.c.bf16 %v98_v44, %v95_v43  ;;  %v1852_v50 = vld.sshfl [vmem:[%s2794_s1] sm:$0x11 pattern:$0x75316420]  ;;  %s2298_s1 = smov 96  }
  0x3a   :  { %1957 = vmatprep.subr.bf16.mxu1 %v163_v27  ;;  %v295_v52 = vcombine.high %v1852_v50, %v1852_v50 }
  0x3c   :  { %193 = vmatpush1.bf16.msra.mxu0 %v152_v35  ;;  %v116_v35 = vld [vmem:[#allocation2 + $0xb8] sm:$0xff] }
  0x3d   :  { %194 = vmatprep.subr.bf16.mxu0 %v150_v36  ;;  %1958 = vmatpush3.bf16.msra.mxu1 %v163_v27  ;;  %v154_v36 = vpack.c.bf16 %v116_v35, %v113_v34 }
  0x40   :  { %195 = vmatpush1.bf16.msra.mxu0 %v149_v41  ;;  %v104_v41 = vld [vmem:[#allocation2 + $0x58] sm:$0xff] }
  0x41   :  { %196 = vmatprep.subr.bf16.mxu0 %v147_v42  ;;  %v148_v42 = vpack.c.bf16 %v104_v41, %v101_v40 }
  0x44   :  { %197 = vmatpush1.bf16.msra.mxu0 %v146_v47  ;;  %v297_v47 = vunpack.c.l.s4 %v2297_v46 }
  0x45   :  { %198 = vmatprep.subr.bf16.mxu0 %v144_v48 }
  0x46   :  { %v298_v48 = vunpack.c.0.s8 %v297_v47 }
  0x48   :  { %199 = vmatpush1.bf16.msra.mxu0 %v143_v51  ;;  %v301_v49 = vsub.s32 %v298_v48, %v2405_v57 }
  0x49   :  { %1975 = vmatprep.subr.bf16.mxu0 %v2295_v55 }
  0x4a   :  { %v302_v51 = vrot.slane %v1852_v50, %v301_v49  ;;  %v309_v56 = vrot.slane %v295_v52, %v301_v49 }
  0x4b   :  { %217 = vmatmul.mubr.bf16.vlgmr.msra.gmra.mxu0 %v141_v29  ;;  %v128_v29 = vld [vmem:[#allocation2 + $0x118] sm:$0xff] }
  0x4c   :  { %226 = vmatprep.mubr.bf16.mxu0 %v2294_v0  ;;  %v160_v30 = vpack.c.bf16 %v128_v29, %v125_v28  ;;  %v312_v53 = vmul.f32 -1e+30, %v302_v51 }
  0x4e   :  { %1959 = vmatprep.subr.bf16.mxu1 %v160_v30 }
  0x4f   :  { %1960 = vmatpush3.bf16.msra.mxu1 %v160_v30 }
  0x50   :  { %1961 = vmatprep.subr.bf16.mxu1 %v157_v33 }
  0x53   :  { %227 = vmatmul.mubr.bf16.gmra.mxu0 %v2399_v54  ;;  %1962 = vmatpush3.bf16.msra.mxu1 %v157_v33 }
  0x54   :  { %1977 = vmatprep.mubr.msk.bf16.mxu0 %vm2296_vm0, %v2295_v55  ;;  %1963 = vmatprep.subr.bf16.mxu1 %v154_v36 }
  0x57   :  { %1964 = vmatpush3.bf16.msra.mxu1 %v154_v36 }
  0x58   :  { %1965 = vmatprep.subr.bf16.mxu1 %v151_v39 }
  0x5b   :  { %1966 = vmatpush3.bf16.msra.mxu1 %v151_v39  ;;  %v179_v39 = vsub.s32 2, %v2405_v57 }
  0x5c   :  { %1967 = vmatprep.subr.bf16.mxu1 %v148_v42 }
  0x5d   :  { %v180_v41 = vrot.slane %v2411_v60, %v179_v39 }
  0x5f   :  { %1968 = vmatpush3.bf16.msra.mxu1 %v148_v42 }
  0x60   :  { %1969 = vmatprep.subr.bf16.mxu1 %v145_v45 }
  0x63   :  { %1970 = vmatpush3.bf16.msra.mxu1 %v145_v45 }
  0x64   :  { %1987 = vmatprep.subr.bf16.mxu1 %v2295_v55 }
  0x66   :  { %1972 = vmatmul.mubr.bf16.vlgmr.msra.gmra.mxu1 %v2399_v54 }
  0x67   :  { %1989 = vmatprep.mubr.msk.bf16.mxu1 %vm2296_vm0, %v2295_v55 }
 0x10b   :  { %v218_v59 = vpop.f32.mrf.mxu0 }
 0x10c   :  { %v219_v14 = vadd.f32 %v218_v59, %v172_v8  ;;  %v2452_v59 = vrot.slane %v312_v53, %v2417_v2 }
 0x10d   :  { %v220_v61 = vpop.f32.mrf.mxu0 }
 0x10e   :  { %v221_v3 = vadd.f32 %v220_v61, %v176_v62 }
 0x10f   :  { %v222_v63 = vpop.f32.mrf.mxu0 }
 0x110   :  { %v223_v11 = vadd.f32 %v222_v63, %v172_v8  ;;  %v313_v63 = vmul.f32 -1e+30, %v309_v56 }
 0x111   :  { %v224_v1 = vpop.f32.mrf.mxu0 }
 0x112   :  { %v225_v4 = vadd.f32 %v224_v1, %v176_v62  ;;  %v2426_v16 = vpack.c.bf16 %v223_v11, %v219_v14 }
 0x113   :  { %v228_v5 = vpop.f32.mrf.mxu0 }
 0x114   :  { %v2419_v6 = vpack.c.bf16 %v225_v4, %v221_v3  ;;  %v229_v18 = vadd.f32 %v228_v5, %v172_v8 }
 0x115   :  { %v230_v7 = vpop.f32.mrf.mxu0 }
 0x116   :  { %v323_v9 = vsel %vm318_vm1, %v2419_v6, 0  ;;  %v231_v12 = vadd.f32 %v230_v7, %v176_v62 }
 0x117   :  { %v232_v10 = vpop.f32.mrf.mxu0  ;;  %1976 = vmatpush3.bf16.xpose.msra.mxu0 %v323_v9 }
 0x118   :  { %1981 = vmatprep.subr.bf16.mxu0 %v2295_v55  ;;  %v233_v19 = vadd.f32 %v232_v10, %v172_v8  ;;  %v2457_v8 = vrot.slane %v313_v63, %v2417_v2 }
 0x119   :  { %v234_v13 = vpop.f32.mrf.mxu0 }
 0x11a   :  { %v235_v15 = vadd.f32 %v234_v13, %v176_v62  ;;  %v2437_v21 = vpack.c.bf16 %v233_v19, %v229_v18 }
 0x11c   :  { %v2428_v17 = vpack.c.bf16 %v235_v15, %v231_v12 }
 0x11e   :  { %1978 = vmatmul.mubr.msk.bf16.vlgmr.msra.gmra.mxu0 %vm318_vm1, %v2426_v16  ;;  %v370_v20 = vsel %vm318_vm1, %v2428_v17, 0 }
 0x11f   :  { %1982 = vmatpush3.bf16.xpose.msra.mxu0 %v370_v20  ;;  %1983 = vmatprep.mubr.msk.bf16.mxu0 %vm2296_vm0, %v2295_v55 }
 0x120   :  { %1993 = vmatprep.subr.bf16.mxu0 %v2295_v55 }
 0x126   :  { %1984 = vmatmul.mubr.msk.bf16.vlgmr.msra.gmra.mxu0 %vm318_vm1, %v2437_v21  ;;  %v1973_v40 = vpop.f32.mrf.mxu1 }
 0x127   :  { %1995 = vmatprep.mubr.msk.bf16.mxu0 %vm2296_vm0, %v2295_v55  ;;  %v280_v43 = vadd.f32 %v1973_v40, %v180_v41 }
 0x128   :  { %v271_v42 = vpop.f32.mrf.mxu1 }
 0x129   :  { %v272_v45 = vadd.f32 %v271_v42, %v180_v41 }
 0x12a   :  { %v1974_v44 = vpop.f32.mrf.mxu1 }
 0x12b   :  { %v283_v46 = vadd.f32 %v1974_v44, %v180_v41 }
 0x12c   :  { %v274_v47 = vpop.f32.mrf.mxu1 }
 0x12d   :  { %v2472_v48 = vpack.c.bf16 %v283_v46, %v280_v43  ;;  %v275_v49 = vadd.f32 %v274_v47, %v180_v41 }
 0x12f   :  { %v2474_v50 = vpack.c.bf16 %v275_v49, %v272_v45  ;;  %1994 = vmatpush3.bf16.msra.mxu0 %v2472_v48 }
 0x130   :  { %2005 = vmatprep.subr.bf16.mxu0 %v2295_v55 }
 0x131   :  { %1988 = vmatpush3.bf16.msra.mxu1 %v2474_v50 }
 0x132   :  { %1999 = vmatprep.subr.bf16.mxu1 %v2295_v55 }
 0x1de   :  { %v359_v54 = vpop.f32.mrf.mxu0 }
 0x1df   :  { %v413_v61 = vmul.f32 0.17677669, %v359_v54 }
 0x1e0   :  { %v1979_v62 = vpop.f32.mrf.mxu0 }
 0x1e1   :  { %v429_v1 = vadd.f32 %v2452_v59, %v413_v61 }
 0x1e2   :  { %v362_v3 = vpop.f32.mrf.mxu0 }
 0x1e3   :  { %v414_v4 = vmul.f32 0.17677669, %v362_v3  ;;  %v434_v5 = vsel %vm433_vm2, %v429_v1, -inf }
 0x1e4   :  { %435 = vmax.xlane.f32.xlu0 %v434_v5  ;;  %v1980_v7 = vpop.f32.mrf.mxu0 }
 0x1e5   :  { %v430_v9 = vadd.f32 %v2452_v59, %v414_v4 }
 0x1e6   :  { %v406_v10 = vpop.f32.mrf.mxu0 }
 0x1e7   :  { %v415_v11 = vmul.f32 0.17677669, %v406_v10  ;;  %v437_v12 = vsel %vm433_vm2, %v430_v9, -inf }
 0x1e8   :  { %438 = vmax.xlane.f32.xlu0 %v437_v12  ;;  %v1985_v13 = vpop.f32.mrf.mxu0 }
 0x1e9   :  { %v431_v14 = vadd.f32 %v2457_v8, %v415_v11 }
 0x1ea   :  { %v409_v15 = vpop.f32.mrf.mxu0 }
 0x1eb   :  { %v416_v18 = vmul.f32 0.17677669, %v409_v15  ;;  %v440_v19 = vsel %vm433_vm2, %v431_v14, -inf }
 0x1ec   :  { %441 = vmax.xlane.f32.xlu1 %v440_v19  ;;  %v1986_v20 = vpop.f32.mrf.mxu0 }
 0x1ed   :  { %v432_v22 = vadd.f32 %v2457_v8, %v416_v18 }
 0x1ef   :  { %v443_v23 = vsel %vm433_vm2, %v432_v22, -inf }
 0x1f0   :  { %444 = vmax.xlane.f32.xlu1 %v443_v23 }
 0x26d   :  { %v436_v24 = vpop.xlane.xlu0 %435 }
 0x26e   :  { %v446_v25 = vsub.f32 %v429_v1, %v436_v24 }
 0x270   :  { %v450_v26 = vmul.f32 1.442695, %v446_v25 }
 0x271   :  { %v439_v27 = vpop.xlane.xlu0 %438 }
 0x272   :  { %2137 = vpow2.f32 %v450_v26  ;;  %v447_v28 = vsub.f32 %v430_v9, %v439_v27 }
 0x274   :  { %v452_v29 = vmul.f32 1.442695, %v447_v28 }
 0x275   :  { %v442_v30 = vpop.xlane.xlu1 %441 }
 0x276   :  { %2139 = vpow2.f32 %v452_v29  ;;  %v448_v31 = vsub.f32 %v431_v14, %v442_v30 }
 0x278   :  { %v454_v32 = vmul.f32 1.442695, %v448_v31 }
 0x279   :  { %v445_v60 = vpop.xlane.xlu1 %444 }
 0x27a   :  { %2141 = vpow2.f32 %v454_v32  ;;  %v449_v51 = vsub.f32 %v432_v22, %v445_v60 }
 0x27c   :  { %v456_v52 = vmul.f32 1.442695, %v449_v51 }
 0x27e   :  { %2143 = vpow2.f32 %v456_v52 }
 0x27f   :  { %v2138_v33 = vpop.eup %2137 }
 0x280   :  { %v458_v34 = vsel %vm433_vm2, %v2138_v33, 0.0 }
 0x281   :  { %459 = vadd.xlane.f32.xlu0 %v458_v34 }
 0x283   :  { %v2140_v35 = vpop.eup %2139 }
 0x284   :  { %v461_v36 = vsel %vm433_vm2, %v2140_v35, 0.0 }
 0x285   :  { %462 = vadd.xlane.f32.xlu1 %v461_v36 }
 0x287   :  { %v2142_v37 = vpop.eup %2141 }
 0x288   :  { %v464_v38 = vsel %vm433_vm2, %v2142_v37, 0.0 }
 0x289   :  { %465 = vadd.xlane.f32.xlu0 %v464_v38 }
 0x28b   :  { %v2144_v53 = vpop.eup %2143 }
 0x28c   :  { %v467_v56 = vsel %vm433_vm2, %v2144_v53, 0.0 }
 0x296   :  { %627 = vrot.lane.b32.xlu1 %v2428_v17, %s2298_s1 }
 0x29f   :  { %574 = vrot.lane.b32.xlu0 %v2419_v6, %s2298_s1 }
 0x2ba   :  { %468 = vadd.xlane.f32.xlu1 %v467_v56 }
 0x2cb   :  { %571 = vrot.lane.b32.xlu1 %v2426_v16, %s2298_s1 }
 0x2cf   :  { %624 = vrot.lane.b32.xlu1 %v2437_v21, %s2298_s1 }
 0x30a   :  { %v460_v54 = vpop.xlane.xlu0 %459 }
 0x30b   :  { %2145 = vrcp.f32 %v460_v54 }
 0x30e   :  { %v463_v61 = vpop.xlane.xlu1 %462 }
 0x30f   :  { %2147 = vrcp.f32 %v463_v61 }
 0x312   :  { %v466_v62 = vpop.xlane.xlu0 %465  ;;  %v628_v10 = vpop.permute.xlu1 %627 }
 0x313   :  { %2149 = vrcp.f32 %v466_v62  ;;  %v633_v20 = vsel %vm318_vm1, %v628_v10, 0 }
 0x316   :  { %v575_v5 = vpop.permute.xlu0 %574 }
 0x317   :  { %v580_v9 = vsel %vm318_vm1, %v575_v5, 0 }
 0x318   :  { %v2146_v63 = vpop.eup %2145 }
 0x319   :  { %v474_v3 = vmul.f32 %v2146_v63, %v2138_v33 }
 0x31c   :  { %v2148_v1 = vpop.eup %2147 }
 0x31d   :  { %v475_v4 = vmul.f32 %v2148_v1, %v2140_v35 }
 0x31f   :  { %v478_v7 = vpack.c.bf16 %v475_v4, %v474_v3 }
 0x320   :  { %v2150_v13 = vpop.eup %2149 }
 0x321   :  { %1990 = vmatmul.mubr.msk.bf16.vlgmr.msra.gmra.mxu1 %vm433_vm2, %v478_v7  ;;  %v476_v15 = vmul.f32 %v2150_v13, %v2142_v37 }
 0x322   :  { %2000 = vmatpush3.bf16.xpose.msra.mxu1 %v580_v9  ;;  %2001 = vmatprep.mubr.msk.bf16.mxu1 %vm2296_vm0, %v2295_v55 }
 0x323   :  { %2011 = vmatprep.subr.bf16.mxu1 %v2295_v55 }
 0x343   :  { %v469_v11 = vpop.xlane.xlu1 %468 }
 0x344   :  { %2151 = vrcp.f32 %v469_v11 }
 0x347   :  { %v572_v12 = vpop.permute.xlu1 %571 }
 0x348   :  { %2002 = vmatmul.mubr.msk.bf16.vlgmr.msra.gmra.mxu1 %vm318_vm1, %v572_v12 }
 0x349   :  { %2013 = vmatprep.mubr.msk.bf16.mxu1 %vm2296_vm0, %v2295_v55 }
 0x34b   :  { %v625_v22 = vpop.permute.xlu1 %624 }
 0x351   :  { %v2152_v14 = vpop.eup %2151 }
 0x352   :  { %v477_v18 = vmul.f32 %v2152_v14, %v2144_v53 }
 0x354   :  { %v479_v19 = vpack.c.bf16 %v477_v18, %v476_v15 }
 0x356   :  { %1996 = vmatmul.mubr.msk.bf16.vlgmr.msra.gmra.mxu0 %vm433_vm2, %v479_v19 }
 0x357   :  { %2006 = vmatpush3.bf16.xpose.msra.mxu0 %v633_v20  ;;  %2007 = vmatprep.mubr.msk.bf16.mxu0 %vm2296_vm0, %v2295_v55 }
 0x358   :  { %2017 = vmatprep.subr.bf16.mxu0 %v2295_v55 }
 0x35e   :  { %2008 = vmatmul.mubr.msk.bf16.vlgmr.msra.gmra.mxu0 %vm318_vm1, %v625_v22 }
 0x35f   :  { %2019 = vmatprep.mubr.msk.bf16.mxu0 %vm2296_vm0, %v2295_v55 }
 0x3e1   :  { %v2503_v23 = vpop.f32.mrf.mxu1 }
 0x3e3   :  { %v1991_v24 = vpop.f32.mrf.mxu1 }
 0x3e5   :  { %v2505_v25 = vpop.f32.mrf.mxu1 }
 0x3e7   :  { %v1992_v26 = vpop.f32.mrf.mxu1 }
 0x408   :  { %v616_v27 = vpop.f32.mrf.mxu1 }
 0x409   :  { %v676_v28 = vmul.f32 0.17677669, %v616_v27 }
 0x40a   :  { %v2003_v29 = vpop.f32.mrf.mxu1 }
 0x40b   :  { %v680_v30 = vadd.f32 %v676_v28, %v2452_v59 }
 0x40c   :  { %v619_v31 = vpop.f32.mrf.mxu1 }
 0x40d   :  { %v677_v32 = vmul.f32 0.17677669, %v619_v31  ;;  %v684_v33 = vsel %vm433_vm2, %v680_v30, -inf }
 0x40e   :  { %685 = vmax.xlane.f32.xlu0 %v684_v33  ;;  %v2004_v34 = vpop.f32.mrf.mxu1 }
 0x40f   :  { %v681_v35 = vadd.f32 %v677_v32, %v2452_v59 }
 0x411   :  { %v687_v36 = vsel %vm433_vm2, %v681_v35, -inf }
 0x412   :  { %688 = vmax.xlane.f32.xlu1 %v687_v36 }
 0x416   :  { %v2511_v37 = vpop.f32.mrf.mxu0 }
 0x418   :  { %v1997_v38 = vpop.f32.mrf.mxu0 }
 0x41a   :  { %v2513_v39 = vpop.f32.mrf.mxu0 }
 0x41c   :  { %v1998_v40 = vpop.f32.mrf.mxu0 }
 0x41e   :  { %v669_v41 = vpop.f32.mrf.mxu0 }
 0x41f   :  { %v678_v42 = vmul.f32 0.17677669, %v669_v41 }
 0x420   :  { %v2009_v43 = vpop.f32.mrf.mxu0 }
 0x421   :  { %v682_v44 = vadd.f32 %v678_v42, %v2457_v8 }
 0x422   :  { %v672_v45 = vpop.f32.mrf.mxu0 }
 0x423   :  { %v679_v46 = vmul.f32 0.17677669, %v672_v45  ;;  %v690_v47 = vsel %vm433_vm2, %v682_v44, -inf }
 0x424   :  { %691 = vmax.xlane.f32.xlu0 %v690_v47  ;;  %v2010_v49 = vpop.f32.mrf.mxu0 }
 0x425   :  { %v683_v60 = vadd.f32 %v679_v46, %v2457_v8 }
 0x427   :  { %v693_v51 = vsel %vm433_vm2, %v683_v60, -inf }
 0x428   :  { %694 = vmax.xlane.f32.xlu0 %v693_v51 }
 0x497   :  { %v686_v52 = vpop.xlane.xlu0 %685 }
 0x498   :  { %v696_v53 = vsub.f32 %v680_v30, %v686_v52 }
 0x49a   :  { %v700_v56 = vmul.f32 1.442695, %v696_v53 }
 0x49b   :  { %v689_v54 = vpop.xlane.xlu1 %688 }
 0x49c   :  { %2153 = vpow2.f32 %v700_v56  ;;  %v697_v61 = vsub.f32 %v681_v35, %v689_v54 }
 0x49e   :  { %v702_v62 = vmul.f32 1.442695, %v697_v61 }
 0x4a0   :  { %2155 = vpow2.f32 %v702_v62 }
 0x4a9   :  { %v2154_v63 = vpop.eup %2153 }
 0x4aa   :  { %v708_v1 = vsel %vm433_vm2, %v2154_v63, 0.0 }
 0x4ab   :  { %709 = vadd.xlane.f32.xlu0 %v708_v1 }
 0x4ad   :  { %v2156_v3 = vpop.eup %2155  ;;  %v692_v4 = vpop.xlane.xlu0 %691 }
 0x4ae   :  { %v698_v5 = vsub.f32 %v682_v44, %v692_v4  ;;  %v711_v7 = vsel %vm433_vm2, %v2156_v3, 0.0 }
 0x4af   :  { %712 = vadd.xlane.f32.xlu1 %v711_v7 }
 0x4b0   :  { %v704_v9 = vmul.f32 1.442695, %v698_v5 }
 0x4b1   :  { %v695_v12 = vpop.xlane.xlu0 %694 }
 0x4b2   :  { %2157 = vpow2.f32 %v704_v9  ;;  %v699_v13 = vsub.f32 %v683_v60, %v695_v12 }
 0x4b4   :  { %v706_v14 = vmul.f32 1.442695, %v699_v13 }
 0x4b6   :  { %2159 = vpow2.f32 %v706_v14 }
 0x4bf   :  { %v2158_v10 = vpop.eup %2157 }
 0x4c0   :  { %779 = vrot.lane.b32.xlu1 %v2472_v48, %s2298_s1  ;;  %v714_v11 = vsel %vm433_vm2, %v2158_v10, 0.0 }
 0x4c1   :  { %715 = vadd.xlane.f32.xlu0 %v714_v11 }
 0x4c3   :  { %v2160_v15 = vpop.eup %2159 }
 0x4c4   :  { %828 = vrot.lane.b32.xlu1 %v2419_v6, %s2299_s26  ;;  %v717_v18 = vsel %vm433_vm2, %v2160_v15, 0.0 }
 0x4d7   :  { %731 = vrot.lane.b32.xlu0 %v2474_v50, %s2298_s1 }
 0x4db   :  { %826 = vrot.lane.b32.xlu0 %v2426_v16, %s2299_s26 }
 0x4e8   :  { %718 = vadd.xlane.f32.xlu1 %v717_v18 }
 0x4f9   :  { %879 = vrot.lane.b32.xlu1 %v2428_v17, %s2299_s26 }
 0x4fd   :  { %877 = vrot.lane.b32.xlu1 %v2437_v21, %s2299_s26 }
 0x534   :  { %v710_v20 = vpop.xlane.xlu0 %709 }
 0x538   :  { %v713_v19 = vpop.xlane.xlu1 %712 }
 0x539   :  { %2161 = vrcp.f32 %v713_v19 }
 0x53a   :  { %2163 = vrcp.f32 %v710_v20 }
 0x53c   :  { %v780_v22 = vpop.permute.xlu1 %779 }
 0x53d   :  { %2018 = vmatpush3.bf16.msra.mxu0 %v780_v22 }
 0x53e   :  { %2029 = vmatprep.subr.bf16.mxu0 %v2295_v55 }
 0x540   :  { %v829_v31 = vpop.permute.xlu1 %828 }
 0x541   :  { %v834_v33 = vsel %vm318_vm1, %v829_v31, 0 }
 0x546   :  { %v2162_v24 = vpop.eup %2161 }
 0x547   :  { %v2164_v27 = vpop.eup %2163  ;;  %v725_v28 = vmul.f32 %v2162_v24, %v2156_v3 }
 0x548   :  { %v724_v30 = vmul.f32 %v2164_v27, %v2154_v63 }
 0x54a   :  { %v716_v26 = vpop.xlane.xlu0 %715  ;;  %v728_v32 = vpack.c.bf16 %v725_v28, %v724_v30 }
 0x54b   :  { %2165 = vrcp.f32 %v716_v26 }
 0x54e   :  { %v732_v29 = vpop.permute.xlu0 %731 }
 0x54f   :  { %2012 = vmatpush3.bf16.msra.mxu1 %v732_v29 }
 0x550   :  { %2023 = vmatprep.subr.bf16.mxu1 %v2295_v55 }
 0x552   :  { %2014 = vmatmul.mubr.msk.bf16.vlgmr.msra.gmra.mxu1 %vm433_vm2, %v728_v32  ;;  %v827_v34 = vpop.permute.xlu0 %826 }
 0x553   :  { %2024 = vmatpush3.bf16.xpose.msra.mxu1 %v834_v33  ;;  %2025 = vmatprep.mubr.msk.bf16.mxu1 %vm2296_vm0, %v2295_v55 }
 0x554   :  { %2035 = vmatprep.subr.bf16.mxu1 %v2295_v55 }
 0x558   :  { %v2166_v36 = vpop.eup %2165 }
 0x559   :  { %v726_v40 = vmul.f32 %v2166_v36, %v2158_v10 }
 0x55a   :  { %2026 = vmatmul.mubr.msk.bf16.vlgmr.msra.gmra.mxu1 %vm318_vm1, %v827_v34 }
 0x55b   :  { %2037 = vmatprep.mubr.msk.bf16.mxu1 %vm2296_vm0, %v2295_v55 }
 0x571   :  { %v719_v35 = vpop.xlane.xlu1 %718 }
 0x572   :  { %2167 = vrcp.f32 %v719_v35 }
 0x575   :  { %v880_v42 = vpop.permute.xlu1 %879 }
 0x576   :  { %v885_v44 = vsel %vm318_vm1, %v880_v42, 0 }
 0x579   :  { %v878_v45 = vpop.permute.xlu1 %877 }
 0x57f   :  { %v2168_v38 = vpop.eup %2167 }
 0x580   :  { %v727_v41 = vmul.f32 %v2168_v38, %v2160_v15 }
 0x582   :  { %v729_v43 = vpack.c.bf16 %v727_v41, %v726_v40 }
 0x584   :  { %2020 = vmatmul.mubr.msk.bf16.vlgmr.msra.gmra.mxu0 %vm433_vm2, %v729_v43 }
 0x585   :  { %2030 = vmatpush3.bf16.xpose.msra.mxu0 %v885_v44  ;;  %2031 = vmatprep.mubr.msk.bf16.mxu0 %vm2296_vm0, %v2295_v55 }
 0x586   :  { %2041 = vmatprep.subr.bf16.mxu0 %v2295_v55 }
 0x58c   :  { %2032 = vmatmul.mubr.msk.bf16.vlgmr.msra.gmra.mxu0 %vm318_vm1, %v878_v45 }
 0x58d   :  { %2043 = vmatprep.mubr.msk.bf16.mxu0 %vm2296_vm0, %v2295_v55 }
 0x612   :  { %v2553_v46 = vpop.f32.mrf.mxu1 }
 0x614   :  { %v2015_v47 = vpop.f32.mrf.mxu1 }
 0x616   :  { %v2555_v49 = vpop.f32.mrf.mxu1 }
 0x617   :  { %v2107_v60 = vpack.i.bf16 %v2555_v49, %v2553_v46 }
 0x618   :  { %v2016_v51 = vpop.f32.mrf.mxu1 }
 0x61a   :  { %v870_v52 = vpop.f32.mrf.mxu1 }
 0x61b   :  { %v928_v53 = vmul.f32 0.17677669, %v870_v52 }
 0x61c   :  { %v2027_v56 = vpop.f32.mrf.mxu1 }
 0x61d   :  { %v932_v54 = vadd.f32 %v928_v53, %v2452_v59 }
 0x61e   :  { %v873_v61 = vpop.f32.mrf.mxu1 }
 0x61f   :  { %v929_v62 = vmul.f32 0.17677669, %v873_v61  ;;  %v936_v63 = vsel %vm433_vm2, %v932_v54, -inf }
 0x620   :  { %937 = vmax.xlane.f32.xlu0 %v936_v63  ;;  %v2028_v1 = vpop.f32.mrf.mxu1 }
 0x621   :  { %v933_v3 = vadd.f32 %v929_v62, %v2452_v59 }
 0x623   :  { %v939_v4 = vsel %vm433_vm2, %v933_v3, -inf }
 0x624   :  { %940 = vmax.xlane.f32.xlu1 %v939_v4 }
 0x644   :  { %v2563_v5 = vpop.f32.mrf.mxu0 }
 0x646   :  { %v2021_v7 = vpop.f32.mrf.mxu0 }
 0x648   :  { %v2565_v9 = vpop.f32.mrf.mxu0 }
 0x649   :  { %v2112_v10 = vpack.i.bf16 %v2565_v9, %v2563_v5 }
 0x64a   :  { %v2022_v11 = vpop.f32.mrf.mxu0 }
 0x64c   :  { %v921_v12 = vpop.f32.mrf.mxu0 }
 0x64d   :  { %v930_v13 = vmul.f32 0.17677669, %v921_v12 }
 0x64e   :  { %v2033_v14 = vpop.f32.mrf.mxu0 }
 0x64f   :  { %v934_v15 = vadd.f32 %v930_v13, %v2457_v8 }
 0x650   :  { %v924_v18 = vpop.f32.mrf.mxu0 }
 0x651   :  { %v931_v19 = vmul.f32 0.17677669, %v924_v18  ;;  %v942_v20 = vsel %vm433_vm2, %v934_v15, -inf }
 0x652   :  { %943 = vmax.xlane.f32.xlu0 %v942_v20  ;;  %v2034_v22 = vpop.f32.mrf.mxu0 }
 0x653   :  { %v935_v24 = vadd.f32 %v931_v19, %v2457_v8 }
 0x655   :  { %v945_v26 = vsel %vm433_vm2, %v935_v24, -inf }
 0x656   :  { %946 = vmax.xlane.f32.xlu0 %v945_v26 }
 0x6a9   :  { %v938_v27 = vpop.xlane.xlu0 %937 }
 0x6aa   :  { %v948_v28 = vsub.f32 %v932_v54, %v938_v27 }
 0x6ac   :  { %v952_v29 = vmul.f32 1.442695, %v948_v28 }
 0x6ad   :  { %v941_v30 = vpop.xlane.xlu1 %940 }
 0x6ae   :  { %2169 = vpow2.f32 %v952_v29  ;;  %v949_v31 = vsub.f32 %v933_v3, %v941_v30 }
 0x6b0   :  { %v954_v32 = vmul.f32 1.442695, %v949_v31 }
 0x6b2   :  { %2171 = vpow2.f32 %v954_v32 }
 0x6bb   :  { %v2170_v33 = vpop.eup %2169 }
 0x6bc   :  { %v960_v34 = vsel %vm433_vm2, %v2170_v33, 0.0 }
 0x6bd   :  { %961 = vadd.xlane.f32.xlu0 %v960_v34 }
 0x6bf   :  { %v2172_v35 = vpop.eup %2171 }
 0x6c0   :  { %v963_v36 = vsel %vm433_vm2, %v2172_v35, 0.0 }
 0x6c1   :  { %964 = vadd.xlane.f32.xlu1 %v963_v36 }
 0x6d2   :  { %1029 = vrot.lane.b32.xlu1 %v2472_v48, %s2299_s26 }
 0x6d6   :  { %1078 = vrot.lane.b32.xlu1 %v2419_v6, %s2300_s27 }
 0x6db   :  { %v944_v38 = vpop.xlane.xlu0 %943 }
 0x6dc   :  { %v950_v40 = vsub.f32 %v934_v15, %v944_v38 }
 0x6de   :  { %v956_v41 = vmul.f32 1.442695, %v950_v40 }
 0x6df   :  { %v947_v42 = vpop.xlane.xlu0 %946 }
 0x6e0   :  { %2173 = vpow2.f32 %v956_v41  ;;  %v951_v43 = vsub.f32 %v935_v24, %v947_v42 }
 0x6e2   :  { %v958_v44 = vmul.f32 1.442695, %v951_v43 }
 0x6e4   :  { %2175 = vpow2.f32 %v958_v44 }
 0x6ed   :  { %v2174_v45 = vpop.eup %2173 }
 0x6ee   :  { %v966_v47 = vsel %vm433_vm2, %v2174_v45, 0.0 }
 0x6ef   :  { %967 = vadd.xlane.f32.xlu0 %v966_v47 }
 0x6f1   :  { %v2176_v51 = vpop.eup %2175 }
 0x6f2   :  { %v969_v52 = vsel %vm433_vm2, %v2176_v51, 0.0 }
 0x6fa   :  { %970 = vadd.xlane.f32.xlu1 %v969_v52 }
 0x705   :  { %982 = vrot.lane.b32.xlu0 %v2474_v50, %s2299_s26 }
 0x709   :  { %1076 = vrot.lane.b32.xlu0 %v2426_v16, %s2300_s27 }
 0x70b   :  { %1129 = vrot.lane.b32.xlu1 %v2428_v17, %s2300_s27 }
 0x70f   :  { %1127 = vrot.lane.b32.xlu1 %v2437_v21, %s2300_s27 }
 0x746   :  { %v962_v56 = vpop.xlane.xlu0 %961 }
 0x74a   :  { %v965_v6 = vpop.xlane.xlu1 %964 }
 0x74b   :  { %2177 = vrcp.f32 %v965_v6 }
 0x74c   :  { %2179 = vrcp.f32 %v962_v56 }
 0x74e   :  { %v1030_v53 = vpop.permute.xlu1 %1029 }
 0x74f   :  { %2042 = vmatpush3.bf16.msra.mxu0 %v1030_v53 }
 0x750   :  { %2053 = vmatprep.subr.bf16.mxu0 %v2295_v55 }
 0x752   :  { %v1079_v3 = vpop.permute.xlu1 %1078 }
 0x753   :  { %v1084_v21 = vsel %vm318_vm1, %v1079_v3, 0 }
 0x758   :  { %v2178_v54 = vpop.eup %2177 }
 0x759   :  { %v2180_v62 = vpop.eup %2179  ;;  %v977_v63 = vmul.f32 %v2178_v54, %v2172_v35 }
 0x75a   :  { %v976_v16 = vmul.f32 %v2180_v62, %v2170_v33 }
 0x75c   :  { %v980_v17 = vpack.c.bf16 %v977_v63, %v976_v16 }
 0x778   :  { %v968_v61 = vpop.xlane.xlu0 %967 }
 0x779   :  { %2181 = vrcp.f32 %v968_v61 }
 0x77c   :  { %v983_v1 = vpop.permute.xlu0 %982 }
 0x77d   :  { %2036 = vmatpush3.bf16.msra.mxu1 %v983_v1 }
 0x77e   :  { %2047 = vmatprep.subr.bf16.mxu1 %v2295_v55 }
 0x780   :  { %2038 = vmatmul.mubr.msk.bf16.vlgmr.msra.gmra.mxu1 %vm433_vm2, %v980_v17  ;;  %v1077_v7 = vpop.permute.xlu0 %1076 }
 0x781   :  { %2048 = vmatpush3.bf16.xpose.msra.mxu1 %v1084_v21  ;;  %2049 = vmatprep.mubr.msk.bf16.mxu1 %vm2296_vm0, %v2295_v55 }
 0x782   :  { %2059 = vmatprep.subr.bf16.mxu1 %v2295_v55 }
 0x783   :  { %v971_v4 = vpop.xlane.xlu1 %970 }
 0x784   :  { %2183 = vrcp.f32 %v971_v4 }
 0x786   :  { %v2182_v11 = vpop.eup %2181 }
 0x787   :  { %v978_v13 = vmul.f32 %v2182_v11, %v2174_v45  ;;  %v1130_v15 = vpop.permute.xlu1 %1129 }
 0x788   :  { %2050 = vmatmul.mubr.msk.bf16.vlgmr.msra.gmra.mxu1 %vm318_vm1, %v1077_v7  ;;  %v1135_v19 = vsel %vm318_vm1, %v1130_v15, 0 }
 0x789   :  { %2061 = vmatprep.mubr.msk.bf16.mxu1 %vm2296_vm0, %v2295_v55 }
 0x78b   :  { %v1128_v20 = vpop.permute.xlu1 %1127 }
 0x791   :  { %v2184_v12 = vpop.eup %2183 }
 0x792   :  { %v979_v14 = vmul.f32 %v2184_v12, %v2176_v51 }
 0x794   :  { %v981_v18 = vpack.c.bf16 %v979_v14, %v978_v13 }
 0x796   :  { %2044 = vmatmul.mubr.msk.bf16.vlgmr.msra.gmra.mxu0 %vm433_vm2, %v981_v18 }
 0x797   :  { %2054 = vmatpush3.bf16.xpose.msra.mxu0 %v1135_v19  ;;  %2055 = vmatprep.mubr.msk.bf16.mxu0 %vm2296_vm0, %v2295_v55 }
 0x798   :  { %2065 = vmatprep.subr.bf16.mxu0 %v2295_v55 }
 0x79e   :  { %2056 = vmatmul.mubr.msk.bf16.vlgmr.msra.gmra.mxu0 %vm318_vm1, %v1128_v20 }
 0x79f   :  { %2067 = vmatprep.mubr.msk.bf16.mxu0 %vm2296_vm0, %v2295_v55 }
 0x840   :  { %v2607_v22 = vpop.f32.mrf.mxu1 }
 0x842   :  { %v2039_v24 = vpop.f32.mrf.mxu1 }
 0x844   :  { %v2609_v26 = vpop.f32.mrf.mxu1 }
 0x845   :  { %v2117_v27 = vpack.i.bf16 %v2609_v26, %v2607_v22 }
 0x846   :  { %v2040_v28 = vpop.f32.mrf.mxu1 }
 0x848   :  { %v1120_v29 = vpop.f32.mrf.mxu1 }
 0x849   :  { %v1178_v30 = vmul.f32 0.17677669, %v1120_v29 }
 0x84a   :  { %v2051_v31 = vpop.f32.mrf.mxu1 }
 0x84b   :  { %v1182_v32 = vadd.f32 %v1178_v30, %v2452_v59 }
 0x84c   :  { %v1123_v33 = vpop.f32.mrf.mxu1 }
 0x84d   :  { %v1179_v34 = vmul.f32 0.17677669, %v1123_v33  ;;  %v1186_v35 = vsel %vm433_vm2, %v1182_v32, -inf }
 0x84e   :  { %1187 = vmax.xlane.f32.xlu0 %v1186_v35  ;;  %v2052_v55 = vpop.f32.mrf.mxu1  ;;  %v1403_v35 = vld [vmem:[%s2797_s4 + $0x78] sm:$0xff] }
 0x84f   :  { %v1183_v36 = vadd.f32 %v1179_v34, %v2452_v59  ;;  %v1402_v34 = vld [vmem:[%s2797_s4 + $0x70] sm:$0xff]  ;;  %v1400_v55 = vld [vmem:[%s2797_s4 + $0x60] sm:$0xff] }
 0x851   :  { %v1189_v38 = vsel %vm433_vm2, %v1183_v36, -inf }
 0x852   :  { %1190 = vmax.xlane.f32.xlu1 %v1189_v38  ;;  %v1401_v38 = vld [vmem:[%s2797_s4 + $0x68] sm:$0xff] }
 0x856   :  { %v1069_v40 = vpop.f32.mrf.mxu0 }
 0x858   :  { %v2045_v41 = vpop.f32.mrf.mxu0 }
 0x859   :  { %v1398_v41 = vld [vmem:[%s2797_s4 + $0x50] sm:$0xff] }
 0x85a   :  { %v1072_v42 = vpop.f32.mrf.mxu0 }
 0x85b   :  { %v2122_v43 = vpack.i.bf16 %v1072_v42, %v1069_v40  ;;  %v1412_v40 = vpack.c.bf16 %v1401_v38, %v1400_v55  ;;  %v1399_v42 = vld [vmem:[%s2797_s4 + $0x58] sm:$0xff] }
 0x85c   :  { %v2046_v44 = vpop.f32.mrf.mxu0 }
 0x85d   :  { %v1396_v44 = vld [vmem:[%s2797_s4 + $0x40] sm:$0xff] }
 0x85e   :  { %v1171_v45 = vpop.f32.mrf.mxu0 }
 0x85f   :  { %v1180_v47 = vmul.f32 0.17677669, %v1171_v45  ;;  %v1397_v45 = vld [vmem:[%s2797_s4 + $0x48] sm:$0xff] }
 0x860   :  { %v2057_v51 = vpop.f32.mrf.mxu0 }
 0x861   :  { %v1184_v52 = vadd.f32 %v1180_v47, %v2457_v8  ;;  %v1410_v47 = vpack.c.bf16 %v1397_v45, %v1396_v44  ;;  %v1394_v51 = vld [vmem:[%s2797_s4 + $0x30] sm:$0xff] }
 0x862   :  { %v1174_v6 = vpop.f32.mrf.mxu0 }
 0x863   :  { %v1181_v53 = vmul.f32 0.17677669, %v1174_v6  ;;  %v1192_v56 = vsel %vm433_vm2, %v1184_v52, -inf }
 0x864   :  { %1193 = vmax.xlane.f32.xlu0 %v1192_v56  ;;  %v2058_v54 = vpop.f32.mrf.mxu0  ;;  %v1393_v56 = vld [vmem:[%s2797_s4 + $0x28] sm:$0xff] }
 0x865   :  { %v1185_v59 = vadd.f32 %v1181_v53, %v2457_v8  ;;  %v1392_v53 = vld [vmem:[%s2797_s4 + $0x20] sm:$0xff]  ;;  %v1390_v54 = vld [vmem:[%s2797_s4 + $0x10] sm:$0xff] }
 0x867   :  { %v1195_v61 = vsel %vm433_vm2, %v1185_v59, -inf }
 0x868   :  { %1196 = vmax.xlane.f32.xlu0 %v1195_v61  ;;  %v1408_v61 = vpack.c.bf16 %v1393_v56, %v1392_v53 }
 0x8d7   :  { %v1188_v62 = vpop.xlane.xlu0 %1187 }
 0x8d8   :  { %v1198_v63 = vsub.f32 %v1182_v32, %v1188_v62  ;;  %v1391_v62 = vld [vmem:[%s2797_s4 + $0x18] sm:$0xff] }
 0x8da   :  { %v1202_v1 = vmul.f32 1.442695, %v1198_v63  ;;  %v1407_v63 = vpack.c.bf16 %v1391_v62, %v1390_v54  ;;  %v2218_v54 = vld [vmem:[%s2793_s0 + $0x8] sm:$0xff] }
 0x8db   :  { %v1191_v16 = vpop.xlane.xlu1 %1190 }
 0x8dc   :  { %2185 = vpow2.f32 %v1202_v1  ;;  %v1199_v3 = vsub.f32 %v1183_v36, %v1191_v16  ;;  %v1413_v36 = vpack.c.bf16 %v1403_v35, %v1402_v34 }
 0x8de   :  { %v1204_v17 = vmul.f32 1.442695, %v1199_v3 }
 0x8e0   :  { %2187 = vpow2.f32 %v1204_v17 }
 0x8e9   :  { %v2186_v21 = vpop.eup %2185 }
 0x8ea   :  { %v1210_v4 = vsel %vm433_vm2, %v2186_v21, 0.0 }
 0x8eb   :  { %1211 = vadd.xlane.f32.xlu0 %v1210_v4  ;;  %v1389_v4 = vld [vmem:[%s2797_s4 + $0x8] sm:$0xff] }
 0x8ed   :  { %v2188_v7 = vpop.eup %2187  ;;  %v1194_v11 = vpop.xlane.xlu0 %1193 }
 0x8ee   :  { %v1200_v12 = vsub.f32 %v1184_v52, %v1194_v11  ;;  %v1213_v8 = vsel %vm433_vm2, %v2188_v7, 0.0  ;;  %v1395_v52 = vld [vmem:[%s2797_s4 + $0x38] sm:$0xff] }
 0x8ef   :  { %1214 = vadd.xlane.f32.xlu1 %v1213_v8  ;;  %v1409_v6 = vpack.c.bf16 %v1395_v52, %v1394_v51  ;;  %v2217_v51 = vld [vmem:[%s2793_s0] sm:$0xff] }
 0x8f0   :  { %v1206_v13 = vmul.f32 1.442695, %v1200_v12 }
 0x8f1   :  { %v1197_v14 = vpop.xlane.xlu0 %1196 }
 0x8f2   :  { %2189 = vpow2.f32 %v1206_v13  ;;  %v1201_v15 = vsub.f32 %v1185_v59, %v1197_v14 }
 0x8f4   :  { %v1208_v18 = vmul.f32 1.442695, %v1201_v15 }
 0x8f6   :  { %2191 = vpow2.f32 %v1208_v18 }
 0x8ff   :  { %v2190_v19 = vpop.eup %2189 }
 0x900   :  { %v1216_v20 = vsel %vm433_vm2, %v2190_v19, 0.0 }
 0x901   :  { %1217 = vadd.xlane.f32.xlu0 %v1216_v20 }
 0x903   :  { %v2192_v22 = vpop.eup %2191 }
 0x904   :  { %v1219_v24 = vsel %vm433_vm2, %v2192_v22, 0.0 }
 0x905   :  { %1220 = vadd.xlane.f32.xlu1 %v1219_v24 }
 0x916   :  { %1279 = vrot.lane.b32.xlu1 %v2472_v48, %s2300_s27 }
 0x917   :  { %1232 = vrot.lane.b32.xlu0 %v2474_v50, %s2300_s27 }
 0x91a   :  { %2108 = vrot.lane.b32.xlu1 %v2107_v60, %s2300_s27 }
 0x91b   :  { %2118 = vrot.lane.b32.xlu0 %v2117_v27, %s2299_s26 }
 0x91e   :  { %2113 = vrot.lane.b32.xlu1 %v2112_v10, %s2300_s27 }
 0x922   :  { %2123 = vrot.lane.b32.xlu1 %v2122_v43, %s2299_s26  ;;  %v1411_v43 = vpack.c.bf16 %v1399_v42, %v1398_v41 }
 0x974   :  { %v1212_v28 = vpop.xlane.xlu0 %1211 }
 0x978   :  { %v1215_v26 = vpop.xlane.xlu1 %1214 }
 0x979   :  { %2193 = vrcp.f32 %v1215_v26 }
 0x97a   :  { %2195 = vrcp.f32 %v1212_v28 }
 0x986   :  { %v2194_v48 = vpop.eup %2193 }
 0x987   :  { %v2196_v29 = vpop.eup %2195  ;;  %v1227_v30 = vmul.f32 %v2194_v48, %v2188_v7 }
 0x988   :  { %v1226_v60 = vmul.f32 %v2196_v29, %v2186_v21  ;;  %v1388_v21 = vld [vmem:[%s2797_s4] sm:$0xff] }
 0x989   :  { %v1406_v7 = vpack.c.bf16 %v1389_v4, %v1388_v21  ;;  %v1571_v4 = vld [vmem:[#allocation4 + $0xf0] sm:$0xff] }
 0x98a   :  { %v1218_v50 = vpop.xlane.xlu0 %1217  ;;  %v1230_v27 = vpack.c.bf16 %v1227_v30, %v1226_v60 }
 0x98b   :  { %2197 = vrcp.f32 %v1218_v50 }
 0x98e   :  { %v1221_v46 = vpop.xlane.xlu1 %1220  ;;  %v1233_v49 = vpop.permute.xlu0 %1232 }
 0x98f   :  { %2199 = vrcp.f32 %v1221_v46  ;;  %2060 = vmatpush3.bf16.msra.mxu1 %v1233_v49 }
 0x990   :  { %2071 = vmatprep.subr.bf16.mxu1 %v1413_v36 }
 0x992   :  { %v1280_v31 = vpop.permute.xlu1 %1279  ;;  %2062 = vmatmul.mubr.msk.bf16.vlgmr.msra.gmra.mxu1 %vm433_vm2, %v1230_v27  ;;  %v2119_v20 = vpop.permute.xlu0 %2118 }
 0x993   :  { %2066 = vmatpush3.bf16.msra.mxu0 %v1280_v31  ;;  %2072 = vmatpush3.bf16.msra.mxu1 %v1413_v36  ;;  %v2121_v26 = vunpack.i.h.bf16 %v2119_v20  ;;  %v2120_v28 = vunpack.i.l.bf16 %v2119_v20 }
 0x994   :  { %2073 = vmatprep.subr.bf16.mxu1 %v1412_v40 }
 0x996   :  { %v2109_v15 = vpop.permute.xlu1 %2108 }
 0x997   :  { %2074 = vmatpush3.bf16.msra.mxu1 %v1412_v40  ;;  %v2111_v18 = vunpack.i.h.bf16 %v2109_v15 }
 0x998   :  { %v2198_v5 = vpop.eup %2197  ;;  %2075 = vmatprep.subr.bf16.mxu1 %v1411_v43 }
 0x999   :  { %v1228_v10 = vmul.f32 %v2198_v5, %v2190_v19  ;;  %v2110_v19 = vunpack.i.l.bf16 %v2109_v15 }
 0x99a   :  { %v2114_v27 = vpop.permute.xlu1 %2113 }
 0x99b   :  { %2076 = vmatpush3.bf16.msra.mxu1 %v1411_v43  ;;  %v1374_v24 = vsel %vm318_vm1, %v2503_v23, %v2110_v19  ;;  %v2116_v23 = vunpack.i.h.bf16 %v2114_v27  ;;  %v2115_v5 = vunpack.i.l.bf16 %v2114_v27  ;;  %v1567_v27 = vld [vmem:[#allocation4 + $0xd0] sm:$0xff] }
 0x99c   :  { %v2200_v9 = vpop.eup %2199  ;;  %2077 = vmatprep.subr.bf16.mxu1 %v1410_v47  ;;  %v1379_v30 = vsel %vm1378_vm3, %v1374_v24, %v2120_v28 }
 0x99d   :  { %v1229_v32 = vmul.f32 %v2200_v9, %v2192_v22  ;;  %v1375_v22 = vsel %vm318_vm1, %v2505_v25, %v2111_v18  ;;  %v1376_v34 = vsel %vm318_vm1, %v2511_v37, %v2115_v5 }
 0x99e   :  { %v1380_v46 = vsel %vm1378_vm3, %v1375_v22, %v2121_v26  ;;  %v2124_v31 = vpop.permute.xlu1 %2123 }
 0x99f   :  { %v1231_v33 = vpack.c.bf16 %v1229_v32, %v1228_v10  ;;  %2078 = vmatpush3.bf16.msra.mxu1 %v1410_v47  ;;  %v2126_v9 = vunpack.i.h.bf16 %v2124_v31  ;;  %v2125_v10 = vunpack.i.l.bf16 %v2124_v31  ;;  %v1562_v31 = vld [vmem:[#allocation4 + $0xa8] sm:$0xff] }
 0x9a0   :  { %2079 = vmatprep.subr.bf16.mxu1 %v1409_v6 }
 0x9a1   :  { %2068 = vmatmul.mubr.msk.bf16.vlgmr.msra.gmra.mxu0 %vm433_vm2, %v1231_v33  ;;  %v1377_v33 = vsel %vm318_vm1, %v2513_v39, %v2116_v23  ;;  %v1381_v36 = vsel %vm1378_vm3, %v1376_v34, %v2125_v10  ;;  %v1869_v39 = vld [vmem:[%s2798_s5] ss:$0 sm:$0xff]  ;;  %v1564_v23 = vld [vmem:[#allocation4 + $0xb8] sm:$0xff]  ;;  %v1563_v10 = vld [vmem:[#allocation4 + $0xb0] sm:$0xff] }
 0x9a2   :  { %1635 = vmatprep.mubr.bf16.mxu0 %v2294_v0  ;;  %v1382_v38 = vsel %vm1378_vm3, %v1377_v33, %v2126_v9  ;;  %v1586_v5 = vpack.c.bf16 %v1564_v23, %v1562_v31  ;;  %v1561_v9 = vld [vmem:[#allocation4 + $0xa0] sm:$0xff]  ;;  %v1558_v33 = vld [vmem:[#allocation4 + $0x88] sm:$0xff]  ;;  %v1560_v34 = vld [vmem:[#allocation4 + $0x98] sm:$0xff] }
 0x9a3   :  { %2080 = vmatpush3.bf16.msra.mxu1 %v1409_v6  ;;  %v1672_v23 = vld [vmem:[#allocation6 + $0x40] sm:$0xff] }
 0x9a4   :  { %2081 = vmatprep.subr.bf16.mxu1 %v1408_v61 }
 0x9a7   :  { %2082 = vmatpush3.bf16.msra.mxu1 %v1408_v61  ;;  %v2219_v61 = vld [vmem:[%s2793_s0 + $0x10] sm:$0xff] }
 0x9a8   :  { %2083 = vmatprep.subr.bf16.mxu1 %v1407_v63 }
 0x9ab   :  { %2084 = vmatpush3.bf16.msra.mxu1 %v1407_v63  ;;  %v2220_v63 = vld [vmem:[%s2793_s0 + $0x18] sm:$0xff] }
 0x9ac   :  { %2085 = vmatprep.subr.bf16.mxu1 %v1406_v7 }
 0x9af   :  { %2086 = vmatpush3.bf16.msra.mxu1 %v1406_v7 }
 0xa52   :  { %v1272_v59 = vpop.f32.mrf.mxu1 }
 0xa54   :  { %v2063_v1 = vpop.f32.mrf.mxu1 }
 0xa56   :  { %v1275_v16 = vpop.f32.mrf.mxu1 }
 0xa57   :  { %v2127_v3 = vpack.i.bf16 %v1275_v16, %v1272_v59  ;;  %v1570_v16 = vld [vmem:[#allocation4 + $0xe8] sm:$0xff] }
 0xa58   :  { %v2064_v17 = vpop.f32.mrf.mxu1 }
 0xa59   :  { %2128 = vrot.lane.b32.xlu0 %v2127_v3, %s2298_s1  ;;  %v1572_v3 = vld [vmem:[#allocation4 + $0xf8] sm:$0xff]  ;;  %v1569_v17 = vld [vmem:[#allocation4 + $0xe0] sm:$0xff] }
 0xa5a   :  { %v1590_v21 = vpack.c.bf16 %v1572_v3, %v1570_v16  ;;  %v1589_v7 = vpack.c.bf16 %v1571_v4, %v1569_v17  ;;  %v1541_v3 = vld [vmem:[#allocation4] sm:$0xff]  ;;  %v1543_v17 = vld [vmem:[#allocation4 + $0x10] sm:$0xff] }
 0xa5b   :  { %v1694_v4 = vld [vmem:[#allocation6 + $0xf0] sm:$0xff] }
 0xa5c   :  { %1603 = vmatprep.subr.bf16.mxu0 %v1590_v21  ;;  %v1575_v21 = vpack.c.bf16 %v1543_v17, %v1541_v3 }
 0xa5d   :  { %1604 = vmatpush1.bf16.msra.mxu0 %v1589_v7  ;;  %v1695_v7 = vld [vmem:[#allocation6 + $0xf8] sm:$0xff] }
 0xa61   :  { %v1319_v11 = vpop.f32.mrf.mxu0 }
 0xa63   :  { %v2069_v12 = vpop.f32.mrf.mxu0 }
 0xa65   :  { %v1322_v8 = vpop.f32.mrf.mxu0 }
 0xa66   :  { %v2132_v13 = vpack.i.bf16 %v1322_v8, %v1319_v11 }
 0xa67   :  { %v2070_v14 = vpop.f32.mrf.mxu0 }
 0xa68   :  { %2133 = vrot.lane.b32.xlu1 %v2132_v13, %s2298_s1 }
 0xacb   :  { %v2129_v48 = vpop.permute.xlu0 %2128 }
 0xacc   :  { %v2131_v50 = vunpack.i.h.bf16 %v2129_v48  ;;  %v2130_v29 = vunpack.i.l.bf16 %v2129_v48 }
 0xace   :  { %v1384_v49 = vsel %vm1383_vm4, %v1379_v30, %v2130_v29  ;;  %v1385_v60 = vsel %vm1383_vm4, %v1380_v46, %v2131_v50  ;;  %v1566_v30 = vld [vmem:[#allocation4 + $0xc8] sm:$0xff]  ;;  %v1568_v46 = vld [vmem:[#allocation4 + $0xd8] sm:$0xff] }
 0xacf   :  { %v1404_v25 = vpack.c.bf16 %v1385_v60, %v1384_v49  ;;  %v1588_v49 = vpack.c.bf16 %v1568_v46, %v1566_v30  ;;  %v1565_v60 = vld [vmem:[#allocation4 + $0xc0] sm:$0xff]  ;;  %v1674_v46 = vld [vmem:[#allocation6 + $0x50] sm:$0xff] }
 0xad1   :  { %2087 = vmatprep.mubr.bf16.mxu1 %v1404_v25  ;;  %v1587_v25 = vpack.c.bf16 %v1567_v27, %v1565_v60  ;;  %1605 = vmatprep.subr.bf16.mxu0 %v1588_v49  ;;  %v1675_v49 = vld [vmem:[#allocation6 + $0x58] sm:$0xff]  ;;  %v1688_v60 = vld [vmem:[#allocation6 + $0xc0] sm:$0xff]  ;;  %v1689_v27 = vld [vmem:[#allocation6 + $0xc8] sm:$0xff] }
 0xad2   :  { %v1712_v31 = vpack.c.bf16 %v1689_v27, %v1688_v60  ;;  %v1665_v60 = vld [vmem:[#allocation6 + $0x8] sm:$0xff] }
 0xad3   :  { %1606 = vmatpush1.bf16.msra.mxu0 %v1587_v25  ;;  %v1705_v25 = vpack.c.bf16 %v1675_v49, %v1674_v46  ;;  %v1664_v49 = vld [vmem:[#allocation6] sm:$0xff] }
 0xad4   :  { %1607 = vmatprep.subr.bf16.mxu0 %v1586_v5  ;;  %v1673_v5 = vld [vmem:[#allocation6 + $0x48] sm:$0xff]  ;;  %v1700_v27 = vpack.c.bf16 %v1665_v60, %v1664_v49 }
 0xada   :  { %v2134_v32 = vpop.permute.xlu1 %2133 }
 0xadb   :  { %v2136_v35 = vunpack.i.h.bf16 %v2134_v32  ;;  %v2135_v55 = vunpack.i.l.bf16 %v2134_v32  ;;  %v1585_v32 = vpack.c.bf16 %v1563_v10, %v1561_v9  ;;  %v1686_v9 = vld [vmem:[#allocation6 + $0xb0] sm:$0xff]  ;;  %v1687_v10 = vld [vmem:[#allocation6 + $0xb8] sm:$0xff] }
 0xadd   :  { %v1387_v40 = vsel %vm1383_vm4, %v1382_v38, %v2136_v35  ;;  %v1386_v41 = vsel %vm1383_vm4, %v1381_v36, %v2135_v55  ;;  %1608 = vmatpush1.bf16.msra.mxu0 %v1585_v32  ;;  %v1584_v35 = vpack.c.bf16 %v1560_v34, %v1558_v33  ;;  %v1557_v55 = vld [vmem:[#allocation4 + $0x80] sm:$0xff]  ;;  %v1559_v36 = vld [vmem:[#allocation4 + $0x90] sm:$0xff]  ;;  %v1704_v32 = vpack.c.bf16 %v1673_v5, %v1672_v23 }
 0xade   :  { %v1405_v42 = vpack.c.bf16 %v1387_v40, %v1386_v41  ;;  %v1583_v38 = vpack.c.bf16 %v1559_v36, %v1557_v55  ;;  %v1554_v40 = vld [vmem:[#allocation4 + $0x68] sm:$0xff]  ;;  %v1556_v41 = vld [vmem:[#allocation4 + $0x78] sm:$0xff]  ;;  %v1711_v33 = vpack.c.bf16 %v1687_v10, %v1686_v9  ;;  %v1670_v34 = vld [vmem:[#allocation6 + $0x30] sm:$0xff] }
 0xadf   :  { %1609 = vmatprep.subr.bf16.mxu0 %v1584_v35  ;;  %v1671_v35 = vld [vmem:[#allocation6 + $0x38] sm:$0xff] }
 0xae0   :  { %2088 = vmatmul.mubr.bf16.vlgmr.msra.gmra.mxu1 %v1405_v42  ;;  %v1553_v42 = vld [vmem:[#allocation4 + $0x60] sm:$0xff]  ;;  %v1703_v55 = vpack.c.bf16 %v1671_v35, %v1670_v34 }
 0xae1   :  { %1610 = vmatpush1.bf16.msra.mxu0 %v1583_v38 }
 0xba0   :  { %v2089_v43 = vpop.f32.mrf.mxu1 }
 0xba1   :  { %v1464_v47 = vadd.f32 %v2089_v43, %v1869_v39  ;;  %v1582_v43 = vpack.c.bf16 %v1556_v41, %v1554_v40 }
 0xba2   :  { %v1455_v44 = vpop.f32.mrf.mxu1 }
 0xba3   :  { %v1456_v45 = vadd.f32 %v1869_v39, %v1455_v44  ;;  %v1472_v62 = vadd.f32 %v2219_v61, %v1464_v47  ;;  %v1550_v44 = vld [vmem:[#allocation4 + $0x48] sm:$0xff]  ;;  %1611 = vmatprep.subr.bf16.mxu0 %v1582_v43  ;;  %v1547_v61 = vld [vmem:[#allocation4 + $0x30] sm:$0xff] }
 0xba4   :  { %v2090_v37 = vpop.f32.mrf.mxu1 }
 0xba5   :  { %v1470_v52 = vadd.f32 %v2217_v51, %v1456_v45  ;;  %v1467_v56 = vadd.f32 %v2090_v37, %v1869_v39  ;;  %v1552_v45 = vld [vmem:[#allocation4 + $0x58] sm:$0xff]  ;;  %v1549_v51 = vld [vmem:[#allocation4 + $0x40] sm:$0xff] }
 0xba6   :  { %v1458_v6 = vpop.f32.mrf.mxu1  ;;  %v1580_v47 = vpack.c.bf16 %v1552_v45, %v1550_v44 }
 0xba7   :  { %v1459_v53 = vadd.f32 %v1869_v39, %v1458_v6  ;;  %1476 = vadd.xlane.f32.xlu0 %v1470_v52  ;;  %v1473_v1 = vadd.f32 %v2220_v63, %v1467_v56  ;;  %v1555_v39 = vld [vmem:[#allocation4 + $0x70] sm:$0xff]  ;;  %v1546_v6 = vld [vmem:[#allocation4 + $0x28] sm:$0xff]  ;;  %v1544_v63 = vld [vmem:[#allocation4 + $0x18] sm:$0xff] }
 0xba8   :  { %v1581_v37 = vpack.c.bf16 %v1555_v39, %v1553_v42 }
 0xba9   :  { %v1471_v59 = vadd.f32 %v2218_v54, %v1459_v53  ;;  %v1548_v53 = vld [vmem:[#allocation4 + $0x38] sm:$0xff] }
 0xbaa   :  { %1612 = vmatpush1.bf16.msra.mxu0 %v1581_v37  ;;  %v1578_v54 = vpack.c.bf16 %v1548_v53, %v1546_v6  ;;  %v1870_v53 = vld [vmem:[%s2799_s6] ss:$0 sm:$0xff] }
 0xbab   :  { %1478 = vadd.xlane.f32.xlu1 %v1471_v59  ;;  %1480 = vadd.xlane.f32.xlu0 %v1472_v62 }
 0xbac   :  { %1613 = vmatprep.subr.bf16.mxu0 %v1580_v47 }
 0xbaf   :  { %1482 = vadd.xlane.f32.xlu0 %v1473_v1 }
 0xc30   :  { %v1477_v11 = vpop.xlane.xlu0 %1476 }
 0xc31   :  { %v1485_v12 = vmul.f32 0.0078125, %v1477_v11  ;;  %v1678_v11 = vld [vmem:[#allocation6 + $0x70] sm:$0xff] }
 0xc33   :  { %v2723_v8 = vsub.f32 %v1470_v52, %v1485_v12  ;;  %v1551_v52 = vld [vmem:[#allocation4 + $0x50] sm:$0xff]  ;;  %v1715_v12 = vpack.c.bf16 %v1695_v7, %v1694_v4 }
 0xc34   :  { %v1479_v13 = vpop.xlane.xlu1 %1478  ;;  %v1481_v14 = vpop.xlane.xlu0 %1480  ;;  %v1579_v56 = vpack.c.bf16 %v1551_v52, %v1549_v51 }
 0xc35   :  { %v1486_v15 = vmul.f32 0.0078125, %v1479_v13  ;;  %v1487_v18 = vmul.f32 0.0078125, %v1481_v14  ;;  %v1493_v19 = vmul.f32 %v2723_v8, %v2723_v8  ;;  %v1679_v13 = vld [vmem:[#allocation6 + $0x78] sm:$0xff]  ;;  %v1692_v14 = vld [vmem:[#allocation6 + $0xe0] sm:$0xff]  ;;  %1927 = vmatprep.subr.bf16.mxu1 %v1715_v12 }
 0xc36   :  { %1614 = vmatpush1.bf16.msra.mxu0 %v1579_v56 }
 0xc37   :  { %v2727_v20 = vsub.f32 %v1471_v59, %v1486_v15  ;;  %v2729_v22 = vsub.f32 %v1472_v62, %v1487_v18  ;;  %1497 = vadd.xlane.f32.xlu0 %v1493_v19  ;;  %v1545_v59 = vld [vmem:[#allocation4 + $0x20] sm:$0xff]  ;;  %v1542_v62 = vld [vmem:[#allocation4 + $0x8] sm:$0xff]  ;;  %1615 = vmatprep.subr.bf16.mxu0 %v1578_v54  ;;  %v1707_v18 = vpack.c.bf16 %v1679_v13, %v1678_v11 }
 0xc38   :  { %v1483_v24 = vpop.xlane.xlu0 %1482  ;;  %v1576_v16 = vpack.c.bf16 %v1544_v63, %v1542_v62  ;;  %v1693_v15 = vld [vmem:[#allocation6 + $0xe8] sm:$0xff]  ;;  %v1871_v62 = vld [vmem:[%s2800_s7] ss:$0 sm:$0xff] }
 0xc39   :  { %v1488_v26 = vmul.f32 0.0078125, %v1483_v24  ;;  %v1494_v28 = vmul.f32 %v2727_v20, %v2727_v20  ;;  %v1495_v48 = vmul.f32 %v2729_v22, %v2729_v22  ;;  %v1714_v19 = vpack.c.bf16 %v1693_v15, %v1692_v14  ;;  %v1676_v24 = vld [vmem:[#allocation6 + $0x60] sm:$0xff]  ;;  %1928 = vmatpush3.bf16.msra.mxu1 %v1707_v18  ;;  %v1669_v15 = vld [vmem:[#allocation6 + $0x28] sm:$0xff] }
 0xc3a   :  { %v1684_v13 = vld [vmem:[#allocation6 + $0xa0] sm:$0xff] }
 0xc3b   :  { %v2735_v50 = vsub.f32 %v1473_v1, %v1488_v26  ;;  %1499 = vadd.xlane.f32.xlu1 %v1494_v28  ;;  %1501 = vadd.xlane.f32.xlu0 %v1495_v48  ;;  %v1577_v1 = vpack.c.bf16 %v1547_v61, %v1545_v59  ;;  %v1677_v26 = vld [vmem:[#allocation6 + $0x68] sm:$0xff]  ;;  %v1690_v28 = vld [vmem:[#allocation6 + $0xd0] sm:$0xff]  ;;  %v1691_v48 = vld [vmem:[#allocation6 + $0xd8] sm:$0xff] }
 0xc3c   :  { %1929 = vmatprep.subr.bf16.mxu1 %v1714_v19  ;;  %v1713_v30 = vpack.c.bf16 %v1691_v48, %v1690_v28  ;;  %v1682_v19 = vld [vmem:[#allocation6 + $0x90] sm:$0xff]  ;;  %v1667_v28 = vld [vmem:[#allocation6 + $0x18] sm:$0xff] }
 0xc3d   :  { %v1496_v29 = vmul.f32 %v2735_v50, %v2735_v50  ;;  %1616 = vmatpush1.bf16.msra.mxu0 %v1577_v1 }
 0xc3e   :  { %1617 = vmatprep.subr.bf16.mxu0 %v1576_v16 }
 0xc3f   :  { %1503 = vadd.xlane.f32.xlu1 %v1496_v29  ;;  %v1706_v29 = vpack.c.bf16 %v1677_v26, %v1676_v24  ;;  %v1683_v24 = vld [vmem:[#allocation6 + $0x98] sm:$0xff] }
 0xc40   :  { %v1709_v26 = vpack.c.bf16 %v1683_v24, %v1682_v19 }
 0xc41   :  { %1618 = vmatpush1.bf16.msra.mxu0 %v1575_v21  ;;  %1930 = vmatpush3.bf16.msra.mxu1 %v1706_v29  ;;  %v1680_v29 = vld [vmem:[#allocation6 + $0x80] sm:$0xff] }
 0xc42   :  { %1931 = vmatprep.subr.bf16.mxu1 %v1713_v30  ;;  %v1681_v30 = vld [vmem:[#allocation6 + $0x88] sm:$0xff] }
 0xc43   :  { %v1708_v46 = vpack.c.bf16 %v1681_v30, %v1680_v29 }
 0xc45   :  { %1932 = vmatpush3.bf16.msra.mxu1 %v1705_v25  ;;  %v1591_v25 = vld [vmem:[%s2802_s9] sm:$0x3] }
 0xc46   :  { %1933 = vmatprep.subr.bf16.mxu1 %v1712_v31  ;;  %v1600_v23 = vrot.slane %v1591_v25, %v175_v58  ;;  %v1596_v5 = vrot.slane %v1591_v25, %v2417_v2 }
 0xc49   :  { %1934 = vmatpush3.bf16.msra.mxu1 %v1704_v32 }
 0xc4a   :  { %1935 = vmatprep.subr.bf16.mxu1 %v1711_v33 }
 0xc4d   :  { %1936 = vmatpush3.bf16.msra.mxu1 %v1703_v55 }
 0xcc0   :  { %v1498_v36 = vpop.xlane.xlu0 %1497 }
 0xcc1   :  { %v1505_v38 = vmul.f32 0.0078125, %v1498_v36 }
 0xcc3   :  { %v1509_v40 = vadd.f32 1e-05, %v1505_v38 }
 0xcc4   :  { %v1500_v41 = vpop.xlane.xlu1 %1499  ;;  %v1502_v42 = vpop.xlane.xlu0 %1501 }
 0xcc5   :  { %2201 = vrsqrt.f32 %v1509_v40  ;;  %v1506_v43 = vmul.f32 0.0078125, %v1500_v41  ;;  %v1507_v39 = vmul.f32 0.0078125, %v1502_v42 }
 0xcc7   :  { %v1510_v44 = vadd.f32 1e-05, %v1506_v43  ;;  %v1511_v45 = vadd.f32 1e-05, %v1507_v39 }
 0xcc8   :  { %v1504_v37 = vpop.xlane.xlu1 %1503 }
 0xcc9   :  { %2203 = vrsqrt.f32 %v1510_v44  ;;  %v1508_v47 = vmul.f32 0.0078125, %v1504_v37 }
 0xcca   :  { %2205 = vrsqrt.f32 %v1511_v45 }
 0xccb   :  { %v1512_v51 = vadd.f32 1e-05, %v1508_v47 }
 0xccd   :  { %2207 = vrsqrt.f32 %v1512_v51 }
 0xcd2   :  { %v2202_v52 = vpop.eup %2201 }
 0xcd3   :  { %v1517_v6 = vmul.f32 %v2202_v52, %v2723_v8 }
 0xcd5   :  { %v1527_v59 = vmul.f32 %v1870_v53, %v1517_v6 }
 0xcd6   :  { %v2204_v56 = vpop.eup %2203 }
 0xcd7   :  { %v1518_v54 = vmul.f32 %v2204_v56, %v2727_v20  ;;  %v2206_v61 = vpop.eup %2205  ;;  %v2747_v16 = vadd.f32 %v1871_v62, %v1527_v59 }
 0xcd8   :  { %v1519_v8 = vmul.f32 %v2206_v61, %v2729_v22  ;;  %v1685_v22 = vld [vmem:[#allocation6 + $0xa8] sm:$0xff]  ;;  %v1872_v61 = vld [vmem:[%s2804_s11] ss:$0 sm:$0xff] }
 0xcd9   :  { %v1528_v63 = vmul.f32 %v1870_v53, %v1518_v54  ;;  %v1710_v14 = vpack.c.bf16 %v1685_v22, %v1684_v13 }
 0xcda   :  { %v2208_v1 = vpop.eup %2207  ;;  %v1529_v4 = vmul.f32 %v1870_v53, %v1519_v8 }
 0xcdb   :  { %v2749_v3 = vadd.f32 %v1871_v62, %v1528_v63  ;;  %v1520_v17 = vmul.f32 %v2208_v1, %v2735_v50  ;;  %v1668_v50 = vld [vmem:[#allocation6 + $0x20] sm:$0xff]  ;;  %1937 = vmatprep.subr.bf16.mxu1 %v1710_v14 }
 0xcdc   :  { %v2758_v11 = vadd.f32 %v1871_v62, %v1529_v4  ;;  %v1702_v18 = vpack.c.bf16 %v1669_v15, %v1668_v50 }
 0xcdd   :  { %v1573_v21 = vpack.c.bf16 %v2749_v3, %v2747_v16  ;;  %v1530_v20 = vmul.f32 %v1870_v53, %v1520_v17 }
 0xcde   :  { %1938 = vmatpush3.bf16.msra.mxu1 %v1702_v18 }
 0xcdf   :  { %1636 = vmatmul.mubr.bf16.vlgmr.msra.gmra.mxu0 %v1573_v21  ;;  %v2756_v7 = vadd.f32 %v1871_v62, %v1530_v20  ;;  %1939 = vmatprep.subr.bf16.mxu1 %v1709_v26 }
 0xce0   :  { %1645 = vmatprep.mubr.bf16.mxu0 %v2294_v0  ;;  %v1666_v0 = vld [vmem:[#allocation6 + $0x10] sm:$0xff] }
 0xce1   :  { %v1574_v12 = vpack.c.bf16 %v2756_v7, %v2758_v11  ;;  %v1701_v48 = vpack.c.bf16 %v1667_v28, %v1666_v0 }
 0xce3   :  { %1940 = vmatpush3.bf16.msra.mxu1 %v1701_v48 }
 0xce4   :  { %1941 = vmatprep.subr.bf16.mxu1 %v1708_v46 }
 0xce7   :  { %1646 = vmatmul.mubr.bf16.gmra.mxu0 %v1574_v12  ;;  %1942 = vmatpush3.bf16.msra.mxu1 %v1700_v27 }
 0xd9f   :  { %v1637_v31 = vpop.f32.mrf.mxu0 }
 0xda0   :  { %v1638_v34 = vadd.f32 %v1637_v31, %v1596_v5 }
 0xda1   :  { %v1639_v9 = vpop.f32.mrf.mxu0 }
 0xda2   :  { %v1640_v32 = vadd.f32 %v1639_v9, %v1600_v23  ;;  %v1656_v42 = vmax.f32 %v1638_v34, 0.0 }
 0xda3   :  { %v1641_v10 = vpop.f32.mrf.mxu0 }
 0xda4   :  { %v1642_v33 = vadd.f32 %v1641_v10, %v1596_v5  ;;  %v1657_v40 = vmax.f32 %v1640_v32, 0.0 }
 0xda5   :  { %v1643_v35 = vpop.f32.mrf.mxu0 }
 0xda6   :  { %v1644_v55 = vadd.f32 %v1643_v35, %v1600_v23  ;;  %v1658_v36 = vmax.f32 %v1642_v33, 0.0 }
 0xda7   :  { %v1647_v38 = vpop.f32.mrf.mxu0 }
 0xda8   :  { %v1659_v41 = vmax.f32 %v1644_v55, 0.0  ;;  %v1696_v44 = vpack.c.bf16 %v1658_v36, %v1656_v42  ;;  %v1648_v2 = vadd.f32 %v1647_v38, %v1596_v5 }
 0xda9   :  { %v1649_v43 = vpop.f32.mrf.mxu0 }
 0xdaa   :  { %v1697_v39 = vpack.c.bf16 %v1659_v41, %v1657_v40  ;;  %v1650_v57 = vadd.f32 %v1649_v43, %v1600_v23  ;;  %v1660_v53 = vmax.f32 %v1648_v2, 0.0 }
 0xdab   :  { %v1651_v45 = vpop.f32.mrf.mxu0 }
 0xdac   :  { %v1652_v58 = vadd.f32 %v1651_v45, %v1596_v5  ;;  %1755 = vmatprep.mubr.bf16.mxu1 %v1697_v39  ;;  %v1661_v52 = vmax.f32 %v1650_v57, 0.0  ;;  %v1873_v39 = vld [vmem:[%s2805_s12] ss:$0 sm:$0xff] }
 0xdad   :  { %v1653_v37 = vpop.f32.mrf.mxu0  ;;  %1756 = vmatmul.mubr.bf16.vlgmr.msra.gmra.mxu1 %v1696_v44  ;;  %v1874_v45 = vld [vmem:[%s2806_s13] ss:$0 sm:$0xff] }
 0xdae   :  { %v1654_v47 = vadd.f32 %v1653_v37, %v1600_v23  ;;  %v1662_v51 = vmax.f32 %v1652_v58, 0.0 }
 0xdb0   :  { %v1663_v6 = vmax.f32 %v1654_v47, 0.0  ;;  %v1698_v54 = vpack.c.bf16 %v1662_v51, %v1660_v53 }
 0xdb2   :  { %v1699_v56 = vpack.c.bf16 %v1663_v6, %v1661_v52 }
 0xdb4   :  { %1763 = vmatprep.mubr.bf16.mxu1 %v1699_v56 }
 0xdb5   :  { %1764 = vmatmul.mubr.bf16.gmra.mxu1 %v1698_v54 }
 0xe6d   :  { %v1943_v59 = vpop.f32.mrf.mxu1 }
 0xe6f   :  { %v1944_v62 = vpop.f32.mrf.mxu1 }
 0xe70   :  { %v1945_v63 = vadd.f32 %v1944_v62, %v1943_v59 }
 0xe71   :  { %v1946_v1 = vpop.f32.mrf.mxu1 }
 0xe72   :  { %v1758_v8 = vadd.f32 %v1945_v63, %v1872_v61 }
 0xe73   :  { %v1947_v17 = vpop.f32.mrf.mxu1 }
 0xe74   :  { %v1948_v21 = vadd.f32 %v1947_v17, %v1946_v1  ;;  %v1772_v20 = vadd.f32 %v1758_v8, %v2747_v16 }
 0xe75   :  { %v1949_v4 = vpop.f32.mrf.mxu1 }
 0xe76   :  { %v1761_v12 = vadd.f32 %v1948_v21, %v1872_v61  ;;  %1778 = vadd.xlane.f32.xlu0 %v1772_v20 }
 0xe77   :  { %v1950_v13 = vpop.f32.mrf.mxu1 }
 0xe78   :  { %v1951_v22 = vadd.f32 %v1950_v13, %v1949_v4  ;;  %v1773_v14 = vadd.f32 %v1761_v12, %v2749_v3 }
 0xe79   :  { %v1952_v50 = vpop.f32.mrf.mxu1 }
 0xe7a   :  { %v1766_v15 = vadd.f32 %v1951_v22, %v1872_v61  ;;  %1780 = vadd.xlane.f32.xlu1 %v1773_v14 }
 0xe7b   :  { %v1953_v18 = vpop.f32.mrf.mxu1 }
 0xe7c   :  { %v1954_v19 = vadd.f32 %v1953_v18, %v1952_v50  ;;  %v1774_v24 = vadd.f32 %v1766_v15, %v2758_v11 }
 0xe7e   :  { %v1769_v26 = vadd.f32 %v1954_v19, %v1872_v61  ;;  %1782 = vadd.xlane.f32.xlu0 %v1774_v24 }
 0xe80   :  { %v1775_v0 = vadd.f32 %v1769_v26, %v2756_v7 }
 0xe82   :  { %1784 = vadd.xlane.f32.xlu1 %v1775_v0 }
 0xeff   :  { %v1779_v16 = vpop.xlane.xlu0 %1778 }
 0xf00   :  { %v1786_v28 = vmul.f32 0.0078125, %v1779_v16 }
 0xf02   :  { %v1790_v48 = vsub.f32 %v1772_v20, %v1786_v28 }
 0xf03   :  { %v1781_v29 = vpop.xlane.xlu1 %1780 }
 0xf04   :  { %v1787_v30 = vmul.f32 0.0078125, %v1781_v29  ;;  %v1794_v46 = vmul.f32 %v1790_v48, %v1790_v48 }
 0xf06   :  { %v1791_v49 = vsub.f32 %v1773_v14, %v1787_v30  ;;  %1798 = vadd.xlane.f32.xlu0 %v1794_v46 }
 0xf07   :  { %v1783_v3 = vpop.xlane.xlu0 %1782 }
 0xf08   :  { %v1788_v60 = vmul.f32 0.0078125, %v1783_v3  ;;  %v1795_v27 = vmul.f32 %v1791_v49, %v1791_v49 }
 0xf0a   :  { %v1792_v25 = vsub.f32 %v1774_v24, %v1788_v60  ;;  %1800 = vadd.xlane.f32.xlu1 %v1795_v27 }
 0xf0b   :  { %v1785_v31 = vpop.xlane.xlu1 %1784 }
 0xf0c   :  { %v1789_v11 = vmul.f32 0.0078125, %v1785_v31  ;;  %v1796_v23 = vmul.f32 %v1792_v25, %v1792_v25 }
 0xf0e   :  { %v1793_v5 = vsub.f32 %v1775_v0, %v1789_v11  ;;  %1802 = vadd.xlane.f32.xlu0 %v1796_v23 }
 0xf10   :  { %v1797_v7 = vmul.f32 %v1793_v5, %v1793_v5 }
 0xf12   :  { %1804 = vadd.xlane.f32.xlu1 %v1797_v7 }
 0xf8f   :  { %v1799_v9 = vpop.xlane.xlu0 %1798 }
 0xf90   :  { %v1806_v10 = vmul.f32 0.0078125, %v1799_v9 }
 0xf92   :  { %v1810_v32 = vadd.f32 1e-05, %v1806_v10 }
 0xf93   :  { %v1801_v33 = vpop.xlane.xlu1 %1800 }
 0xf94   :  { %2209 = vrsqrt.f32 %v1810_v32  ;;  %v1807_v34 = vmul.f32 0.0078125, %v1801_v33 }
 0xf96   :  { %v1811_v35 = vadd.f32 1e-05, %v1807_v34 }
 0xf97   :  { %v1803_v55 = vpop.xlane.xlu0 %1802 }
 0xf98   :  { %2211 = vrsqrt.f32 %v1811_v35  ;;  %v1808_v36 = vmul.f32 0.0078125, %v1803_v55 }
 0xf9a   :  { %v1812_v38 = vadd.f32 1e-05, %v1808_v36 }
 0xf9b   :  { %v1805_v40 = vpop.xlane.xlu1 %1804 }
 0xf9c   :  { %2213 = vrsqrt.f32 %v1812_v38  ;;  %v1809_v41 = vmul.f32 0.0078125, %v1805_v40 }
 0xf9e   :  { %v1813_v42 = vadd.f32 1e-05, %v1809_v41 }
 0xfa0   :  { %2215 = vrsqrt.f32 %v1813_v42 }
 0xfa1   :  { %v2210_v43 = vpop.eup %2209 }
 0xfa2   :  { %v1818_v44 = vmul.f32 %v2210_v43, %v1790_v48 }
 0xfa4   :  { %v1828_v57 = vmul.f32 %v1873_v39, %v1818_v44 }
 0xfa5   :  { %v2212_v58 = vpop.eup %2211 }
 0xfa6   :  { %v1838_v2 = vadd.f32 %v1874_v45, %v1828_v57  ;;  %v1819_v37 = vmul.f32 %v2212_v58, %v1791_v49 }
 0xfa8   :  { %1842 = vst [vmem:[%s2807_s14] sm:$0xff] %v1838_v2  ;;  %v1829_v47 = vmul.f32 %v1873_v39, %v1819_v37 }
 0xfa9   :  { %v2214_v51 = vpop.eup %2213 }
 0xfaa   :  { %v1839_v52 = vadd.f32 %v1874_v45, %v1829_v47  ;;  %v1820_v6 = vmul.f32 %v2214_v51, %v1792_v25 }
 0xfac   :  { %1843 = vst [vmem:[%s2807_s14 + $0x8] sm:$0xff] %v1839_v52  ;;  %v1830_v53 = vmul.f32 %v1873_v39, %v1820_v6 }
 0xfad   :  { %v2216_v56 = vpop.eup %2215 }
 0xfae   :  { %v1840_v54 = vadd.f32 %v1874_v45, %v1830_v53  ;;  %v1821_v59 = vmul.f32 %v2216_v56, %v1793_v5 }
 0xfb0   :  { %1844 = vst [vmem:[%s2807_s14 + $0x10] sm:$0xff] %v1840_v54  ;;  %v1831_v61 = vmul.f32 %v1873_v39, %v1821_v59 }
 0xfb2   :  { %v1841_v62 = vadd.f32 %v1874_v45, %v1831_v61 }
 0xfb4   :  { %1845 = vst [vmem:[%s2807_s14 + $0x18] sm:$0xff] %v1841_v62 }
 0xfb5   :  { %1850 = vsyncpa [#allocation3], 1 }
 0xfb6   :  { %1851 = vsyncpa [#allocation5], 1 }

// kernel: forward.6
= control target key start
LH: loop header
LB: loop body
LE: loop exit
PB: predicated region body
PF: predicated region fallthrough
CT: control target
= control target key end

     0   :  { %v2169_v3 = vmov 0   ;;  %v2170_v55 = vmov 0.0   ;;  %vm2171_vm0 = vmmov 0   ;;  %v128_v56 = vlaneseq  ;;  %s2174_s22 = smov 64   ;;  %s2995_s2 = inlined_call_operand.vmem [shape: f32[128,384], index: 2, kind: input, shape index: {}]   ;;  %s2996_s0 = inlined_call_operand.vmem [shape: f32[2,16,128], index: 0, kind: input, shape index: {}]   ;;  %s2997_s3 = inlined_call_operand.vmem [shape: f32[1,384], index: 3, kind: input, shape index: {}]   ;;  %s2998_s1 = inlined_call_operand.vmem [shape: f32[2,16], index: 1, kind: input, shape index: {}]   ;;  %s2999_s4 = inlined_call_operand.vmem [shape: f32[128,128], index: 4, kind: input, shape index: {}]   ;;  %s3000_s5 = inlined_call_operand.vmem [shape: f32[1,128], index: 5, kind: input, shape index: {}]   ;;  %s3001_s8 = inlined_call_operand.vmem [shape: f32[128,256], index: 8, kind: input, shape index: {}]   ;;  %s3002_s10 = inlined_call_operand.vmem [shape: f32[256,128], index: 10, kind: input, shape index: {}]   ;;  %s3003_s6 = inlined_call_operand.vmem [shape: f32[1,128], index: 6, kind: input, shape index: {}]   ;;  %s3004_s7 = inlined_call_operand.vmem [shape: f32[1,128], index: 7, kind: input, shape index: {}]   ;;  %s3005_s9 = inlined_call_operand.vmem [shape: f32[1,256], index: 9, kind: input, shape index: {}]   ;;  %s3006_s11 = inlined_call_operand.vmem [shape: f32[1,128], index: 11, kind: input, shape index: {}]   ;;  %s3007_s12 = inlined_call_operand.vmem [shape: f32[1,128], index: 12, kind: input, shape index: {}]   ;;  %s3008_s13 = inlined_call_operand.vmem [shape: f32[1,128], index: 13, kind: input, shape index: {}]   ;;  %s3009_s14 = inlined_call_operand.vmem [shape: f32[2,16,128], index: 14, kind: output, shape index: {}]  }
   0x1   :  { %v95_v0 = vld [vmem:[%s2995_s2 + $0x158] sm:$0xff]  ;;  %v98_v1 = vld [vmem:[%s2995_s2 + $0x170] sm:$0xff]  ;;  %175 = vmatprep.mubr.bf16.mxu0 %v2169_v3  ;;  %v97_v5 = vld [vmem:[%s2995_s2 + $0x168] sm:$0xff]  ;;  %vm277_vm1 = vcmask 261120   ;;  %vm392_vm2 = vcmask 130048   ;;  %vm1337_vm3 = vcmask 523264  }
   0x2   :  { %v94_v2 = vld [vmem:[%s2995_s2 + $0x150] sm:$0xff]  ;;  %v124_v4 = vpack.c.bf16 %v98_v1, %v95_v0  ;;  %v89_v6 = vld [vmem:[%s2995_s2 + $0x128] sm:$0xff]  ;;  %v92_v7 = vld [vmem:[%s2995_s2 + $0x140] sm:$0xff]  ;;  %v2367_v57 = vshrl.u32 %v128_v56, 7  ;;  %vm1342_vm4 = vcmask 785408  }
   0x3   :  { %v123_v8 = vpack.c.bf16 %v97_v5, %v94_v2  ;;  %v121_v9 = vpack.c.bf16 %v92_v7, %v89_v6  ;;  %v88_v10 = vld [vmem:[%s2995_s2 + $0x120] sm:$0xff]  ;;  %v91_v11 = vld [vmem:[%s2995_s2 + $0x138] sm:$0xff]  ;;  %v86_v13 = vld [vmem:[%s2995_s2 + $0x110] sm:$0xff] }
   0x4   :  { %v83_v12 = vld [vmem:[%s2995_s2 + $0xf8] sm:$0xff]  ;;  %143 = vmatprep.subr.bf16.mxu0 %v124_v4  ;;  %v120_v14 = vpack.c.bf16 %v91_v11, %v88_v10  ;;  %v82_v16 = vld [vmem:[%s2995_s2 + $0xf0] sm:$0xff]  ;;  %v85_v17 = vld [vmem:[%s2995_s2 + $0x108] sm:$0xff]  ;;  %v134_v58 = vsub.s32 1, %v2367_v57  ;;  %v2379_v1 = vsub.s32 0, %v2367_v57 }
   0x5   :  { %144 = vmatpush1.bf16.msra.mxu0 %v123_v8  ;;  %v118_v15 = vpack.c.bf16 %v86_v13, %v83_v12  ;;  %v77_v18 = vld [vmem:[%s2995_s2 + $0xc8] sm:$0xff]  ;;  %v80_v19 = vld [vmem:[%s2995_s2 + $0xe0] sm:$0xff]  ;;  %v117_v20 = vpack.c.bf16 %v85_v17, %v82_v16  ;;  %v79_v23 = vld [vmem:[%s2995_s2 + $0xd8] sm:$0xff] }
   0x6   :  { %145 = vmatprep.subr.bf16.mxu0 %v121_v9  ;;  %v115_v21 = vpack.c.bf16 %v80_v19, %v77_v18  ;;  %v76_v22 = vld [vmem:[%s2995_s2 + $0xc0] sm:$0xff]  ;;  %v71_v24 = vld [vmem:[%s2995_s2 + $0x98] sm:$0xff]  ;;  %v74_v25 = vld [vmem:[%s2995_s2 + $0xb0] sm:$0xff] }
   0x7   :  { %v48_v26 = vld [vmem:[%s2996_s0] sm:$0xff]  ;;  %v49_v27 = vld [vmem:[%s2996_s0 + $0x8] sm:$0xff]  ;;  %v114_v28 = vpack.c.bf16 %v79_v23, %v76_v22  ;;  %v112_v30 = vpack.c.bf16 %v74_v25, %v71_v24  ;;  %v70_v31 = vld [vmem:[%s2995_s2 + $0x90] sm:$0xff] }
   0x8   :  { %v100_v29 = vpack.c.bf16 %v49_v27, %v48_v26  ;;  %v73_v32 = vld [vmem:[%s2995_s2 + $0xa8] sm:$0xff]  ;;  %v68_v34 = vld [vmem:[%s2995_s2 + $0x80] sm:$0xff]  ;;  %v67_v38 = vld [vmem:[%s2995_s2 + $0x78] sm:$0xff] }
   0x9   :  { %146 = vmatpush1.bf16.msra.mxu0 %v120_v14  ;;  %v65_v33 = vld [vmem:[%s2995_s2 + $0x68] sm:$0xff]  ;;  %v111_v35 = vpack.c.bf16 %v73_v32, %v70_v31  ;;  %v64_v37 = vld [vmem:[%s2995_s2 + $0x60] sm:$0xff]  ;;  %v59_v39 = vld [vmem:[%s2995_s2 + $0x38] sm:$0xff] }
   0xa   :  { %147 = vmatprep.subr.bf16.mxu0 %v118_v15  ;;  %1928 = vmatprep.mubr.bf16.mxu1 %v100_v29  ;;  %v109_v36 = vpack.c.bf16 %v68_v34, %v65_v33  ;;  %v62_v40 = vld [vmem:[%s2995_s2 + $0x50] sm:$0xff]  ;;  %v108_v41 = vpack.c.bf16 %v67_v38, %v64_v37  ;;  %v61_v44 = vld [vmem:[%s2995_s2 + $0x48] sm:$0xff]  ;;  %v56_v46 = vld [vmem:[%s2995_s2 + $0x20] sm:$0xff] }
   0xb   :  { %v106_v42 = vpack.c.bf16 %v62_v40, %v59_v39  ;;  %v58_v43 = vld [vmem:[%s2995_s2 + $0x30] sm:$0xff]  ;;  %v53_v45 = vld [vmem:[%s2995_s2 + $0x8] sm:$0xff]  ;;  %v52_v49 = vld [vmem:[%s2995_s2] sm:$0xff] }
   0xc   :  { %v105_v47 = vpack.c.bf16 %v61_v44, %v58_v43  ;;  %v103_v48 = vpack.c.bf16 %v56_v46, %v53_v45  ;;  %v55_v50 = vld [vmem:[%s2995_s2 + $0x18] sm:$0xff]  ;;  %v50_v52 = vld [vmem:[%s2996_s0 + $0x10] sm:$0xff]  ;;  %v2373_v60 = vld [vmem:[%s2997_s3] sm:$0x7]  ;;  %v2172_v46 = vmov 1966171168  }
   0xd   :  { %148 = vmatpush1.bf16.msra.mxu0 %v117_v20  ;;  %v102_v51 = vpack.c.bf16 %v55_v50, %v52_v49  ;;  %v51_v53 = vld [vmem:[%s2996_s0 + $0x18] sm:$0xff]  ;;  %v135_v62 = vrot.slane %v2373_v60, %v134_v58  ;;  %v131_v8 = vrot.slane %v2373_v60, %v2379_v1  ;;  %v96_v22 = vld [vmem:[%s2995_s2 + $0x160] sm:$0xff]  ;;  %v90_v24 = vld [vmem:[%s2995_s2 + $0x130] sm:$0xff]  ;;  %s2175_s3 = smov 32  }
   0xe   :  { %149 = vmatprep.subr.bf16.mxu0 %v115_v21  ;;  %v2361_v54 = vpack.c.bf16 %v51_v53, %v50_v52  ;;  %v99_v23 = vld [vmem:[%s2995_s2 + $0x178] sm:$0xff]  ;;  %v93_v26 = vld [vmem:[%s2995_s2 + $0x148] sm:$0xff]  ;;  %v78_v31 = vld [vmem:[%s2995_s2 + $0xd0] sm:$0xff] }
   0xf   :  { %v125_v25 = vpack.c.bf16 %v99_v23, %v96_v22  ;;  %v122_v27 = vpack.c.bf16 %v93_v26, %v90_v24  ;;  %v81_v32 = vld [vmem:[%s2995_s2 + $0xe8] sm:$0xff]  ;;  %v72_v34 = vld [vmem:[%s2995_s2 + $0xa0] sm:$0xff]  ;;  %v66_v37 = vld [vmem:[%s2995_s2 + $0x70] sm:$0xff] }
  0x10   :  { %v116_v33 = vpack.c.bf16 %v81_v32, %v78_v31  ;;  %v69_v38 = vld [vmem:[%s2995_s2 + $0x88] sm:$0xff]  ;;  %v60_v40 = vld [vmem:[%s2995_s2 + $0x40] sm:$0xff]  ;;  %v54_v43 = vld [vmem:[%s2995_s2 + $0x10] sm:$0xff] }
  0x11   :  { %150 = vmatpush1.bf16.msra.mxu0 %v114_v28  ;;  %v84_v28 = vld [vmem:[%s2995_s2 + $0x100] sm:$0xff]  ;;  %1912 = vmatprep.subr.bf16.mxu1 %v125_v25  ;;  %v110_v39 = vpack.c.bf16 %v69_v38, %v66_v37  ;;  %v57_v44 = vld [vmem:[%s2995_s2 + $0x28] sm:$0xff] }
  0x12   :  { %151 = vmatprep.subr.bf16.mxu0 %v112_v30  ;;  %1913 = vmatpush3.bf16.msra.mxu1 %v125_v25  ;;  %v104_v45 = vpack.c.bf16 %v57_v44, %v54_v43  ;;  %v1809_v50 = vld.sshfl [vmem:[%s2998_s1] sm:$0x11 pattern:$0x75316420]  ;;  %s2173_s1 = smov 96  }
  0x13   :  { %1914 = vmatprep.subr.bf16.mxu1 %v122_v27  ;;  %v254_v52 = vcombine.high %v1809_v50, %v1809_v50 }
  0x15   :  { %152 = vmatpush1.bf16.msra.mxu0 %v111_v35  ;;  %v75_v35 = vld [vmem:[%s2995_s2 + $0xb8] sm:$0xff] }
  0x16   :  { %153 = vmatprep.subr.bf16.mxu0 %v109_v36  ;;  %1915 = vmatpush3.bf16.msra.mxu1 %v122_v27  ;;  %v113_v36 = vpack.c.bf16 %v75_v35, %v72_v34 }
  0x19   :  { %154 = vmatpush1.bf16.msra.mxu0 %v108_v41  ;;  %v63_v41 = vld [vmem:[%s2995_s2 + $0x58] sm:$0xff] }
  0x1a   :  { %155 = vmatprep.subr.bf16.mxu0 %v106_v42  ;;  %v107_v42 = vpack.c.bf16 %v63_v41, %v60_v40 }
  0x1d   :  { %156 = vmatpush1.bf16.msra.mxu0 %v105_v47  ;;  %v256_v47 = vunpack.c.l.s4 %v2172_v46 }
  0x1e   :  { %157 = vmatprep.subr.bf16.mxu0 %v103_v48 }
  0x1f   :  { %v257_v48 = vunpack.c.0.s8 %v256_v47 }
  0x21   :  { %158 = vmatpush1.bf16.msra.mxu0 %v102_v51  ;;  %v260_v49 = vsub.s32 %v257_v48, %v2367_v57 }
  0x22   :  { %1932 = vmatprep.subr.bf16.mxu0 %v2170_v55 }
  0x23   :  { %v261_v51 = vrot.slane %v1809_v50, %v260_v49  ;;  %v268_v56 = vrot.slane %v254_v52, %v260_v49 }
  0x24   :  { %176 = vmatmul.mubr.bf16.vlgmr.msra.gmra.mxu0 %v100_v29  ;;  %v87_v29 = vld [vmem:[%s2995_s2 + $0x118] sm:$0xff] }
  0x25   :  { %185 = vmatprep.mubr.bf16.mxu0 %v2169_v3  ;;  %v119_v30 = vpack.c.bf16 %v87_v29, %v84_v28  ;;  %v271_v53 = vmul.f32 -1e+30, %v261_v51 }
  0x27   :  { %1916 = vmatprep.subr.bf16.mxu1 %v119_v30 }
  0x28   :  { %1917 = vmatpush3.bf16.msra.mxu1 %v119_v30 }
  0x29   :  { %1918 = vmatprep.subr.bf16.mxu1 %v116_v33 }
  0x2c   :  { %186 = vmatmul.mubr.bf16.gmra.mxu0 %v2361_v54  ;;  %1919 = vmatpush3.bf16.msra.mxu1 %v116_v33 }
  0x2d   :  { %1934 = vmatprep.mubr.msk.bf16.mxu0 %vm2171_vm0, %v2170_v55  ;;  %1920 = vmatprep.subr.bf16.mxu1 %v113_v36 }
  0x30   :  { %1921 = vmatpush3.bf16.msra.mxu1 %v113_v36 }
  0x31   :  { %1922 = vmatprep.subr.bf16.mxu1 %v110_v39 }
  0x34   :  { %1923 = vmatpush3.bf16.msra.mxu1 %v110_v39  ;;  %v138_v39 = vsub.s32 2, %v2367_v57 }
  0x35   :  { %1924 = vmatprep.subr.bf16.mxu1 %v107_v42 }
  0x36   :  { %v139_v41 = vrot.slane %v2373_v60, %v138_v39 }
  0x38   :  { %1925 = vmatpush3.bf16.msra.mxu1 %v107_v42 }
  0x39   :  { %1926 = vmatprep.subr.bf16.mxu1 %v104_v45 }
  0x3c   :  { %1927 = vmatpush3.bf16.msra.mxu1 %v104_v45 }
  0x3d   :  { %1944 = vmatprep.subr.bf16.mxu1 %v2170_v55 }
  0x3f   :  { %1929 = vmatmul.mubr.bf16.vlgmr.msra.gmra.mxu1 %v2361_v54 }
  0x40   :  { %1946 = vmatprep.mubr.msk.bf16.mxu1 %vm2171_vm0, %v2170_v55 }
  0xe4   :  { %v177_v59 = vpop.f32.mrf.mxu0 }
  0xe5   :  { %v178_v14 = vadd.f32 %v177_v59, %v131_v8  ;;  %v2462_v59 = vrot.slane %v271_v53, %v2379_v1 }
  0xe6   :  { %v179_v61 = vpop.f32.mrf.mxu0 }
  0xe7   :  { %v180_v2 = vadd.f32 %v179_v61, %v135_v62 }
  0xe8   :  { %v181_v63 = vpop.f32.mrf.mxu0 }
  0xe9   :  { %v182_v11 = vadd.f32 %v181_v63, %v131_v8  ;;  %v272_v63 = vmul.f32 -1e+30, %v268_v56 }
  0xea   :  { %v183_v0 = vpop.f32.mrf.mxu0 }
  0xeb   :  { %v184_v4 = vadd.f32 %v183_v0, %v135_v62  ;;  %v2388_v16 = vpack.c.bf16 %v182_v11, %v178_v14 }
  0xec   :  { %v187_v5 = vpop.f32.mrf.mxu0 }
  0xed   :  { %v2381_v6 = vpack.c.bf16 %v184_v4, %v180_v2  ;;  %v188_v18 = vadd.f32 %v187_v5, %v131_v8 }
  0xee   :  { %v189_v7 = vpop.f32.mrf.mxu0 }
  0xef   :  { %v282_v9 = vsel %vm277_vm1, %v2381_v6, 0  ;;  %v190_v12 = vadd.f32 %v189_v7, %v135_v62 }
  0xf0   :  { %v191_v10 = vpop.f32.mrf.mxu0  ;;  %1933 = vmatpush3.bf16.xpose.msra.mxu0 %v282_v9 }
  0xf1   :  { %1938 = vmatprep.subr.bf16.mxu0 %v2170_v55  ;;  %v192_v19 = vadd.f32 %v191_v10, %v131_v8  ;;  %v2467_v8 = vrot.slane %v272_v63, %v2379_v1 }
  0xf2   :  { %v193_v13 = vpop.f32.mrf.mxu0 }
  0xf3   :  { %v194_v15 = vadd.f32 %v193_v13, %v135_v62  ;;  %v2399_v21 = vpack.c.bf16 %v192_v19, %v188_v18 }
  0xf5   :  { %v2390_v17 = vpack.c.bf16 %v194_v15, %v190_v12 }
  0xf7   :  { %1935 = vmatmul.mubr.msk.bf16.vlgmr.msra.gmra.mxu0 %vm277_vm1, %v2388_v16  ;;  %v329_v20 = vsel %vm277_vm1, %v2390_v17, 0 }
  0xf8   :  { %1939 = vmatpush3.bf16.xpose.msra.mxu0 %v329_v20  ;;  %1940 = vmatprep.mubr.msk.bf16.mxu0 %vm2171_vm0, %v2170_v55 }
  0xf9   :  { %1950 = vmatprep.subr.bf16.mxu0 %v2170_v55 }
  0xff   :  { %1941 = vmatmul.mubr.msk.bf16.vlgmr.msra.gmra.mxu0 %vm277_vm1, %v2399_v21  ;;  %v1930_v40 = vpop.f32.mrf.mxu1 }
 0x100   :  { %1952 = vmatprep.mubr.msk.bf16.mxu0 %vm2171_vm0, %v2170_v55  ;;  %v239_v43 = vadd.f32 %v1930_v40, %v139_v41 }
 0x101   :  { %v230_v42 = vpop.f32.mrf.mxu1 }
 0x102   :  { %v231_v45 = vadd.f32 %v230_v42, %v139_v41 }
 0x103   :  { %v1931_v44 = vpop.f32.mrf.mxu1 }
 0x104   :  { %v242_v46 = vadd.f32 %v1931_v44, %v139_v41 }
 0x105   :  { %v233_v47 = vpop.f32.mrf.mxu1 }
 0x106   :  { %v2482_v48 = vpack.c.bf16 %v242_v46, %v239_v43  ;;  %v234_v49 = vadd.f32 %v233_v47, %v139_v41 }
 0x108   :  { %v2484_v50 = vpack.c.bf16 %v234_v49, %v231_v45  ;;  %1951 = vmatpush3.bf16.msra.mxu0 %v2482_v48 }
 0x109   :  { %1962 = vmatprep.subr.bf16.mxu0 %v2170_v55 }
 0x10a   :  { %1945 = vmatpush3.bf16.msra.mxu1 %v2484_v50 }
 0x10b   :  { %1956 = vmatprep.subr.bf16.mxu1 %v2170_v55 }
 0x1b7   :  { %v318_v54 = vpop.f32.mrf.mxu0 }
 0x1b8   :  { %v372_v61 = vmul.f32 0.17677669, %v318_v54 }
 0x1b9   :  { %v1936_v62 = vpop.f32.mrf.mxu0 }
 0x1ba   :  { %v388_v0 = vadd.f32 %v2462_v59, %v372_v61 }
 0x1bb   :  { %v321_v2 = vpop.f32.mrf.mxu0 }
 0x1bc   :  { %v373_v4 = vmul.f32 0.17677669, %v321_v2  ;;  %v393_v5 = vsel %vm392_vm2, %v388_v0, -inf }
 0x1bd   :  { %394 = vmax.xlane.f32.xlu0 %v393_v5  ;;  %v1937_v7 = vpop.f32.mrf.mxu0 }
 0x1be   :  { %v389_v9 = vadd.f32 %v2462_v59, %v373_v4 }
 0x1bf   :  { %v365_v10 = vpop.f32.mrf.mxu0 }
 0x1c0   :  { %v374_v11 = vmul.f32 0.17677669, %v365_v10  ;;  %v396_v12 = vsel %vm392_vm2, %v389_v9, -inf }
 0x1c1   :  { %397 = vmax.xlane.f32.xlu0 %v396_v12  ;;  %v1942_v13 = vpop.f32.mrf.mxu0 }
 0x1c2   :  { %v390_v14 = vadd.f32 %v2467_v8, %v374_v11 }
 0x1c3   :  { %v368_v15 = vpop.f32.mrf.mxu0 }
 0x1c4   :  { %v375_v18 = vmul.f32 0.17677669, %v368_v15  ;;  %v399_v19 = vsel %vm392_vm2, %v390_v14, -inf }
 0x1c5   :  { %400 = vmax.xlane.f32.xlu1 %v399_v19  ;;  %v1943_v20 = vpop.f32.mrf.mxu0 }
 0x1c6   :  { %v391_v22 = vadd.f32 %v2467_v8, %v375_v18 }
 0x1c8   :  { %v402_v23 = vsel %vm392_vm2, %v391_v22, -inf }
 0x1c9   :  { %403 = vmax.xlane.f32.xlu1 %v402_v23 }
 0x246   :  { %v395_v24 = vpop.xlane.xlu0 %394 }
 0x247   :  { %v405_v25 = vsub.f32 %v388_v0, %v395_v24 }
 0x249   :  { %v409_v26 = vmul.f32 1.442695, %v405_v25 }
 0x24a   :  { %v398_v27 = vpop.xlane.xlu0 %397 }
 0x24b   :  { %2085 = vpow2.f32 %v409_v26  ;;  %v406_v28 = vsub.f32 %v389_v9, %v398_v27 }
 0x24d   :  { %v411_v29 = vmul.f32 1.442695, %v406_v28 }
 0x24e   :  { %v401_v30 = vpop.xlane.xlu1 %400 }
 0x24f   :  { %2087 = vpow2.f32 %v411_v29  ;;  %v407_v31 = vsub.f32 %v390_v14, %v401_v30 }
 0x251   :  { %v413_v32 = vmul.f32 1.442695, %v407_v31 }
 0x252   :  { %v404_v60 = vpop.xlane.xlu1 %403 }
 0x253   :  { %2089 = vpow2.f32 %v413_v32  ;;  %v408_v51 = vsub.f32 %v391_v22, %v404_v60 }
 0x255   :  { %v415_v52 = vmul.f32 1.442695, %v408_v51 }
 0x257   :  { %2091 = vpow2.f32 %v415_v52 }
 0x258   :  { %v2086_v33 = vpop.eup %2085 }
 0x259   :  { %v417_v34 = vsel %vm392_vm2, %v2086_v33, 0.0 }
 0x25a   :  { %418 = vadd.xlane.f32.xlu0 %v417_v34 }
 0x25c   :  { %v2088_v35 = vpop.eup %2087 }
 0x25d   :  { %v420_v36 = vsel %vm392_vm2, %v2088_v35, 0.0 }
 0x25e   :  { %421 = vadd.xlane.f32.xlu1 %v420_v36 }
 0x260   :  { %v2090_v37 = vpop.eup %2089 }
 0x261   :  { %v423_v38 = vsel %vm392_vm2, %v2090_v37, 0.0 }
 0x262   :  { %424 = vadd.xlane.f32.xlu0 %v423_v38 }
 0x264   :  { %v2092_v53 = vpop.eup %2091 }
 0x265   :  { %v426_v56 = vsel %vm392_vm2, %v2092_v53, 0.0 }
 0x26f   :  { %586 = vrot.lane.b32.xlu1 %v2390_v17, %s2173_s1 }
 0x278   :  { %533 = vrot.lane.b32.xlu0 %v2381_v6, %s2173_s1 }
 0x293   :  { %427 = vadd.xlane.f32.xlu1 %v426_v56 }
 0x2a4   :  { %530 = vrot.lane.b32.xlu1 %v2388_v16, %s2173_s1 }
 0x2a8   :  { %583 = vrot.lane.b32.xlu1 %v2399_v21, %s2173_s1 }
 0x2e3   :  { %v419_v54 = vpop.xlane.xlu0 %418 }
 0x2e4   :  { %2093 = vrcp.f32 %v419_v54 }
 0x2e7   :  { %v422_v61 = vpop.xlane.xlu1 %421 }
 0x2e8   :  { %2095 = vrcp.f32 %v422_v61 }
 0x2eb   :  { %v425_v62 = vpop.xlane.xlu0 %424  ;;  %v587_v10 = vpop.permute.xlu1 %586 }
 0x2ec   :  { %2097 = vrcp.f32 %v425_v62  ;;  %v592_v20 = vsel %vm277_vm1, %v587_v10, 0 }
 0x2ef   :  { %v534_v5 = vpop.permute.xlu0 %533 }
 0x2f0   :  { %v539_v9 = vsel %vm277_vm1, %v534_v5, 0 }
 0x2f1   :  { %v2094_v63 = vpop.eup %2093 }
 0x2f2   :  { %v433_v2 = vmul.f32 %v2094_v63, %v2086_v33 }
 0x2f5   :  { %v2096_v0 = vpop.eup %2095 }
 0x2f6   :  { %v434_v4 = vmul.f32 %v2096_v0, %v2088_v35 }
 0x2f8   :  { %v437_v7 = vpack.c.bf16 %v434_v4, %v433_v2 }
 0x2f9   :  { %v2098_v13 = vpop.eup %2097 }
 0x2fa   :  { %1947 = vmatmul.mubr.msk.bf16.vlgmr.msra.gmra.mxu1 %vm392_vm2, %v437_v7  ;;  %v435_v15 = vmul.f32 %v2098_v13, %v2090_v37 }
 0x2fb   :  { %1957 = vmatpush3.bf16.xpose.msra.mxu1 %v539_v9  ;;  %1958 = vmatprep.mubr.msk.bf16.mxu1 %vm2171_vm0, %v2170_v55 }
 0x2fc   :  { %1968 = vmatprep.subr.bf16.mxu1 %v2170_v55 }
 0x31c   :  { %v428_v11 = vpop.xlane.xlu1 %427 }
 0x31d   :  { %2099 = vrcp.f32 %v428_v11 }
 0x320   :  { %v531_v12 = vpop.permute.xlu1 %530 }
 0x321   :  { %1959 = vmatmul.mubr.msk.bf16.vlgmr.msra.gmra.mxu1 %vm277_vm1, %v531_v12 }
 0x322   :  { %1970 = vmatprep.mubr.msk.bf16.mxu1 %vm2171_vm0, %v2170_v55 }
 0x324   :  { %v584_v22 = vpop.permute.xlu1 %583 }
 0x32a   :  { %v2100_v14 = vpop.eup %2099 }
 0x32b   :  { %v436_v18 = vmul.f32 %v2100_v14, %v2092_v53 }
 0x32d   :  { %v438_v19 = vpack.c.bf16 %v436_v18, %v435_v15 }
 0x32f   :  { %1953 = vmatmul.mubr.msk.bf16.vlgmr.msra.gmra.mxu0 %vm392_vm2, %v438_v19 }
 0x330   :  { %1963 = vmatpush3.bf16.xpose.msra.mxu0 %v592_v20  ;;  %1964 = vmatprep.mubr.msk.bf16.mxu0 %vm2171_vm0, %v2170_v55 }
 0x331   :  { %1974 = vmatprep.subr.bf16.mxu0 %v2170_v55 }
 0x337   :  { %1965 = vmatmul.mubr.msk.bf16.vlgmr.msra.gmra.mxu0 %vm277_vm1, %v584_v22 }
 0x338   :  { %1976 = vmatprep.mubr.msk.bf16.mxu0 %vm2171_vm0, %v2170_v55 }
 0x3ba   :  { %v2513_v23 = vpop.f32.mrf.mxu1 }
 0x3bc   :  { %v1948_v24 = vpop.f32.mrf.mxu1 }
 0x3be   :  { %v2515_v25 = vpop.f32.mrf.mxu1 }
 0x3c0   :  { %v1949_v26 = vpop.f32.mrf.mxu1 }
 0x3e1   :  { %v575_v27 = vpop.f32.mrf.mxu1 }
 0x3e2   :  { %v635_v28 = vmul.f32 0.17677669, %v575_v27 }
 0x3e3   :  { %v1960_v29 = vpop.f32.mrf.mxu1 }
 0x3e4   :  { %v639_v30 = vadd.f32 %v635_v28, %v2462_v59 }
 0x3e5   :  { %v578_v31 = vpop.f32.mrf.mxu1 }
 0x3e6   :  { %v636_v32 = vmul.f32 0.17677669, %v578_v31  ;;  %v643_v33 = vsel %vm392_vm2, %v639_v30, -inf }
 0x3e7   :  { %644 = vmax.xlane.f32.xlu0 %v643_v33  ;;  %v1961_v34 = vpop.f32.mrf.mxu1 }
 0x3e8   :  { %v640_v35 = vadd.f32 %v636_v32, %v2462_v59 }
 0x3ea   :  { %v646_v36 = vsel %vm392_vm2, %v640_v35, -inf }
 0x3eb   :  { %647 = vmax.xlane.f32.xlu1 %v646_v36 }
 0x3ef   :  { %v2521_v37 = vpop.f32.mrf.mxu0 }
 0x3f1   :  { %v1954_v38 = vpop.f32.mrf.mxu0 }
 0x3f3   :  { %v2523_v39 = vpop.f32.mrf.mxu0 }
 0x3f5   :  { %v1955_v40 = vpop.f32.mrf.mxu0 }
 0x3f7   :  { %v628_v41 = vpop.f32.mrf.mxu0 }
 0x3f8   :  { %v637_v42 = vmul.f32 0.17677669, %v628_v41 }
 0x3f9   :  { %v1966_v43 = vpop.f32.mrf.mxu0 }
 0x3fa   :  { %v641_v44 = vadd.f32 %v637_v42, %v2467_v8 }
 0x3fb   :  { %v631_v45 = vpop.f32.mrf.mxu0 }
 0x3fc   :  { %v638_v46 = vmul.f32 0.17677669, %v631_v45  ;;  %v649_v47 = vsel %vm392_vm2, %v641_v44, -inf }
 0x3fd   :  { %650 = vmax.xlane.f32.xlu0 %v649_v47  ;;  %v1967_v49 = vpop.f32.mrf.mxu0 }
 0x3fe   :  { %v642_v60 = vadd.f32 %v638_v46, %v2467_v8 }
 0x400   :  { %v652_v51 = vsel %vm392_vm2, %v642_v60, -inf }
 0x401   :  { %653 = vmax.xlane.f32.xlu0 %v652_v51 }
 0x470   :  { %v645_v52 = vpop.xlane.xlu0 %644 }
 0x471   :  { %v655_v53 = vsub.f32 %v639_v30, %v645_v52 }
 0x473   :  { %v659_v56 = vmul.f32 1.442695, %v655_v53 }
 0x474   :  { %v648_v54 = vpop.xlane.xlu1 %647 }
 0x475   :  { %2101 = vpow2.f32 %v659_v56  ;;  %v656_v61 = vsub.f32 %v640_v35, %v648_v54 }
 0x477   :  { %v661_v62 = vmul.f32 1.442695, %v656_v61 }
 0x479   :  { %2103 = vpow2.f32 %v661_v62 }
 0x482   :  { %v2102_v63 = vpop.eup %2101 }
 0x483   :  { %v667_v0 = vsel %vm392_vm2, %v2102_v63, 0.0 }
 0x484   :  { %668 = vadd.xlane.f32.xlu0 %v667_v0 }
 0x486   :  { %v2104_v2 = vpop.eup %2103  ;;  %v651_v4 = vpop.xlane.xlu0 %650 }
 0x487   :  { %v657_v5 = vsub.f32 %v641_v44, %v651_v4  ;;  %v670_v7 = vsel %vm392_vm2, %v2104_v2, 0.0 }
 0x488   :  { %671 = vadd.xlane.f32.xlu1 %v670_v7 }
 0x489   :  { %v663_v9 = vmul.f32 1.442695, %v657_v5 }
 0x48a   :  { %v654_v12 = vpop.xlane.xlu0 %653 }
 0x48b   :  { %2105 = vpow2.f32 %v663_v9  ;;  %v658_v13 = vsub.f32 %v642_v60, %v654_v12 }
 0x48d   :  { %v665_v14 = vmul.f32 1.442695, %v658_v13 }
 0x48f   :  { %2107 = vpow2.f32 %v665_v14 }
 0x498   :  { %v2106_v10 = vpop.eup %2105 }
 0x499   :  { %738 = vrot.lane.b32.xlu1 %v2482_v48, %s2173_s1  ;;  %v673_v11 = vsel %vm392_vm2, %v2106_v10, 0.0 }
 0x49a   :  { %674 = vadd.xlane.f32.xlu0 %v673_v11 }
 0x49c   :  { %v2108_v15 = vpop.eup %2107 }
 0x49d   :  { %787 = vrot.lane.b32.xlu1 %v2381_v6, %s2174_s22  ;;  %v676_v18 = vsel %vm392_vm2, %v2108_v15, 0.0 }
 0x4b0   :  { %690 = vrot.lane.b32.xlu0 %v2484_v50, %s2173_s1 }
 0x4b4   :  { %785 = vrot.lane.b32.xlu0 %v2388_v16, %s2174_s22 }
 0x4c1   :  { %677 = vadd.xlane.f32.xlu1 %v676_v18 }
 0x4d2   :  { %838 = vrot.lane.b32.xlu1 %v2390_v17, %s2174_s22 }
 0x4d6   :  { %836 = vrot.lane.b32.xlu1 %v2399_v21, %s2174_s22 }
 0x50d   :  { %v669_v20 = vpop.xlane.xlu0 %668 }
 0x511   :  { %v672_v19 = vpop.xlane.xlu1 %671 }
 0x512   :  { %2109 = vrcp.f32 %v672_v19 }
 0x513   :  { %2111 = vrcp.f32 %v669_v20 }
 0x515   :  { %v739_v22 = vpop.permute.xlu1 %738 }
 0x516   :  { %1975 = vmatpush3.bf16.msra.mxu0 %v739_v22 }
 0x517   :  { %1986 = vmatprep.subr.bf16.mxu0 %v2170_v55 }
 0x519   :  { %v788_v31 = vpop.permute.xlu1 %787 }
 0x51a   :  { %v793_v33 = vsel %vm277_vm1, %v788_v31, 0 }
 0x51f   :  { %v2110_v24 = vpop.eup %2109 }
 0x520   :  { %v2112_v27 = vpop.eup %2111  ;;  %v684_v28 = vmul.f32 %v2110_v24, %v2104_v2 }
 0x521   :  { %v683_v30 = vmul.f32 %v2112_v27, %v2102_v63 }
 0x523   :  { %v675_v26 = vpop.xlane.xlu0 %674  ;;  %v687_v32 = vpack.c.bf16 %v684_v28, %v683_v30 }
 0x524   :  { %2113 = vrcp.f32 %v675_v26 }
 0x527   :  { %v691_v29 = vpop.permute.xlu0 %690 }
 0x528   :  { %1969 = vmatpush3.bf16.msra.mxu1 %v691_v29 }
 0x529   :  { %1980 = vmatprep.subr.bf16.mxu1 %v2170_v55 }
 0x52b   :  { %1971 = vmatmul.mubr.msk.bf16.vlgmr.msra.gmra.mxu1 %vm392_vm2, %v687_v32  ;;  %v786_v34 = vpop.permute.xlu0 %785 }
 0x52c   :  { %1981 = vmatpush3.bf16.xpose.msra.mxu1 %v793_v33  ;;  %1982 = vmatprep.mubr.msk.bf16.mxu1 %vm2171_vm0, %v2170_v55 }
 0x52d   :  { %1992 = vmatprep.subr.bf16.mxu1 %v2170_v55 }
 0x531   :  { %v2114_v36 = vpop.eup %2113 }
 0x532   :  { %v685_v40 = vmul.f32 %v2114_v36, %v2106_v10 }
 0x533   :  { %1983 = vmatmul.mubr.msk.bf16.vlgmr.msra.gmra.mxu1 %vm277_vm1, %v786_v34 }
 0x534   :  { %1994 = vmatprep.mubr.msk.bf16.mxu1 %vm2171_vm0, %v2170_v55 }
 0x54a   :  { %v678_v35 = vpop.xlane.xlu1 %677 }
 0x54b   :  { %2115 = vrcp.f32 %v678_v35 }
 0x54e   :  { %v839_v42 = vpop.permute.xlu1 %838 }
 0x54f   :  { %v844_v44 = vsel %vm277_vm1, %v839_v42, 0 }
 0x552   :  { %v837_v45 = vpop.permute.xlu1 %836 }
 0x558   :  { %v2116_v38 = vpop.eup %2115 }
 0x559   :  { %v686_v41 = vmul.f32 %v2116_v38, %v2108_v15 }
 0x55b   :  { %v688_v43 = vpack.c.bf16 %v686_v41, %v685_v40 }
 0x55d   :  { %1977 = vmatmul.mubr.msk.bf16.vlgmr.msra.gmra.mxu0 %vm392_vm2, %v688_v43 }
 0x55e   :  { %1987 = vmatpush3.bf16.xpose.msra.mxu0 %v844_v44  ;;  %1988 = vmatprep.mubr.msk.bf16.mxu0 %vm2171_vm0, %v2170_v55 }
 0x55f   :  { %1998 = vmatprep.subr.bf16.mxu0 %v2170_v55 }
 0x565   :  { %1989 = vmatmul.mubr.msk.bf16.vlgmr.msra.gmra.mxu0 %vm277_vm1, %v837_v45 }
 0x566   :  { %2000 = vmatprep.mubr.msk.bf16.mxu0 %vm2171_vm0, %v2170_v55 }
 0x5eb   :  { %v2563_v46 = vpop.f32.mrf.mxu1 }
 0x5ed   :  { %v1972_v47 = vpop.f32.mrf.mxu1 }
 0x5ef   :  { %v2565_v49 = vpop.f32.mrf.mxu1 }
 0x5f0   :  { %v2055_v60 = vpack.i.bf16 %v2565_v49, %v2563_v46 }
 0x5f1   :  { %v1973_v51 = vpop.f32.mrf.mxu1 }
 0x5f3   :  { %v829_v52 = vpop.f32.mrf.mxu1 }
 0x5f4   :  { %v887_v53 = vmul.f32 0.17677669, %v829_v52 }
 0x5f5   :  { %v1984_v56 = vpop.f32.mrf.mxu1 }
 0x5f6   :  { %v891_v54 = vadd.f32 %v887_v53, %v2462_v59 }
 0x5f7   :  { %v832_v61 = vpop.f32.mrf.mxu1 }
 0x5f8   :  { %v888_v62 = vmul.f32 0.17677669, %v832_v61  ;;  %v895_v63 = vsel %vm392_vm2, %v891_v54, -inf }
 0x5f9   :  { %896 = vmax.xlane.f32.xlu0 %v895_v63  ;;  %v1985_v0 = vpop.f32.mrf.mxu1 }
 0x5fa   :  { %v892_v2 = vadd.f32 %v888_v62, %v2462_v59 }
 0x5fc   :  { %v898_v4 = vsel %vm392_vm2, %v892_v2, -inf }
 0x5fd   :  { %899 = vmax.xlane.f32.xlu1 %v898_v4 }
 0x61d   :  { %v2573_v5 = vpop.f32.mrf.mxu0 }
 0x61f   :  { %v1978_v7 = vpop.f32.mrf.mxu0 }
 0x621   :  { %v2575_v9 = vpop.f32.mrf.mxu0 }
 0x622   :  { %v2060_v10 = vpack.i.bf16 %v2575_v9, %v2573_v5 }
 0x623   :  { %v1979_v11 = vpop.f32.mrf.mxu0 }
 0x625   :  { %v880_v12 = vpop.f32.mrf.mxu0 }
 0x626   :  { %v889_v13 = vmul.f32 0.17677669, %v880_v12 }
 0x627   :  { %v1990_v14 = vpop.f32.mrf.mxu0 }
 0x628   :  { %v893_v15 = vadd.f32 %v889_v13, %v2467_v8 }
 0x629   :  { %v883_v18 = vpop.f32.mrf.mxu0 }
 0x62a   :  { %v890_v19 = vmul.f32 0.17677669, %v883_v18  ;;  %v901_v20 = vsel %vm392_vm2, %v893_v15, -inf }
 0x62b   :  { %902 = vmax.xlane.f32.xlu0 %v901_v20  ;;  %v1991_v22 = vpop.f32.mrf.mxu0 }
 0x62c   :  { %v894_v24 = vadd.f32 %v890_v19, %v2467_v8 }
 0x62e   :  { %v904_v26 = vsel %vm392_vm2, %v894_v24, -inf }
 0x62f   :  { %905 = vmax.xlane.f32.xlu0 %v904_v26 }
 0x682   :  { %v897_v27 = vpop.xlane.xlu0 %896 }
 0x683   :  { %v907_v28 = vsub.f32 %v891_v54, %v897_v27 }
 0x685   :  { %v911_v29 = vmul.f32 1.442695, %v907_v28 }
 0x686   :  { %v900_v30 = vpop.xlane.xlu1 %899 }
 0x687   :  { %2117 = vpow2.f32 %v911_v29  ;;  %v908_v31 = vsub.f32 %v892_v2, %v900_v30 }
 0x689   :  { %v913_v32 = vmul.f32 1.442695, %v908_v31 }
 0x68b   :  { %2119 = vpow2.f32 %v913_v32 }
 0x694   :  { %v2118_v33 = vpop.eup %2117 }
 0x695   :  { %v919_v34 = vsel %vm392_vm2, %v2118_v33, 0.0 }
 0x696   :  { %920 = vadd.xlane.f32.xlu0 %v919_v34 }
 0x698   :  { %v2120_v35 = vpop.eup %2119 }
 0x699   :  { %v922_v36 = vsel %vm392_vm2, %v2120_v35, 0.0 }
 0x69a   :  { %923 = vadd.xlane.f32.xlu1 %v922_v36 }
 0x6ab   :  { %988 = vrot.lane.b32.xlu1 %v2482_v48, %s2174_s22 }
 0x6af   :  { %1037 = vrot.lane.b32.xlu1 %v2381_v6, %s2175_s3 }
 0x6b4   :  { %v903_v38 = vpop.xlane.xlu0 %902 }
 0x6b5   :  { %v909_v40 = vsub.f32 %v893_v15, %v903_v38 }
 0x6b7   :  { %v915_v41 = vmul.f32 1.442695, %v909_v40 }
 0x6b8   :  { %v906_v42 = vpop.xlane.xlu0 %905 }
 0x6b9   :  { %2121 = vpow2.f32 %v915_v41  ;;  %v910_v43 = vsub.f32 %v894_v24, %v906_v42 }
 0x6bb   :  { %v917_v44 = vmul.f32 1.442695, %v910_v43 }
 0x6bd   :  { %2123 = vpow2.f32 %v917_v44 }
 0x6c6   :  { %v2122_v45 = vpop.eup %2121 }
 0x6c7   :  { %v925_v47 = vsel %vm392_vm2, %v2122_v45, 0.0 }
 0x6c8   :  { %926 = vadd.xlane.f32.xlu0 %v925_v47 }
 0x6ca   :  { %v2124_v51 = vpop.eup %2123 }
 0x6cb   :  { %v928_v52 = vsel %vm392_vm2, %v2124_v51, 0.0 }
 0x6d3   :  { %929 = vadd.xlane.f32.xlu1 %v928_v52 }
 0x6de   :  { %941 = vrot.lane.b32.xlu0 %v2484_v50, %s2174_s22 }
 0x6e2   :  { %1035 = vrot.lane.b32.xlu0 %v2388_v16, %s2175_s3 }
 0x6e4   :  { %1088 = vrot.lane.b32.xlu1 %v2390_v17, %s2175_s3 }
 0x6e8   :  { %1086 = vrot.lane.b32.xlu1 %v2399_v21, %s2175_s3 }
 0x71f   :  { %v921_v56 = vpop.xlane.xlu0 %920 }
 0x723   :  { %v924_v6 = vpop.xlane.xlu1 %923 }
 0x724   :  { %2125 = vrcp.f32 %v924_v6 }
 0x725   :  { %2127 = vrcp.f32 %v921_v56 }
 0x727   :  { %v989_v53 = vpop.permute.xlu1 %988 }
 0x728   :  { %1999 = vmatpush3.bf16.msra.mxu0 %v989_v53 }
 0x729   :  { %2010 = vmatprep.subr.bf16.mxu0 %v2170_v55 }
 0x72b   :  { %v1038_v2 = vpop.permute.xlu1 %1037 }
 0x72c   :  { %v1043_v21 = vsel %vm277_vm1, %v1038_v2, 0 }
 0x731   :  { %v2126_v54 = vpop.eup %2125 }
 0x732   :  { %v2128_v62 = vpop.eup %2127  ;;  %v936_v63 = vmul.f32 %v2126_v54, %v2120_v35 }
 0x733   :  { %v935_v16 = vmul.f32 %v2128_v62, %v2118_v33 }
 0x735   :  { %v939_v17 = vpack.c.bf16 %v936_v63, %v935_v16 }
 0x751   :  { %v927_v61 = vpop.xlane.xlu0 %926 }
 0x752   :  { %2129 = vrcp.f32 %v927_v61 }
 0x755   :  { %v942_v0 = vpop.permute.xlu0 %941 }
 0x756   :  { %1993 = vmatpush3.bf16.msra.mxu1 %v942_v0 }
 0x757   :  { %2004 = vmatprep.subr.bf16.mxu1 %v2170_v55 }
 0x759   :  { %1995 = vmatmul.mubr.msk.bf16.vlgmr.msra.gmra.mxu1 %vm392_vm2, %v939_v17  ;;  %v1036_v7 = vpop.permute.xlu0 %1035 }
 0x75a   :  { %2005 = vmatpush3.bf16.xpose.msra.mxu1 %v1043_v21  ;;  %2006 = vmatprep.mubr.msk.bf16.mxu1 %vm2171_vm0, %v2170_v55 }
 0x75b   :  { %2016 = vmatprep.subr.bf16.mxu1 %v2170_v55 }
 0x75c   :  { %v930_v4 = vpop.xlane.xlu1 %929 }
 0x75d   :  { %2131 = vrcp.f32 %v930_v4 }
 0x75f   :  { %v2130_v11 = vpop.eup %2129 }
 0x760   :  { %v937_v13 = vmul.f32 %v2130_v11, %v2122_v45  ;;  %v1089_v15 = vpop.permute.xlu1 %1088 }
 0x761   :  { %2007 = vmatmul.mubr.msk.bf16.vlgmr.msra.gmra.mxu1 %vm277_vm1, %v1036_v7  ;;  %v1094_v19 = vsel %vm277_vm1, %v1089_v15, 0 }
 0x762   :  { %2018 = vmatprep.mubr.msk.bf16.mxu1 %vm2171_vm0, %v2170_v55 }
 0x764   :  { %v1087_v20 = vpop.permute.xlu1 %1086 }
 0x76a   :  { %v2132_v12 = vpop.eup %2131 }
 0x76b   :  { %v938_v14 = vmul.f32 %v2132_v12, %v2124_v51 }
 0x76d   :  { %v940_v18 = vpack.c.bf16 %v938_v14, %v937_v13 }
 0x76f   :  { %2001 = vmatmul.mubr.msk.bf16.vlgmr.msra.gmra.mxu0 %vm392_vm2, %v940_v18 }
 0x770   :  { %2011 = vmatpush3.bf16.xpose.msra.mxu0 %v1094_v19  ;;  %2012 = vmatprep.mubr.msk.bf16.mxu0 %vm2171_vm0, %v2170_v55 }
 0x771   :  { %2022 = vmatprep.subr.bf16.mxu0 %v2170_v55 }
 0x777   :  { %2013 = vmatmul.mubr.msk.bf16.vlgmr.msra.gmra.mxu0 %vm277_vm1, %v1087_v20 }
 0x778   :  { %2024 = vmatprep.mubr.msk.bf16.mxu0 %vm2171_vm0, %v2170_v55 }
 0x819   :  { %v2617_v22 = vpop.f32.mrf.mxu1 }
 0x81b   :  { %v1996_v24 = vpop.f32.mrf.mxu1 }
 0x81d   :  { %v2619_v26 = vpop.f32.mrf.mxu1 }
 0x81e   :  { %v2065_v27 = vpack.i.bf16 %v2619_v26, %v2617_v22 }
 0x81f   :  { %v1997_v28 = vpop.f32.mrf.mxu1 }
 0x821   :  { %v1079_v29 = vpop.f32.mrf.mxu1 }
 0x822   :  { %v1137_v30 = vmul.f32 0.17677669, %v1079_v29 }
 0x823   :  { %v2008_v31 = vpop.f32.mrf.mxu1 }
 0x824   :  { %v1141_v32 = vadd.f32 %v1137_v30, %v2462_v59 }
 0x825   :  { %v1082_v33 = vpop.f32.mrf.mxu1 }
 0x826   :  { %v1138_v34 = vmul.f32 0.17677669, %v1082_v33  ;;  %v1145_v35 = vsel %vm392_vm2, %v1141_v32, -inf }
 0x827   :  { %1146 = vmax.xlane.f32.xlu0 %v1145_v35  ;;  %v2009_v55 = vpop.f32.mrf.mxu1  ;;  %v1362_v35 = vld [vmem:[%s2999_s4 + $0x78] sm:$0xff] }
 0x828   :  { %v1142_v36 = vadd.f32 %v1138_v34, %v2462_v59  ;;  %v1361_v34 = vld [vmem:[%s2999_s4 + $0x70] sm:$0xff]  ;;  %v1359_v55 = vld [vmem:[%s2999_s4 + $0x60] sm:$0xff] }
 0x82a   :  { %v1148_v38 = vsel %vm392_vm2, %v1142_v36, -inf }
 0x82b   :  { %1149 = vmax.xlane.f32.xlu1 %v1148_v38  ;;  %v1360_v38 = vld [vmem:[%s2999_s4 + $0x68] sm:$0xff] }
 0x82f   :  { %v1028_v40 = vpop.f32.mrf.mxu0 }
 0x831   :  { %v2002_v41 = vpop.f32.mrf.mxu0 }
 0x832   :  { %v1357_v41 = vld [vmem:[%s2999_s4 + $0x50] sm:$0xff] }
 0x833   :  { %v1031_v42 = vpop.f32.mrf.mxu0 }
 0x834   :  { %v2070_v43 = vpack.i.bf16 %v1031_v42, %v1028_v40  ;;  %v1371_v40 = vpack.c.bf16 %v1360_v38, %v1359_v55  ;;  %v1358_v42 = vld [vmem:[%s2999_s4 + $0x58] sm:$0xff] }
 0x835   :  { %v2003_v44 = vpop.f32.mrf.mxu0 }
 0x836   :  { %v1355_v44 = vld [vmem:[%s2999_s4 + $0x40] sm:$0xff] }
 0x837   :  { %v1130_v45 = vpop.f32.mrf.mxu0 }
 0x838   :  { %v1139_v47 = vmul.f32 0.17677669, %v1130_v45  ;;  %v1356_v45 = vld [vmem:[%s2999_s4 + $0x48] sm:$0xff] }
 0x839   :  { %v2014_v51 = vpop.f32.mrf.mxu0 }
 0x83a   :  { %v1143_v52 = vadd.f32 %v1139_v47, %v2467_v8  ;;  %v1369_v47 = vpack.c.bf16 %v1356_v45, %v1355_v44  ;;  %v1353_v51 = vld [vmem:[%s2999_s4 + $0x30] sm:$0xff] }
 0x83b   :  { %v1133_v6 = vpop.f32.mrf.mxu0 }
 0x83c   :  { %v1140_v53 = vmul.f32 0.17677669, %v1133_v6  ;;  %v1151_v56 = vsel %vm392_vm2, %v1143_v52, -inf }
 0x83d   :  { %1152 = vmax.xlane.f32.xlu0 %v1151_v56  ;;  %v2015_v54 = vpop.f32.mrf.mxu0  ;;  %v1352_v56 = vld [vmem:[%s2999_s4 + $0x28] sm:$0xff] }
 0x83e   :  { %v1144_v59 = vadd.f32 %v1140_v53, %v2467_v8  ;;  %v1351_v53 = vld [vmem:[%s2999_s4 + $0x20] sm:$0xff]  ;;  %v1349_v54 = vld [vmem:[%s2999_s4 + $0x10] sm:$0xff] }
 0x840   :  { %v1154_v61 = vsel %vm392_vm2, %v1144_v59, -inf }
 0x841   :  { %1155 = vmax.xlane.f32.xlu0 %v1154_v61  ;;  %v1367_v61 = vpack.c.bf16 %v1352_v56, %v1351_v53 }
 0x8b0   :  { %v1147_v62 = vpop.xlane.xlu0 %1146 }
 0x8b1   :  { %v1157_v63 = vsub.f32 %v1141_v32, %v1147_v62  ;;  %v1350_v62 = vld [vmem:[%s2999_s4 + $0x18] sm:$0xff] }
 0x8b3   :  { %v1161_v0 = vmul.f32 1.442695, %v1157_v63  ;;  %v1366_v63 = vpack.c.bf16 %v1350_v62, %v1349_v54  ;;  %v2166_v54 = vld [vmem:[%s2996_s0 + $0x8] sm:$0xff] }
 0x8b4   :  { %v1150_v16 = vpop.xlane.xlu1 %1149 }
 0x8b5   :  { %2133 = vpow2.f32 %v1161_v0  ;;  %v1158_v2 = vsub.f32 %v1142_v36, %v1150_v16  ;;  %v1372_v36 = vpack.c.bf16 %v1362_v35, %v1361_v34 }
 0x8b7   :  { %v1163_v17 = vmul.f32 1.442695, %v1158_v2 }
 0x8b9   :  { %2135 = vpow2.f32 %v1163_v17 }
 0x8c2   :  { %v2134_v21 = vpop.eup %2133 }
 0x8c3   :  { %v1169_v4 = vsel %vm392_vm2, %v2134_v21, 0.0 }
 0x8c4   :  { %1170 = vadd.xlane.f32.xlu0 %v1169_v4  ;;  %v1348_v4 = vld [vmem:[%s2999_s4 + $0x8] sm:$0xff] }
 0x8c6   :  { %v2136_v7 = vpop.eup %2135  ;;  %v1153_v11 = vpop.xlane.xlu0 %1152 }
 0x8c7   :  { %v1159_v12 = vsub.f32 %v1143_v52, %v1153_v11  ;;  %v1172_v8 = vsel %vm392_vm2, %v2136_v7, 0.0  ;;  %v1354_v52 = vld [vmem:[%s2999_s4 + $0x38] sm:$0xff] }
 0x8c8   :  { %1173 = vadd.xlane.f32.xlu1 %v1172_v8  ;;  %v1368_v6 = vpack.c.bf16 %v1354_v52, %v1353_v51  ;;  %v2165_v51 = vld [vmem:[%s2996_s0] sm:$0xff] }
 0x8c9   :  { %v1165_v13 = vmul.f32 1.442695, %v1159_v12 }
 0x8ca   :  { %v1156_v14 = vpop.xlane.xlu0 %1155 }
 0x8cb   :  { %2137 = vpow2.f32 %v1165_v13  ;;  %v1160_v15 = vsub.f32 %v1144_v59, %v1156_v14 }
 0x8cd   :  { %v1167_v18 = vmul.f32 1.442695, %v1160_v15 }
 0x8cf   :  { %2139 = vpow2.f32 %v1167_v18 }
 0x8d8   :  { %v2138_v19 = vpop.eup %2137 }
 0x8d9   :  { %v1175_v20 = vsel %vm392_vm2, %v2138_v19, 0.0 }
 0x8da   :  { %1176 = vadd.xlane.f32.xlu0 %v1175_v20 }
 0x8dc   :  { %v2140_v22 = vpop.eup %2139 }
 0x8dd   :  { %v1178_v24 = vsel %vm392_vm2, %v2140_v22, 0.0 }
 0x8de   :  { %1179 = vadd.xlane.f32.xlu1 %v1178_v24 }
 0x8ef   :  { %1238 = vrot.lane.b32.xlu1 %v2482_v48, %s2175_s3 }
 0x8f0   :  { %1191 = vrot.lane.b32.xlu0 %v2484_v50, %s2175_s3 }
 0x8f3   :  { %2056 = vrot.lane.b32.xlu1 %v2055_v60, %s2175_s3 }
 0x8f4   :  { %2066 = vrot.lane.b32.xlu0 %v2065_v27, %s2174_s22 }
 0x8f7   :  { %2061 = vrot.lane.b32.xlu1 %v2060_v10, %s2175_s3 }
 0x8fb   :  { %2071 = vrot.lane.b32.xlu1 %v2070_v43, %s2174_s22  ;;  %v1370_v43 = vpack.c.bf16 %v1358_v42, %v1357_v41 }
 0x94d   :  { %v1171_v28 = vpop.xlane.xlu0 %1170 }
 0x951   :  { %v1174_v26 = vpop.xlane.xlu1 %1173 }
 0x952   :  { %2141 = vrcp.f32 %v1174_v26 }
 0x953   :  { %2143 = vrcp.f32 %v1171_v28 }
 0x95f   :  { %v2142_v48 = vpop.eup %2141 }
 0x960   :  { %v2144_v29 = vpop.eup %2143  ;;  %v1186_v30 = vmul.f32 %v2142_v48, %v2136_v7 }
 0x961   :  { %v1185_v60 = vmul.f32 %v2144_v29, %v2134_v21  ;;  %v1347_v21 = vld [vmem:[%s2999_s4] sm:$0xff] }
 0x962   :  { %v1365_v7 = vpack.c.bf16 %v1348_v4, %v1347_v21  ;;  %v1530_v4 = vld [vmem:[%s3001_s8 + $0xf0] sm:$0xff] }
 0x963   :  { %v1177_v50 = vpop.xlane.xlu0 %1176  ;;  %v1189_v27 = vpack.c.bf16 %v1186_v30, %v1185_v60 }
 0x964   :  { %2145 = vrcp.f32 %v1177_v50 }
 0x967   :  { %v1180_v46 = vpop.xlane.xlu1 %1179  ;;  %v1192_v49 = vpop.permute.xlu0 %1191 }
 0x968   :  { %2147 = vrcp.f32 %v1180_v46  ;;  %2017 = vmatpush3.bf16.msra.mxu1 %v1192_v49 }
 0x969   :  { %2028 = vmatprep.subr.bf16.mxu1 %v1372_v36 }
 0x96b   :  { %v1239_v31 = vpop.permute.xlu1 %1238  ;;  %2019 = vmatmul.mubr.msk.bf16.vlgmr.msra.gmra.mxu1 %vm392_vm2, %v1189_v27  ;;  %v2067_v20 = vpop.permute.xlu0 %2066 }
 0x96c   :  { %2023 = vmatpush3.bf16.msra.mxu0 %v1239_v31  ;;  %2029 = vmatpush3.bf16.msra.mxu1 %v1372_v36  ;;  %v2069_v26 = vunpack.i.h.bf16 %v2067_v20  ;;  %v2068_v28 = vunpack.i.l.bf16 %v2067_v20 }
 0x96d   :  { %2030 = vmatprep.subr.bf16.mxu1 %v1371_v40 }
 0x96f   :  { %v2057_v15 = vpop.permute.xlu1 %2056 }
 0x970   :  { %2031 = vmatpush3.bf16.msra.mxu1 %v1371_v40  ;;  %v2059_v18 = vunpack.i.h.bf16 %v2057_v15 }
 0x971   :  { %v2146_v5 = vpop.eup %2145  ;;  %2032 = vmatprep.subr.bf16.mxu1 %v1370_v43 }
 0x972   :  { %v1187_v10 = vmul.f32 %v2146_v5, %v2138_v19  ;;  %v2058_v19 = vunpack.i.l.bf16 %v2057_v15 }
 0x973   :  { %v2062_v27 = vpop.permute.xlu1 %2061 }
 0x974   :  { %2033 = vmatpush3.bf16.msra.mxu1 %v1370_v43  ;;  %v1333_v24 = vsel %vm277_vm1, %v2513_v23, %v2058_v19  ;;  %v2064_v23 = vunpack.i.h.bf16 %v2062_v27  ;;  %v2063_v5 = vunpack.i.l.bf16 %v2062_v27  ;;  %v1526_v27 = vld [vmem:[%s3001_s8 + $0xd0] sm:$0xff] }
 0x975   :  { %v2148_v9 = vpop.eup %2147  ;;  %2034 = vmatprep.subr.bf16.mxu1 %v1369_v47  ;;  %v1338_v30 = vsel %vm1337_vm3, %v1333_v24, %v2068_v28 }
 0x976   :  { %v1188_v32 = vmul.f32 %v2148_v9, %v2140_v22  ;;  %v1334_v22 = vsel %vm277_vm1, %v2515_v25, %v2059_v18  ;;  %v1335_v34 = vsel %vm277_vm1, %v2521_v37, %v2063_v5 }
 0x977   :  { %v1339_v46 = vsel %vm1337_vm3, %v1334_v22, %v2069_v26  ;;  %v2072_v31 = vpop.permute.xlu1 %2071 }
 0x978   :  { %v1190_v33 = vpack.c.bf16 %v1188_v32, %v1187_v10  ;;  %2035 = vmatpush3.bf16.msra.mxu1 %v1369_v47  ;;  %v2074_v9 = vunpack.i.h.bf16 %v2072_v31  ;;  %v2073_v10 = vunpack.i.l.bf16 %v2072_v31  ;;  %v1521_v31 = vld [vmem:[%s3001_s8 + $0xa8] sm:$0xff] }
 0x979   :  { %2036 = vmatprep.subr.bf16.mxu1 %v1368_v6 }
 0x97a   :  { %2025 = vmatmul.mubr.msk.bf16.vlgmr.msra.gmra.mxu0 %vm392_vm2, %v1190_v33  ;;  %v1336_v33 = vsel %vm277_vm1, %v2523_v39, %v2064_v23  ;;  %v1340_v36 = vsel %vm1337_vm3, %v1335_v34, %v2073_v10  ;;  %v1826_v39 = vld [vmem:[%s3000_s5] ss:$0 sm:$0xff]  ;;  %v1523_v23 = vld [vmem:[%s3001_s8 + $0xb8] sm:$0xff]  ;;  %v1522_v10 = vld [vmem:[%s3001_s8 + $0xb0] sm:$0xff] }
 0x97b   :  { %1594 = vmatprep.mubr.bf16.mxu0 %v2169_v3  ;;  %v1341_v38 = vsel %vm1337_vm3, %v1336_v33, %v2074_v9  ;;  %v1545_v5 = vpack.c.bf16 %v1523_v23, %v1521_v31  ;;  %v1520_v9 = vld [vmem:[%s3001_s8 + $0xa0] sm:$0xff]  ;;  %v1517_v33 = vld [vmem:[%s3001_s8 + $0x88] sm:$0xff]  ;;  %v1519_v34 = vld [vmem:[%s3001_s8 + $0x98] sm:$0xff] }
 0x97c   :  { %2037 = vmatpush3.bf16.msra.mxu1 %v1368_v6  ;;  %v1631_v23 = vld [vmem:[%s3002_s10 + $0x40] sm:$0xff] }
 0x97d   :  { %2038 = vmatprep.subr.bf16.mxu1 %v1367_v61 }
 0x980   :  { %2039 = vmatpush3.bf16.msra.mxu1 %v1367_v61  ;;  %v2167_v61 = vld [vmem:[%s2996_s0 + $0x10] sm:$0xff] }
 0x981   :  { %2040 = vmatprep.subr.bf16.mxu1 %v1366_v63 }
 0x984   :  { %2041 = vmatpush3.bf16.msra.mxu1 %v1366_v63  ;;  %v2168_v63 = vld [vmem:[%s2996_s0 + $0x18] sm:$0xff] }
 0x985   :  { %2042 = vmatprep.subr.bf16.mxu1 %v1365_v7 }
 0x988   :  { %2043 = vmatpush3.bf16.msra.mxu1 %v1365_v7 }
 0xa2b   :  { %v1231_v59 = vpop.f32.mrf.mxu1 }
 0xa2d   :  { %v2020_v0 = vpop.f32.mrf.mxu1 }
 0xa2f   :  { %v1234_v16 = vpop.f32.mrf.mxu1 }
 0xa30   :  { %v2075_v2 = vpack.i.bf16 %v1234_v16, %v1231_v59  ;;  %v1529_v16 = vld [vmem:[%s3001_s8 + $0xe8] sm:$0xff] }
 0xa31   :  { %v2021_v17 = vpop.f32.mrf.mxu1 }
 0xa32   :  { %2076 = vrot.lane.b32.xlu0 %v2075_v2, %s2173_s1  ;;  %v1531_v2 = vld [vmem:[%s3001_s8 + $0xf8] sm:$0xff]  ;;  %v1528_v17 = vld [vmem:[%s3001_s8 + $0xe0] sm:$0xff] }
 0xa33   :  { %v1549_v21 = vpack.c.bf16 %v1531_v2, %v1529_v16  ;;  %v1548_v7 = vpack.c.bf16 %v1530_v4, %v1528_v17  ;;  %v1500_v2 = vld [vmem:[%s3001_s8] sm:$0xff]  ;;  %v1502_v17 = vld [vmem:[%s3001_s8 + $0x10] sm:$0xff] }
 0xa34   :  { %v1653_v4 = vld [vmem:[%s3002_s10 + $0xf0] sm:$0xff] }
 0xa35   :  { %1562 = vmatprep.subr.bf16.mxu0 %v1549_v21  ;;  %v1534_v21 = vpack.c.bf16 %v1502_v17, %v1500_v2 }
 0xa36   :  { %1563 = vmatpush1.bf16.msra.mxu0 %v1548_v7  ;;  %v1654_v7 = vld [vmem:[%s3002_s10 + $0xf8] sm:$0xff] }
 0xa3a   :  { %v1278_v11 = vpop.f32.mrf.mxu0 }
 0xa3c   :  { %v2026_v12 = vpop.f32.mrf.mxu0 }
 0xa3e   :  { %v1281_v8 = vpop.f32.mrf.mxu0 }
 0xa3f   :  { %v2080_v13 = vpack.i.bf16 %v1281_v8, %v1278_v11 }
 0xa40   :  { %v2027_v14 = vpop.f32.mrf.mxu0 }
 0xa41   :  { %2081 = vrot.lane.b32.xlu1 %v2080_v13, %s2173_s1 }
 0xaa4   :  { %v2077_v48 = vpop.permute.xlu0 %2076 }
 0xaa5   :  { %v2079_v50 = vunpack.i.h.bf16 %v2077_v48  ;;  %v2078_v29 = vunpack.i.l.bf16 %v2077_v48 }
 0xaa7   :  { %v1343_v49 = vsel %vm1342_vm4, %v1338_v30, %v2078_v29  ;;  %v1344_v60 = vsel %vm1342_vm4, %v1339_v46, %v2079_v50  ;;  %v1525_v30 = vld [vmem:[%s3001_s8 + $0xc8] sm:$0xff]  ;;  %v1527_v46 = vld [vmem:[%s3001_s8 + $0xd8] sm:$0xff] }
 0xaa8   :  { %v1363_v25 = vpack.c.bf16 %v1344_v60, %v1343_v49  ;;  %v1547_v49 = vpack.c.bf16 %v1527_v46, %v1525_v30  ;;  %v1524_v60 = vld [vmem:[%s3001_s8 + $0xc0] sm:$0xff]  ;;  %v1633_v46 = vld [vmem:[%s3002_s10 + $0x50] sm:$0xff] }
 0xaaa   :  { %2044 = vmatprep.mubr.bf16.mxu1 %v1363_v25  ;;  %v1546_v25 = vpack.c.bf16 %v1526_v27, %v1524_v60  ;;  %1564 = vmatprep.subr.bf16.mxu0 %v1547_v49  ;;  %v1634_v49 = vld [vmem:[%s3002_s10 + $0x58] sm:$0xff]  ;;  %v1647_v60 = vld [vmem:[%s3002_s10 + $0xc0] sm:$0xff]  ;;  %v1648_v27 = vld [vmem:[%s3002_s10 + $0xc8] sm:$0xff] }
 0xaab   :  { %v1671_v31 = vpack.c.bf16 %v1648_v27, %v1647_v60  ;;  %v1624_v60 = vld [vmem:[%s3002_s10 + $0x8] sm:$0xff] }
 0xaac   :  { %1565 = vmatpush1.bf16.msra.mxu0 %v1546_v25  ;;  %v1664_v25 = vpack.c.bf16 %v1634_v49, %v1633_v46  ;;  %v1623_v49 = vld [vmem:[%s3002_s10] sm:$0xff] }
 0xaad   :  { %1566 = vmatprep.subr.bf16.mxu0 %v1545_v5  ;;  %v1632_v5 = vld [vmem:[%s3002_s10 + $0x48] sm:$0xff]  ;;  %v1659_v27 = vpack.c.bf16 %v1624_v60, %v1623_v49 }
 0xab3   :  { %v2082_v32 = vpop.permute.xlu1 %2081 }
 0xab4   :  { %v2084_v35 = vunpack.i.h.bf16 %v2082_v32  ;;  %v2083_v55 = vunpack.i.l.bf16 %v2082_v32  ;;  %v1544_v32 = vpack.c.bf16 %v1522_v10, %v1520_v9  ;;  %v1645_v9 = vld [vmem:[%s3002_s10 + $0xb0] sm:$0xff]  ;;  %v1646_v10 = vld [vmem:[%s3002_s10 + $0xb8] sm:$0xff] }
 0xab6   :  { %v1346_v40 = vsel %vm1342_vm4, %v1341_v38, %v2084_v35  ;;  %v1345_v41 = vsel %vm1342_vm4, %v1340_v36, %v2083_v55  ;;  %1567 = vmatpush1.bf16.msra.mxu0 %v1544_v32  ;;  %v1543_v35 = vpack.c.bf16 %v1519_v34, %v1517_v33  ;;  %v1516_v55 = vld [vmem:[%s3001_s8 + $0x80] sm:$0xff]  ;;  %v1518_v36 = vld [vmem:[%s3001_s8 + $0x90] sm:$0xff]  ;;  %v1663_v32 = vpack.c.bf16 %v1632_v5, %v1631_v23 }
 0xab7   :  { %v1364_v42 = vpack.c.bf16 %v1346_v40, %v1345_v41  ;;  %v1542_v38 = vpack.c.bf16 %v1518_v36, %v1516_v55  ;;  %v1513_v40 = vld [vmem:[%s3001_s8 + $0x68] sm:$0xff]  ;;  %v1515_v41 = vld [vmem:[%s3001_s8 + $0x78] sm:$0xff]  ;;  %v1670_v33 = vpack.c.bf16 %v1646_v10, %v1645_v9  ;;  %v1629_v34 = vld [vmem:[%s3002_s10 + $0x30] sm:$0xff] }
 0xab8   :  { %1568 = vmatprep.subr.bf16.mxu0 %v1543_v35  ;;  %v1630_v35 = vld [vmem:[%s3002_s10 + $0x38] sm:$0xff] }
 0xab9   :  { %2045 = vmatmul.mubr.bf16.vlgmr.msra.gmra.mxu1 %v1364_v42  ;;  %v1512_v42 = vld [vmem:[%s3001_s8 + $0x60] sm:$0xff]  ;;  %v1662_v55 = vpack.c.bf16 %v1630_v35, %v1629_v34 }
 0xaba   :  { %1569 = vmatpush1.bf16.msra.mxu0 %v1542_v38 }
 0xb79   :  { %v2046_v43 = vpop.f32.mrf.mxu1 }
 0xb7a   :  { %v1423_v47 = vadd.f32 %v2046_v43, %v1826_v39  ;;  %v1541_v43 = vpack.c.bf16 %v1515_v41, %v1513_v40 }
 0xb7b   :  { %v1414_v44 = vpop.f32.mrf.mxu1 }
 0xb7c   :  { %v1415_v45 = vadd.f32 %v1826_v39, %v1414_v44  ;;  %v1431_v62 = vadd.f32 %v2167_v61, %v1423_v47  ;;  %v1509_v44 = vld [vmem:[%s3001_s8 + $0x48] sm:$0xff]  ;;  %1570 = vmatprep.subr.bf16.mxu0 %v1541_v43  ;;  %v1506_v61 = vld [vmem:[%s3001_s8 + $0x30] sm:$0xff] }
 0xb7d   :  { %v2047_v37 = vpop.f32.mrf.mxu1 }
 0xb7e   :  { %v1429_v52 = vadd.f32 %v2165_v51, %v1415_v45  ;;  %v1426_v56 = vadd.f32 %v2047_v37, %v1826_v39  ;;  %v1511_v45 = vld [vmem:[%s3001_s8 + $0x58] sm:$0xff]  ;;  %v1508_v51 = vld [vmem:[%s3001_s8 + $0x40] sm:$0xff] }
 0xb7f   :  { %v1417_v6 = vpop.f32.mrf.mxu1  ;;  %v1539_v47 = vpack.c.bf16 %v1511_v45, %v1509_v44 }
 0xb80   :  { %v1418_v53 = vadd.f32 %v1826_v39, %v1417_v6  ;;  %1435 = vadd.xlane.f32.xlu0 %v1429_v52  ;;  %v1432_v0 = vadd.f32 %v2168_v63, %v1426_v56  ;;  %v1514_v39 = vld [vmem:[%s3001_s8 + $0x70] sm:$0xff]  ;;  %v1505_v6 = vld [vmem:[%s3001_s8 + $0x28] sm:$0xff]  ;;  %v1503_v63 = vld [vmem:[%s3001_s8 + $0x18] sm:$0xff] }
 0xb81   :  { %v1540_v37 = vpack.c.bf16 %v1514_v39, %v1512_v42 }
 0xb82   :  { %v1430_v59 = vadd.f32 %v2166_v54, %v1418_v53  ;;  %v1507_v53 = vld [vmem:[%s3001_s8 + $0x38] sm:$0xff] }
 0xb83   :  { %1571 = vmatpush1.bf16.msra.mxu0 %v1540_v37  ;;  %v1537_v54 = vpack.c.bf16 %v1507_v53, %v1505_v6  ;;  %v1827_v53 = vld [vmem:[%s3003_s6] ss:$0 sm:$0xff] }
 0xb84   :  { %1437 = vadd.xlane.f32.xlu1 %v1430_v59  ;;  %1439 = vadd.xlane.f32.xlu0 %v1431_v62 }
 0xb85   :  { %1572 = vmatprep.subr.bf16.mxu0 %v1539_v47 }
 0xb88   :  { %1441 = vadd.xlane.f32.xlu0 %v1432_v0 }
 0xc09   :  { %v1436_v11 = vpop.xlane.xlu0 %1435 }
 0xc0a   :  { %v1444_v12 = vmul.f32 0.0078125, %v1436_v11  ;;  %v1637_v11 = vld [vmem:[%s3002_s10 + $0x70] sm:$0xff] }
 0xc0c   :  { %v2745_v8 = vsub.f32 %v1429_v52, %v1444_v12  ;;  %v1510_v52 = vld [vmem:[%s3001_s8 + $0x50] sm:$0xff]  ;;  %v1674_v12 = vpack.c.bf16 %v1654_v7, %v1653_v4 }
 0xc0d   :  { %v1438_v13 = vpop.xlane.xlu1 %1437  ;;  %v1440_v14 = vpop.xlane.xlu0 %1439  ;;  %v1538_v56 = vpack.c.bf16 %v1510_v52, %v1508_v51 }
 0xc0e   :  { %v1445_v15 = vmul.f32 0.0078125, %v1438_v13  ;;  %v1446_v18 = vmul.f32 0.0078125, %v1440_v14  ;;  %v1452_v19 = vmul.f32 %v2745_v8, %v2745_v8  ;;  %v1638_v13 = vld [vmem:[%s3002_s10 + $0x78] sm:$0xff]  ;;  %v1651_v14 = vld [vmem:[%s3002_s10 + $0xe0] sm:$0xff]  ;;  %1884 = vmatprep.subr.bf16.mxu1 %v1674_v12 }
 0xc0f   :  { %1573 = vmatpush1.bf16.msra.mxu0 %v1538_v56 }
 0xc10   :  { %v2749_v20 = vsub.f32 %v1430_v59, %v1445_v15  ;;  %v2751_v22 = vsub.f32 %v1431_v62, %v1446_v18  ;;  %1456 = vadd.xlane.f32.xlu0 %v1452_v19  ;;  %v1504_v59 = vld [vmem:[%s3001_s8 + $0x20] sm:$0xff]  ;;  %v1501_v62 = vld [vmem:[%s3001_s8 + $0x8] sm:$0xff]  ;;  %1574 = vmatprep.subr.bf16.mxu0 %v1537_v54  ;;  %v1666_v18 = vpack.c.bf16 %v1638_v13, %v1637_v11 }
 0xc11   :  { %v1442_v24 = vpop.xlane.xlu0 %1441  ;;  %v1535_v16 = vpack.c.bf16 %v1503_v63, %v1501_v62  ;;  %v1652_v15 = vld [vmem:[%s3002_s10 + $0xe8] sm:$0xff]  ;;  %v1828_v62 = vld [vmem:[%s3004_s7] ss:$0 sm:$0xff] }
 0xc12   :  { %v1447_v26 = vmul.f32 0.0078125, %v1442_v24  ;;  %v1453_v28 = vmul.f32 %v2749_v20, %v2749_v20  ;;  %v1454_v48 = vmul.f32 %v2751_v22, %v2751_v22  ;;  %v1673_v19 = vpack.c.bf16 %v1652_v15, %v1651_v14  ;;  %v1635_v24 = vld [vmem:[%s3002_s10 + $0x60] sm:$0xff]  ;;  %1885 = vmatpush3.bf16.msra.mxu1 %v1666_v18  ;;  %v1628_v14 = vld [vmem:[%s3002_s10 + $0x28] sm:$0xff]  ;;  %v1641_v18 = vld [vmem:[%s3002_s10 + $0x90] sm:$0xff] }
 0xc14   :  { %v2757_v50 = vsub.f32 %v1432_v0, %v1447_v26  ;;  %1458 = vadd.xlane.f32.xlu1 %v1453_v28  ;;  %1460 = vadd.xlane.f32.xlu0 %v1454_v48  ;;  %v1536_v0 = vpack.c.bf16 %v1506_v61, %v1504_v59  ;;  %v1636_v26 = vld [vmem:[%s3002_s10 + $0x68] sm:$0xff]  ;;  %v1649_v28 = vld [vmem:[%s3002_s10 + $0xd0] sm:$0xff]  ;;  %v1650_v48 = vld [vmem:[%s3002_s10 + $0xd8] sm:$0xff] }
 0xc15   :  { %1886 = vmatprep.subr.bf16.mxu1 %v1673_v19  ;;  %v1672_v30 = vpack.c.bf16 %v1650_v48, %v1649_v28  ;;  %v1642_v19 = vld [vmem:[%s3002_s10 + $0x98] sm:$0xff] }
 0xc16   :  { %v1455_v29 = vmul.f32 %v2757_v50, %v2757_v50  ;;  %1575 = vmatpush1.bf16.msra.mxu0 %v1536_v0  ;;  %v1626_v28 = vld [vmem:[%s3002_s10 + $0x18] sm:$0xff] }
 0xc17   :  { %1576 = vmatprep.subr.bf16.mxu0 %v1535_v16 }
 0xc18   :  { %1462 = vadd.xlane.f32.xlu1 %v1455_v29  ;;  %v1665_v29 = vpack.c.bf16 %v1636_v26, %v1635_v24  ;;  %v1668_v24 = vpack.c.bf16 %v1642_v19, %v1641_v18  ;;  %v1625_v26 = vld [vmem:[%s3002_s10 + $0x10] sm:$0xff] }
 0xc19   :  { %v1660_v48 = vpack.c.bf16 %v1626_v28, %v1625_v26 }
 0xc1a   :  { %1577 = vmatpush1.bf16.msra.mxu0 %v1534_v21  ;;  %1887 = vmatpush3.bf16.msra.mxu1 %v1665_v29  ;;  %v1639_v29 = vld [vmem:[%s3002_s10 + $0x80] sm:$0xff] }
 0xc1b   :  { %1888 = vmatprep.subr.bf16.mxu1 %v1672_v30  ;;  %v1640_v30 = vld [vmem:[%s3002_s10 + $0x88] sm:$0xff] }
 0xc1c   :  { %v1667_v46 = vpack.c.bf16 %v1640_v30, %v1639_v29 }
 0xc1e   :  { %1889 = vmatpush3.bf16.msra.mxu1 %v1664_v25  ;;  %v1550_v25 = vld [vmem:[%s3005_s9] sm:$0x3] }
 0xc1f   :  { %1890 = vmatprep.subr.bf16.mxu1 %v1671_v31  ;;  %v1559_v23 = vrot.slane %v1550_v25, %v134_v58  ;;  %v1555_v5 = vrot.slane %v1550_v25, %v2379_v1 }
 0xc22   :  { %1891 = vmatpush3.bf16.msra.mxu1 %v1663_v32 }
 0xc23   :  { %1892 = vmatprep.subr.bf16.mxu1 %v1670_v33 }
 0xc26   :  { %1893 = vmatpush3.bf16.msra.mxu1 %v1662_v55 }
 0xc99   :  { %v1457_v36 = vpop.xlane.xlu0 %1456 }
 0xc9a   :  { %v1464_v38 = vmul.f32 0.0078125, %v1457_v36 }
 0xc9c   :  { %v1468_v40 = vadd.f32 1e-05, %v1464_v38 }
 0xc9d   :  { %v1459_v41 = vpop.xlane.xlu1 %1458  ;;  %v1461_v42 = vpop.xlane.xlu0 %1460 }
 0xc9e   :  { %2149 = vrsqrt.f32 %v1468_v40  ;;  %v1465_v43 = vmul.f32 0.0078125, %v1459_v41  ;;  %v1466_v39 = vmul.f32 0.0078125, %v1461_v42 }
 0xca0   :  { %v1469_v44 = vadd.f32 1e-05, %v1465_v43  ;;  %v1470_v45 = vadd.f32 1e-05, %v1466_v39 }
 0xca1   :  { %v1463_v37 = vpop.xlane.xlu1 %1462 }
 0xca2   :  { %2151 = vrsqrt.f32 %v1469_v44  ;;  %v1467_v47 = vmul.f32 0.0078125, %v1463_v37 }
 0xca3   :  { %2153 = vrsqrt.f32 %v1470_v45 }
 0xca4   :  { %v1471_v51 = vadd.f32 1e-05, %v1467_v47 }
 0xca6   :  { %2155 = vrsqrt.f32 %v1471_v51 }
 0xcab   :  { %v2150_v52 = vpop.eup %2149 }
 0xcac   :  { %v1476_v6 = vmul.f32 %v2150_v52, %v2745_v8 }
 0xcae   :  { %v1486_v59 = vmul.f32 %v1827_v53, %v1476_v6 }
 0xcaf   :  { %v2152_v56 = vpop.eup %2151 }
 0xcb0   :  { %v1477_v54 = vmul.f32 %v2152_v56, %v2749_v20  ;;  %v2154_v61 = vpop.eup %2153  ;;  %v2913_v16 = vadd.f32 %v1828_v62, %v1486_v59 }
 0xcb1   :  { %v1478_v8 = vmul.f32 %v2154_v61, %v2751_v22  ;;  %v1643_v22 = vld [vmem:[%s3002_s10 + $0xa0] sm:$0xff] }
 0xcb2   :  { %v1487_v63 = vmul.f32 %v1827_v53, %v1477_v54  ;;  %v1829_v61 = vld [vmem:[%s3006_s11] ss:$0 sm:$0xff] }
 0xcb3   :  { %v2156_v0 = vpop.eup %2155  ;;  %v1488_v4 = vmul.f32 %v1827_v53, %v1478_v8 }
 0xcb4   :  { %v2915_v2 = vadd.f32 %v1828_v62, %v1487_v63  ;;  %v1479_v17 = vmul.f32 %v2156_v0, %v2757_v50  ;;  %v1644_v50 = vld [vmem:[%s3002_s10 + $0xa8] sm:$0xff] }
 0xcb5   :  { %v2924_v11 = vadd.f32 %v1828_v62, %v1488_v4  ;;  %v1669_v13 = vpack.c.bf16 %v1644_v50, %v1643_v22 }
 0xcb6   :  { %v1532_v21 = vpack.c.bf16 %v2915_v2, %v2913_v16  ;;  %v1489_v20 = vmul.f32 %v1827_v53, %v1479_v17 }
 0xcb7   :  { %1894 = vmatprep.subr.bf16.mxu1 %v1669_v13 }
 0xcb8   :  { %1595 = vmatmul.mubr.bf16.vlgmr.msra.gmra.mxu0 %v1532_v21  ;;  %v2922_v7 = vadd.f32 %v1828_v62, %v1489_v20 }
 0xcb9   :  { %1604 = vmatprep.mubr.bf16.mxu0 %v2169_v3  ;;  %v1627_v3 = vld [vmem:[%s3002_s10 + $0x20] sm:$0xff] }
 0xcba   :  { %v1533_v12 = vpack.c.bf16 %v2922_v7, %v2924_v11  ;;  %v1661_v15 = vpack.c.bf16 %v1628_v14, %v1627_v3 }
 0xcbc   :  { %1895 = vmatpush3.bf16.msra.mxu1 %v1661_v15 }
 0xcbd   :  { %1896 = vmatprep.subr.bf16.mxu1 %v1668_v24 }
 0xcc0   :  { %1605 = vmatmul.mubr.bf16.gmra.mxu0 %v1533_v12  ;;  %1897 = vmatpush3.bf16.msra.mxu1 %v1660_v48 }
 0xcc1   :  { %1898 = vmatprep.subr.bf16.mxu1 %v1667_v46 }
 0xcc4   :  { %1899 = vmatpush3.bf16.msra.mxu1 %v1659_v27 }
 0xd78   :  { %v1596_v31 = vpop.f32.mrf.mxu0 }
 0xd79   :  { %v1597_v34 = vadd.f32 %v1596_v31, %v1555_v5 }
 0xd7a   :  { %v1598_v9 = vpop.f32.mrf.mxu0 }
 0xd7b   :  { %v1599_v32 = vadd.f32 %v1598_v9, %v1559_v23  ;;  %v1615_v42 = vmax.f32 %v1597_v34, 0.0 }
 0xd7c   :  { %v1600_v10 = vpop.f32.mrf.mxu0 }
 0xd7d   :  { %v1601_v33 = vadd.f32 %v1600_v10, %v1555_v5  ;;  %v1616_v40 = vmax.f32 %v1599_v32, 0.0 }
 0xd7e   :  { %v1602_v35 = vpop.f32.mrf.mxu0 }
 0xd7f   :  { %v1603_v55 = vadd.f32 %v1602_v35, %v1559_v23  ;;  %v1617_v36 = vmax.f32 %v1601_v33, 0.0 }
 0xd80   :  { %v1606_v38 = vpop.f32.mrf.mxu0 }
 0xd81   :  { %v1618_v41 = vmax.f32 %v1603_v55, 0.0  ;;  %v1655_v44 = vpack.c.bf16 %v1617_v36, %v1615_v42  ;;  %v1607_v1 = vadd.f32 %v1606_v38, %v1555_v5 }
 0xd82   :  { %v1608_v43 = vpop.f32.mrf.mxu0 }
 0xd83   :  { %v1656_v39 = vpack.c.bf16 %v1618_v41, %v1616_v40  ;;  %v1609_v57 = vadd.f32 %v1608_v43, %v1559_v23  ;;  %v1619_v53 = vmax.f32 %v1607_v1, 0.0 }
 0xd84   :  { %v1610_v45 = vpop.f32.mrf.mxu0 }
 0xd85   :  { %v1611_v58 = vadd.f32 %v1610_v45, %v1555_v5  ;;  %1714 = vmatprep.mubr.bf16.mxu1 %v1656_v39  ;;  %v1620_v52 = vmax.f32 %v1609_v57, 0.0  ;;  %v1830_v39 = vld [vmem:[%s3007_s12] ss:$0 sm:$0xff] }
 0xd86   :  { %v1612_v37 = vpop.f32.mrf.mxu0  ;;  %1715 = vmatmul.mubr.bf16.vlgmr.msra.gmra.mxu1 %v1655_v44  ;;  %v1831_v45 = vld [vmem:[%s3008_s13] ss:$0 sm:$0xff] }
 0xd87   :  { %v1613_v47 = vadd.f32 %v1612_v37, %v1559_v23  ;;  %v1621_v51 = vmax.f32 %v1611_v58, 0.0 }
 0xd89   :  { %v1622_v6 = vmax.f32 %v1613_v47, 0.0  ;;  %v1657_v54 = vpack.c.bf16 %v1621_v51, %v1619_v53 }
 0xd8b   :  { %v1658_v56 = vpack.c.bf16 %v1622_v6, %v1620_v52 }
 0xd8d   :  { %1722 = vmatprep.mubr.bf16.mxu1 %v1658_v56 }
 0xd8e   :  { %1723 = vmatmul.mubr.bf16.gmra.mxu1 %v1657_v54 }
 0xe46   :  { %v1900_v59 = vpop.f32.mrf.mxu1 }
 0xe48   :  { %v1901_v62 = vpop.f32.mrf.mxu1 }
 0xe49   :  { %v1902_v63 = vadd.f32 %v1901_v62, %v1900_v59 }
 0xe4a   :  { %v1903_v0 = vpop.f32.mrf.mxu1 }
 0xe4b   :  { %v1717_v8 = vadd.f32 %v1902_v63, %v1829_v61 }
 0xe4c   :  { %v1904_v17 = vpop.f32.mrf.mxu1 }
 0xe4d   :  { %v1905_v21 = vadd.f32 %v1904_v17, %v1903_v0  ;;  %v1731_v20 = vadd.f32 %v1717_v8, %v2913_v16 }
 0xe4e   :  { %v1906_v4 = vpop.f32.mrf.mxu1 }
 0xe4f   :  { %v1720_v12 = vadd.f32 %v1905_v21, %v1829_v61  ;;  %1737 = vadd.xlane.f32.xlu0 %v1731_v20 }
 0xe50   :  { %v1907_v22 = vpop.f32.mrf.mxu1 }
 0xe51   :  { %v1908_v50 = vadd.f32 %v1907_v22, %v1906_v4  ;;  %v1732_v13 = vadd.f32 %v1720_v12, %v2915_v2 }
 0xe52   :  { %v1909_v3 = vpop.f32.mrf.mxu1 }
 0xe53   :  { %v1725_v14 = vadd.f32 %v1908_v50, %v1829_v61  ;;  %1739 = vadd.xlane.f32.xlu1 %v1732_v13 }
 0xe54   :  { %v1910_v15 = vpop.f32.mrf.mxu1 }
 0xe55   :  { %v1911_v18 = vadd.f32 %v1910_v15, %v1909_v3  ;;  %v1733_v19 = vadd.f32 %v1725_v14, %v2924_v11 }
 0xe57   :  { %v1728_v24 = vadd.f32 %v1911_v18, %v1829_v61  ;;  %1741 = vadd.xlane.f32.xlu0 %v1733_v19 }
 0xe59   :  { %v1734_v26 = vadd.f32 %v1728_v24, %v2922_v7 }
 0xe5b   :  { %1743 = vadd.xlane.f32.xlu1 %v1734_v26 }
 0xed8   :  { %v1738_v16 = vpop.xlane.xlu0 %1737 }
 0xed9   :  { %v1745_v28 = vmul.f32 0.0078125, %v1738_v16 }
 0xedb   :  { %v1749_v48 = vsub.f32 %v1731_v20, %v1745_v28 }
 0xedc   :  { %v1740_v29 = vpop.xlane.xlu1 %1739 }
 0xedd   :  { %v1746_v30 = vmul.f32 0.0078125, %v1740_v29  ;;  %v1753_v46 = vmul.f32 %v1749_v48, %v1749_v48 }
 0xedf   :  { %v1750_v49 = vsub.f32 %v1732_v13, %v1746_v30  ;;  %1757 = vadd.xlane.f32.xlu0 %v1753_v46 }
 0xee0   :  { %v1742_v2 = vpop.xlane.xlu0 %1741 }
 0xee1   :  { %v1747_v60 = vmul.f32 0.0078125, %v1742_v2  ;;  %v1754_v27 = vmul.f32 %v1750_v49, %v1750_v49 }
 0xee3   :  { %v1751_v25 = vsub.f32 %v1733_v19, %v1747_v60  ;;  %1759 = vadd.xlane.f32.xlu1 %v1754_v27 }
 0xee4   :  { %v1744_v31 = vpop.xlane.xlu1 %1743 }
 0xee5   :  { %v1748_v11 = vmul.f32 0.0078125, %v1744_v31  ;;  %v1755_v23 = vmul.f32 %v1751_v25, %v1751_v25 }
 0xee7   :  { %v1752_v5 = vsub.f32 %v1734_v26, %v1748_v11  ;;  %1761 = vadd.xlane.f32.xlu0 %v1755_v23 }
 0xee9   :  { %v1756_v7 = vmul.f32 %v1752_v5, %v1752_v5 }
 0xeeb   :  { %1763 = vadd.xlane.f32.xlu1 %v1756_v7 }
 0xf68   :  { %v1758_v9 = vpop.xlane.xlu0 %1757 }
 0xf69   :  { %v1765_v10 = vmul.f32 0.0078125, %v1758_v9 }
 0xf6b   :  { %v1769_v32 = vadd.f32 1e-05, %v1765_v10 }
 0xf6c   :  { %v1760_v33 = vpop.xlane.xlu1 %1759 }
 0xf6d   :  { %2157 = vrsqrt.f32 %v1769_v32  ;;  %v1766_v34 = vmul.f32 0.0078125, %v1760_v33 }
 0xf6f   :  { %v1770_v35 = vadd.f32 1e-05, %v1766_v34 }
 0xf70   :  { %v1762_v55 = vpop.xlane.xlu0 %1761 }
 0xf71   :  { %2159 = vrsqrt.f32 %v1770_v35  ;;  %v1767_v36 = vmul.f32 0.0078125, %v1762_v55 }
 0xf73   :  { %v1771_v38 = vadd.f32 1e-05, %v1767_v36 }
 0xf74   :  { %v1764_v40 = vpop.xlane.xlu1 %1763 }
 0xf75   :  { %2161 = vrsqrt.f32 %v1771_v38  ;;  %v1768_v41 = vmul.f32 0.0078125, %v1764_v40 }
 0xf77   :  { %v1772_v42 = vadd.f32 1e-05, %v1768_v41 }
 0xf79   :  { %2163 = vrsqrt.f32 %v1772_v42 }
 0xf7a   :  { %v2158_v43 = vpop.eup %2157 }
 0xf7b   :  { %v1777_v44 = vmul.f32 %v2158_v43, %v1749_v48 }
 0xf7d   :  { %v1787_v57 = vmul.f32 %v1830_v39, %v1777_v44 }
 0xf7e   :  { %v2160_v58 = vpop.eup %2159 }
 0xf7f   :  { %v1797_v1 = vadd.f32 %v1831_v45, %v1787_v57  ;;  %v1778_v37 = vmul.f32 %v2160_v58, %v1750_v49 }
 0xf81   :  { %1801 = vst [vmem:[%s3009_s14] sm:$0xff] %v1797_v1  ;;  %v1788_v47 = vmul.f32 %v1830_v39, %v1778_v37 }
 0xf82   :  { %v2162_v51 = vpop.eup %2161 }
 0xf83   :  { %v1798_v52 = vadd.f32 %v1831_v45, %v1788_v47  ;;  %v1779_v6 = vmul.f32 %v2162_v51, %v1751_v25 }
 0xf85   :  { %1802 = vst [vmem:[%s3009_s14 + $0x8] sm:$0xff] %v1798_v52  ;;  %v1789_v53 = vmul.f32 %v1830_v39, %v1779_v6 }
 0xf86   :  { %v2164_v56 = vpop.eup %2163 }
 0xf87   :  { %v1799_v54 = vadd.f32 %v1831_v45, %v1789_v53  ;;  %v1780_v59 = vmul.f32 %v2164_v56, %v1752_v5 }
 0xf89   :  { %1803 = vst [vmem:[%s3009_s14 + $0x10] sm:$0xff] %v1799_v54  ;;  %v1790_v61 = vmul.f32 %v1830_v39, %v1780_v59 }
 0xf8b   :  { %v1800_v62 = vadd.f32 %v1831_v45, %v1790_v61 }
 0xf8d   :  { %1804 = vst [vmem:[%s3009_s14 + $0x18] sm:$0xff] %v1800_v62 }

</bundles_post_ra>
